<compile_context>
chip_gen: v7x
topology: tpu7x:2x2x1
jax: 0.10.0
libtpu: 0.0.40
codegen_flags: <defaults>
</compile_context>

<pallas_src>
import functools

import jax
import jax.numpy as jnp
from jax.experimental import pallas as pl
from jax.experimental.pallas import tpu as pltpu

PAD = 0  # ignore_index used by seq2seq.pytorch


def _add_loss_kernel(x_ref, w_ref, b_ref, t_ref, loss_ref, corr_ref,
                     m_ref, l_ref, tl_ref, *, n_rows, vocab, tm, tn,
                     exp_in_bf16):
    """Grid step (i, j): row tile i x vocab tile j (online softmax over j).

    x_ref: (tm, H) f32, w_ref: (H, tn) bf16, b_ref: (1, tn) f32,
    t_ref: (tm, 1) i32.
    loss_ref / corr_ref: (8, 128) per-row-tile partials (scalar at [0, 0]),
    written only on the last vocab step.
    m_ref / l_ref / tl_ref: (tm, 1) f32 running max / sum-exp / target logit.
    """
    i = pl.program_id(0)
    j = pl.program_id(1)
    nj = pl.num_programs(1)

    @pl.when(j == 0)
    def _init():
        m_ref[...] = jnp.full_like(m_ref, -jnp.inf)
        l_ref[...] = jnp.zeros_like(l_ref)
        tl_ref[...] = jnp.zeros_like(tl_ref)

    # Inner module: linear decoder.  bf16 MXU matmul with f32 accumulation;
    # the f32 -> bf16 cast of x happens here (saves a wrapper-side HBM pass).
    logits = jnp.dot(x_ref[...].astype(jnp.bfloat16), w_ref[...],
                     preferred_element_type=jnp.float32) + b_ref[...]

    tgt = t_ref[...]                                          # (tm, 1) int32
    col = j * tn + jax.lax.broadcasted_iota(jnp.int32, logits.shape, 1)
    if vocab % tn != 0:
        # Ragged last vocab tile: out-of-range columns must not win the max
        # or contribute to the sum-exp.
        logits = jnp.where(col < vocab, logits, -jnp.inf)

    # Online-softmax update (running max m, rescaled running sum-exp l).
    m_prev = m_ref[...]
    m_new = jnp.maximum(m_prev, jnp.max(logits, axis=-1, keepdims=True))
    alpha = jnp.exp(m_prev - m_new)
    shifted = logits - m_new
    if exp_in_bf16:
        # v6e/v7x only (packed bf16 EUP); do not enable on v5e.
        p = jnp.exp(shifted.astype(jnp.bfloat16)).astype(jnp.float32)
    else:
        p = jnp.exp(shifted)
    l_ref[...] = alpha * l_ref[...] + jnp.sum(p, axis=-1, keepdims=True)
    m_ref[...] = m_new
    # The target logit lives in exactly one vocab tile per row; accumulate it.
    tl_ref[...] += jnp.sum(jnp.where(col == tgt, logits, 0.0),
                           axis=-1, keepdims=True)

    @pl.when(j == nj - 1)
    def _finalize():
        valid = tgt != PAD
        if n_rows % tm != 0:
            # Ragged last row tile: rows beyond n_rows contain garbage.
            row = i * tm + jax.lax.broadcasted_iota(jnp.int32, tgt.shape, 0)
            valid = valid & (row < n_rows)
        m = m_ref[...]
        l = l_ref[...]
        tl = tl_ref[...]
        # CE with sum reduction & ignore_index: logsumexp(logits) - target_logit.
        per_row_loss = jnp.where(valid, jnp.log(l) + m - tl, 0.0)
        # Accuracy without an explicit argmax: target logit attains the max.
        # (Exact float ties count as correct; torch argmax picks first index.)
        correct = jnp.where(valid & (tl >= m), 1, 0)
        tile_loss = jnp.sum(per_row_loss)
        tile_corr = jnp.sum(correct).astype(jnp.int32)
        # Masked full-tile store of the per-tile scalars at [0, 0].  Kept in
        # place of a raw scalar VMEM store (not universally supported by
        # Mosaic); it runs once per row tile so the cost is negligible.
        r = jax.lax.broadcasted_iota(jnp.int32, loss_ref.shape, 0)
        c = jax.lax.broadcasted_iota(jnp.int32, loss_ref.shape, 1)
        at00 = (r == 0) & (c == 0)
        loss_ref[...] = jnp.where(at00, tile_loss, 0.0)
        corr_ref[...] = jnp.where(at00, tile_corr, 0)


def _round_up(a, m):
    return ((a + m - 1) // m) * m


def _vmem_estimate_bytes(tm, tn, hidden):
    """Honest per-step VMEM working-set estimate (includes epilogue temps)."""
    lane = 128
    x_tile = 2 * tm * hidden * 4          # f32 x rows, double-buffered
    w_tile = 2 * hidden * tn * 2          # bf16 W vocab slab, double-buffered
    b_tile = 2 * 8 * tn * 4               # (1, tn) f32 bias, sublane-padded
    t_tile = 2 * tm * lane * 4            # (tm, 1) i32 targets, lane-padded
    outs = 2 * 2 * 8 * lane * 4           # two (8, 128) partial outputs
    scratch = 3 * tm * lane * 4           # m / l / target-logit, lane-padded
    epilogue = 5 * tm * tn * 4            # logits, col iota, mask/select, exp temps
    return x_tile + w_tile + b_tile + t_tile + outs + scratch + epilogue


def _vmem_cap_bytes():
    """Scoped-VMEM ceiling: 75% of physical, leaving compiler headroom."""
    try:
        phys = int(pltpu.get_tpu_info().vmem_capacity_bytes)
    except Exception:
        phys = 64 * 1024 * 1024           # conservative fallback: v7x per-TC VMEM
    return (phys * 3) // 4


def add_loss_forward(x, w, b, target, *, tm=512, tn_max=2048,
                     exp_in_bf16=False):
    """Returns (loss (1,1) f32, accuracy (1,1) i32) just like AddLossModule."""
    B, T, H = x.shape
    V = w.shape[1]
    N = B * T

    # Row tile: multiple of 8, no larger than the (rounded-up) row count.
    tm = max(8, min(_round_up(tm, 8), _round_up(N, 8)))
    # Vocab tile: multiple of 128, capped at tn_max and the rounded-up vocab.
    tn = max(128, min((tn_max // 128) * 128, _round_up(V, 128)))
    cap = _vmem_cap_bytes()
    while int(1.25 * _vmem_estimate_bytes(tm, tn, H)) > cap and tn > 128:
        tn = max(128, ((tn // 2) // 128) * 128)
    # TODO(synk): if the estimate still exceeds the cap (very large H), shrink tm too.

    num_row_tiles = pl.cdiv(N, tm)
    num_vtiles = pl.cdiv(V, tn)

    # No wrapper-side cast / pad of x: reshape is free, the bf16 cast happens
    # in-kernel and ragged row/vocab tails are masked in-kernel.
    x_flat = x.reshape(N, H)
    t_flat = target.reshape(N, 1).astype(jnp.int32)
    w_bf16 = w.astype(jnp.bfloat16)       # no-op if weights are already bf16
    b2 = b.reshape(1, V).astype(jnp.float32)

    vmem_limit = min(cap, max(int(1.25 * _vmem_estimate_bytes(tm, tn, H)),
                              32 * 1024 * 1024))

    kernel = functools.partial(_add_loss_kernel, n_rows=N, vocab=V, tm=tm,
                               tn=tn, exp_in_bf16=exp_in_bf16)

    loss_part, corr_part = pl.pallas_call(
        kernel,
        out_shape=(jax.ShapeDtypeStruct((num_row_tiles * 8, 128), jnp.float32),
                   jax.ShapeDtypeStruct((num_row_tiles * 8, 128), jnp.int32)),
        grid_spec=pltpu.PrefetchScalarGridSpec(
            num_scalar_prefetch=0,
            grid=(num_row_tiles, num_vtiles),
            in_specs=[
                pl.BlockSpec((tm, H), lambda i, j: (i, 0)),   # x rows (f32)
                pl.BlockSpec((H, tn), lambda i, j: (0, j)),   # W vocab slab (bf16)
                pl.BlockSpec((1, tn), lambda i, j: (0, j)),   # bias slab (f32)
                pl.BlockSpec((tm, 1), lambda i, j: (i, 0)),   # targets (i32)
            ],
            out_specs=[
                pl.BlockSpec((8, 128), lambda i, j: (i, 0)),  # loss partial
                pl.BlockSpec((8, 128), lambda i, j: (i, 0)),  # correct partial
            ],
            scratch_shapes=[
                pltpu.VMEM((tm, 1), jnp.float32),   # running row max
                pltpu.VMEM((tm, 1), jnp.float32),   # running sum-exp
                pltpu.VMEM((tm, 1), jnp.float32),   # target logit
            ],
        ),
        compiler_params=pltpu.CompilerParams(
            dimension_semantics=("parallel", "arbitrary"),
            vmem_limit_bytes=vmem_limit),
    )(x_flat, w_bf16, b2, t_flat)

    # Tiny final reduction over per-row-tile partials (exact: counts are int32).
    loss = jnp.sum(loss_part).reshape(1, 1)
    accuracy = jnp.sum(corr_part).reshape(1, 1)
    return loss, accuracy


def _reference(x, w, b, target):
    """Pure-JAX reference using the same bf16 matmul / f32 accumulation."""
    B, T, H = x.shape
    V = w.shape[1]
    logits = jnp.dot(x.reshape(-1, H).astype(jnp.bfloat16),
                     w.astype(jnp.bfloat16),
                     preferred_element_type=jnp.float32) + b.reshape(1, V)
    tgt = target.reshape(-1)
    logp = jax.nn.log_softmax(logits, axis=-1)
    nll = -jnp.take_along_axis(logp, tgt[:, None], axis=-1)[:, 0]
    valid = tgt != PAD
    loss = jnp.sum(jnp.where(valid, nll, 0.0)).reshape(1, 1)
    argmax = jnp.argmax(logits, axis=-1)
    acc = jnp.sum(jnp.where(valid & (argmax == tgt), 1, 0)).reshape(1, 1)
    return loss, acc


def _check(x, w, b, target, **kwargs):
    loss, acc = add_loss_forward(x, w, b, target, **kwargs)
    loss, acc = jax.block_until_ready((loss, acc))
    ref_loss, ref_acc = _reference(x, w, b, target)
    assert jnp.allclose(loss, ref_loss, rtol=2e-3, atol=1e-1), (loss, ref_loss)
    assert int(acc[0, 0]) == int(ref_acc[0, 0]), (acc, ref_acc)


if __name__ == "__main__":
    key = jax.random.PRNGKey(0)
    k = jax.random.split(key, 8)

    # Config 1: multi-tile grid with a ragged row tile (400 = 256 + 144) and a
    # ragged vocab tile (384 = 256 + 128) - exercises every mask path.
    B, T, H, V = 4, 100, 128, 384
    x = jax.random.normal(k[0], (B, T, H), dtype=jnp.float32)
    w = 0.1 * jax.random.normal(k[1], (H, V), dtype=jnp.float32)
    b = 0.1 * jax.random.normal(k[2], (V,), dtype=jnp.float32)
    target = jax.random.randint(k[3], (B, T), 0, V, dtype=jnp.int32)
    target = target.at[:, -8:].set(PAD)          # exercise ignore_index
    _check(x, w, b, target, tm=256, tn_max=256)

    # Config 2: single row tile / single vocab tile (default tiling).
    B, T, H, V = 2, 64, 256, 512
    x = jax.random.normal(k[4], (B, T, H), dtype=jnp.float32)
    w = 0.1 * jax.random.normal(k[5], (H, V), dtype=jnp.float32)
    b = 0.1 * jax.random.normal(k[6], (V,), dtype=jnp.float32)
    target = jax.random.randint(k[7], (B, T), 0, V, dtype=jnp.int32)
    target = target.at[:, -4:].set(PAD)
    _check(x, w, b, target)

    print("KERNEL_OK")
</pallas_src>

<mosaic_0001>
module attributes {stable_mosaic.version = 11 : i64} {
  func.func @_add_loss_kernel(%arg0: i32, %arg1: i32, %arg2: memref<256x128xf32, #tpu.memory_space<vmem>>, %arg3: memref<128x256xbf16, #tpu.memory_space<vmem>>, %arg4: memref<1x256xf32, #tpu.memory_space<vmem>>, %arg5: memref<256x1xi32, #tpu.memory_space<vmem>>, %arg6: memref<8x128xf32, #tpu.memory_space<vmem>>, %arg7: memref<8x128xi32, #tpu.memory_space<vmem>>, %arg8: memref<256x1xf32, #tpu.memory_space<vmem>>, %arg9: memref<256x1xf32, #tpu.memory_space<vmem>>, %arg10: memref<256x1xf32, #tpu.memory_space<vmem>>) attributes {dimension_semantics = [#tpu.dimension_semantics<parallel>, #tpu.dimension_semantics<arbitrary>], iteration_bounds = array<i64: 2, 2>, scalar_prefetch = 0 : i64, scratch_operands = 3 : i64, tpu.core_type = #tpu.core_type<tc>, window_params = [{transform_indices = @transform_0, window_bounds = array<i64: 256, 128>}, {transform_indices = @transform_1, window_bounds = array<i64: 128, 256>}, {transform_indices = @transform_2, window_bounds = array<i64: 1, 256>}, {transform_indices = @transform_3, window_bounds = array<i64: 256, 1>}, {transform_indices = @transform_4, window_bounds = array<i64: 8, 128>}, {transform_indices = @transform_5, window_bounds = array<i64: 8, 128>}]} {
    %c0_i32 = arith.constant 0 : i32
    %0 = arith.cmpi eq, %arg1, %c0_i32 : i32
    %1 = arith.extui %0 : i1 to i32
    %c0_i32_0 = arith.constant 0 : i32
    %2 = arith.cmpi ne, %1, %c0_i32_0 : i32
    scf.if %2 {
      %cst_26 = arith.constant 0xFF800000 : f32
      %47 = vector.broadcast %cst_26 : f32 to vector<256x1xf32>
      %c0_27 = arith.constant 0 : index
      %c0_28 = arith.constant 0 : index
      %48 = vector.load %arg8[%c0_27, %c0_28] : memref<256x1xf32, #tpu.memory_space<vmem>>, vector<256x1xf32>
      tpu.vector_store %arg8[%c0_27, %c0_28], %47 {strides = array<i32>} : memref<256x1xf32, #tpu.memory_space<vmem>>, vector<256x1xf32>,
      %cst_29 = arith.constant 0.000000e+00 : f32
      %49 = vector.broadcast %cst_29 : f32 to vector<256x1xf32>
      %c0_30 = arith.constant 0 : index
      %c0_31 = arith.constant 0 : index
      %50 = vector.load %arg9[%c0_30, %c0_31] : memref<256x1xf32, #tpu.memory_space<vmem>>, vector<256x1xf32>
      tpu.vector_store %arg9[%c0_30, %c0_31], %49 {strides = array<i32>} : memref<256x1xf32, #tpu.memory_space<vmem>>, vector<256x1xf32>,
      %cst_32 = arith.constant 0.000000e+00 : f32
      %51 = vector.broadcast %cst_32 : f32 to vector<256x1xf32>
      %c0_33 = arith.constant 0 : index
      %c0_34 = arith.constant 0 : index
      %52 = vector.load %arg10[%c0_33, %c0_34] : memref<256x1xf32, #tpu.memory_space<vmem>>, vector<256x1xf32>
      tpu.vector_store %arg10[%c0_33, %c0_34], %51 {strides = array<i32>} : memref<256x1xf32, #tpu.memory_space<vmem>>, vector<256x1xf32>,
    } else {
    }
    %c0 = arith.constant 0 : index
    %c0_1 = arith.constant 0 : index
    %3 = vector.load %arg2[%c0, %c0_1] : memref<256x128xf32, #tpu.memory_space<vmem>>, vector<256x128xf32>
    %4 = arith.truncf %3 : vector<256x128xf32> to vector<256x128xbf16>
    %c0_2 = arith.constant 0 : index
    %c0_3 = arith.constant 0 : index
    %5 = vector.load %arg3[%c0_2, %c0_3] : memref<128x256xbf16, #tpu.memory_space<vmem>>, vector<128x256xbf16>
    %cst = arith.constant dense<0.000000e+00> : vector<256x256xf32>
    %6 = tpu.matmul %4, %5, %cst {dimension_numbers = #tpu.dot_dimension_numbers<[1], [0], [0], [1], [0, 0, 1, 1], [], []>} : vector<256x128xbf16>, vector<128x256xbf16>, vector<256x256xf32> -> vector<256x256xf32>
    %c0_4 = arith.constant 0 : index
    %c0_5 = arith.constant 0 : index
    %7 = vector.load %arg4[%c0_4, %c0_5] : memref<1x256xf32, #tpu.memory_space<vmem>>, vector<1x256xf32>
    %8 = vector.broadcast %7 : vector<1x256xf32> to vector<256x256xf32>
    %9 = arith.addf %6, %8 : vector<256x256xf32>
    %c0_6 = arith.constant 0 : index
    %c0_7 = arith.constant 0 : index
    %10 = vector.load %arg5[%c0_6, %c0_7] : memref<256x1xi32, #tpu.memory_space<vmem>>, vector<256x1xi32>
    %c256_i32 = arith.constant 256 : i32
    %11 = arith.muli %arg1, %c256_i32 : i32
    %12 = tpu.iota {dimensions = array<i32: 1>} : vector<256x256xi32>
    %13 = vector.broadcast %11 : i32 to vector<256x256xi32>
    %14 = arith.addi %13, %12 : vector<256x256xi32>
    %c384_i32 = arith.constant 384 : i32
    %15 = vector.broadcast %c384_i32 : i32 to vector<256x256xi32>
    %16 = arith.cmpi slt, %14, %15 : vector<256x256xi32>
    %cst_8 = arith.constant 0xFF800000 : f32
    %17 = vector.broadcast %cst_8 : f32 to vector<256x256xf32>
    %18 = arith.select %16, %9, %17 : vector<256x256xi1>, vector<256x256xf32>
    %c0_9 = arith.constant 0 : index
    %c0_10 = arith.constant 0 : index
    %19 = vector.load %arg8[%c0_9, %c0_10] : memref<256x1xf32, #tpu.memory_space<vmem>>, vector<256x1xf32>
    %cst_11 = arith.constant dense<0xFF800000> : vector<256xf32>
    %20 = vector.multi_reduction <maximumf>, %18, %cst_11 [1] : vector<256x256xf32> to vector<256xf32>
    %21 = vector.shape_cast %20 : vector<256xf32> to vector<256x1xf32>
    %22 = arith.maximumf %19, %21 : vector<256x1xf32>
    %23 = arith.subf %19, %22 : vector<256x1xf32>
    %24 = math.exp %23 : vector<256x1xf32>
    %25 = vector.broadcast %22 : vector<256x1xf32> to vector<256x256xf32>
    %26 = arith.subf %18, %25 : vector<256x256xf32>
    %27 = math.exp %26 : vector<256x256xf32>
    %c0_12 = arith.constant 0 : index
    %c0_13 = arith.constant 0 : index
    %28 = vector.load %arg9[%c0_12, %c0_13] : memref<256x1xf32, #tpu.memory_space<vmem>>, vector<256x1xf32>
    %29 = arith.mulf %24, %28 : vector<256x1xf32>
    %cst_14 = arith.constant dense<0.000000e+00> : vector<256xf32>
    %30 = vector.multi_reduction <add>, %27, %cst_14 [1] : vector<256x256xf32> to vector<256xf32>
    %31 = vector.shape_cast %30 : vector<256xf32> to vector<256x1xf32>
    %32 = arith.addf %29, %31 : vector<256x1xf32>
    %c0_15 = arith.constant 0 : index
    %c0_16 = arith.constant 0 : index
    %33 = vector.load %arg9[%c0_15, %c0_16] : memref<256x1xf32, #tpu.memory_space<vmem>>, vector<256x1xf32>
    tpu.vector_store %arg9[%c0_15, %c0_16], %32 {strides = array<i32>} : memref<256x1xf32, #tpu.memory_space<vmem>>, vector<256x1xf32>,
    %c0_17 = arith.constant 0 : index
    %c0_18 = arith.constant 0 : index
    %34 = vector.load %arg8[%c0_17, %c0_18] : memref<256x1xf32, #tpu.memory_space<vmem>>, vector<256x1xf32>
    tpu.vector_store %arg8[%c0_17, %c0_18], %22 {strides = array<i32>} : memref<256x1xf32, #tpu.memory_space<vmem>>, vector<256x1xf32>,
    %c0_19 = arith.constant 0 : index
    %c0_20 = arith.constant 0 : index
    %35 = vector.load %arg10[%c0_19, %c0_20] : memref<256x1xf32, #tpu.memory_space<vmem>>, vector<256x1xf32>
    %36 = vector.broadcast %10 : vector<256x1xi32> to vector<256x256xi32>
    %37 = arith.cmpi eq, %14, %36 : vector<256x256xi32>
    %cst_21 = arith.constant 0.000000e+00 : f32
    %38 = vector.broadcast %cst_21 : f32 to vector<256x256xf32>
    %39 = arith.select %37, %18, %38 : vector<256x256xi1>, vector<256x256xf32>
    %cst_22 = arith.constant dense<0.000000e+00> : vector<256xf32>
    %40 = vector.multi_reduction <add>, %39, %cst_22 [1] : vector<256x256xf32> to vector<256xf32>
    %41 = vector.shape_cast %40 : vector<256xf32> to vector<256x1xf32>
    %42 = arith.addf %35, %41 : vector<256x1xf32>
    %c0_23 = arith.constant 0 : index
    %c0_24 = arith.constant 0 : index
    %43 = vector.load %arg10[%c0_23, %c0_24] : memref<256x1xf32, #tpu.memory_space<vmem>>, vector<256x1xf32>
    tpu.vector_store %arg10[%c0_23, %c0_24], %42 {strides = array<i32>} : memref<256x1xf32, #tpu.memory_space<vmem>>, vector<256x1xf32>,
    %c1_i32 = arith.constant 1 : i32
    %44 = arith.cmpi eq, %arg1, %c1_i32 : i32
    %45 = arith.extui %44 : i1 to i32
    %c0_i32_25 = arith.constant 0 : i32
    %46 = arith.cmpi ne, %45, %c0_i32_25 : i32
    scf.if %46 {
      %c0_i32_26 = arith.constant 0 : i32
      %47 = vector.broadcast %c0_i32_26 : i32 to vector<256x1xi32>
      %48 = arith.cmpi ne, %10, %47 : vector<256x1xi32>
      %c256_i32_27 = arith.constant 256 : i32
      %49 = arith.muli %arg0, %c256_i32_27 : i32
      %50 = tpu.iota {dimensions = array<i32: 0>} : vector<256x1xi32>
      %51 = vector.broadcast %49 : i32 to vector<256x1xi32>
      %52 = arith.addi %51, %50 : vector<256x1xi32>
      %c400_i32 = arith.constant 400 : i32
      %53 = vector.broadcast %c400_i32 : i32 to vector<256x1xi32>
      %54 = arith.cmpi slt, %52, %53 : vector<256x1xi32>
      %55 = arith.andi %48, %54 : vector<256x1xi1>
      %c0_28 = arith.constant 0 : index
      %c0_29 = arith.constant 0 : index
      %56 = vector.load %arg8[%c0_28, %c0_29] : memref<256x1xf32, #tpu.memory_space<vmem>>, vector<256x1xf32>
      %c0_30 = arith.constant 0 : index
      %c0_31 = arith.constant 0 : index
      %57 = vector.load %arg9[%c0_30, %c0_31] : memref<256x1xf32, #tpu.memory_space<vmem>>, vector<256x1xf32>
      %c0_32 = arith.constant 0 : index
      %c0_33 = arith.constant 0 : index
      %58 = vector.load %arg10[%c0_32, %c0_33] : memref<256x1xf32, #tpu.memory_space<vmem>>, vector<256x1xf32>
      %59 = math.log %57 : vector<256x1xf32>
      %60 = arith.addf %59, %56 : vector<256x1xf32>
      %61 = arith.subf %60, %58 : vector<256x1xf32>
      %cst_34 = arith.constant 0.000000e+00 : f32
      %62 = vector.broadcast %cst_34 : f32 to vector<256x1xf32>
      %63 = arith.select %55, %61, %62 : vector<256x1xi1>, vector<256x1xf32>
      %64 = arith.cmpf oge, %58, %56 : vector<256x1xf32>
      %65 = arith.andi %55, %64 : vector<256x1xi1>
      %c1_i32_35 = arith.constant 1 : i32
      %c0_i32_36 = arith.constant 0 : i32
      %66 = vector.broadcast %c1_i32_35 : i32 to vector<256x1xi32>
      %67 = vector.broadcast %c0_i32_36 : i32 to vector<256x1xi32>
      %68 = arith.select %65, %66, %67 : vector<256x1xi1>, vector<256x1xi32>
      %69 = vector.shape_cast %63 : vector<256x1xf32> to vector<1x256x1xf32>
      %cst_37 = arith.constant dense<0.000000e+00> : vector<1xf32>
      %70 = vector.multi_reduction <add>, %69, %cst_37 [1, 2] : vector<1x256x1xf32> to vector<1xf32>
      %71 = vector.shape_cast %70 : vector<1xf32> to vector<1x1x1xf32>
      %72 = vector.extract %71[0, 0, 0] : f32 from vector<1x1x1xf32>
      %73 = vector.shape_cast %68 : vector<256x1xi32> to vector<1x256x1xi32>
      %cst_38 = arith.constant dense<0> : vector<1xi32>
      %74 = vector.multi_reduction <add>, %73, %cst_38 [1, 2] : vector<1x256x1xi32> to vector<1xi32>
      %75 = vector.shape_cast %74 : vector<1xi32> to vector<1x1x1xi32>
      %76 = vector.extract %75[0, 0, 0] : i32 from vector<1x1x1xi32>
      %77 = tpu.iota {dimensions = array<i32: 0>} : vector<8x128xi32>
      %78 = tpu.iota {dimensions = array<i32: 1>} : vector<8x128xi32>
      %c0_i32_39 = arith.constant 0 : i32
      %79 = vector.broadcast %c0_i32_39 : i32 to vector<8x128xi32>
      %80 = arith.cmpi eq, %77, %79 : vector<8x128xi32>
      %c0_i32_40 = arith.constant 0 : i32
      %81 = vector.broadcast %c0_i32_40 : i32 to vector<8x128xi32>
      %82 = arith.cmpi eq, %78, %81 : vector<8x128xi32>
      %83 = arith.andi %80, %82 : vector<8x128xi1>
      %cst_41 = arith.constant 0.000000e+00 : f32
      %84 = vector.broadcast %72 : f32 to vector<8x128xf32>
      %85 = vector.broadcast %cst_41 : f32 to vector<8x128xf32>
      %86 = arith.select %83, %84, %85 : vector<8x128xi1>, vector<8x128xf32>
      %c0_42 = arith.constant 0 : index
      %c0_43 = arith.constant 0 : index
      %87 = vector.load %arg6[%c0_42, %c0_43] : memref<8x128xf32, #tpu.memory_space<vmem>>, vector<8x128xf32>
      tpu.vector_store %arg6[%c0_42, %c0_43], %86 {strides = array<i32>} : memref<8x128xf32, #tpu.memory_space<vmem>>, vector<8x128xf32>,
      %c0_i32_44 = arith.constant 0 : i32
      %88 = vector.broadcast %76 : i32 to vector<8x128xi32>
      %89 = vector.broadcast %c0_i32_44 : i32 to vector<8x128xi32>
      %90 = arith.select %83, %88, %89 : vector<8x128xi1>, vector<8x128xi32>
      %c0_45 = arith.constant 0 : index
      %c0_46 = arith.constant 0 : index
      %91 = vector.load %arg7[%c0_45, %c0_46] : memref<8x128xi32, #tpu.memory_space<vmem>>, vector<8x128xi32>
      tpu.vector_store %arg7[%c0_45, %c0_46], %90 {strides = array<i32>} : memref<8x128xi32, #tpu.memory_space<vmem>>, vector<8x128xi32>,
    } else {
    }
    return
  }
  func.func @transform_0(%arg0: i32, %arg1: i32) -> (i32, i32) {
    %c0_i32 = arith.constant 0 : i32
    %c0_i32_0 = arith.constant 0 : i32
    return %arg0, %c0_i32 : i32, i32
  }
  func.func @transform_1(%arg0: i32, %arg1: i32) -> (i32, i32) {
    %c0_i32 = arith.constant 0 : i32
    %c0_i32_0 = arith.constant 0 : i32
    return %c0_i32, %arg1 : i32, i32
  }
  func.func @transform_2(%arg0: i32, %arg1: i32) -> (i32, i32) {
    %c0_i32 = arith.constant 0 : i32
    %c0_i32_0 = arith.constant 0 : i32
    return %c0_i32, %arg1 : i32, i32
  }
  func.func @transform_3(%arg0: i32, %arg1: i32) -> (i32, i32) {
    %c0_i32 = arith.constant 0 : i32
    %c0_i32_0 = arith.constant 0 : i32
    return %arg0, %c0_i32 : i32, i32
  }
  func.func @transform_4(%arg0: i32, %arg1: i32) -> (i32, i32) {
    %c0_i32 = arith.constant 0 : i32
    %c0_i32_0 = arith.constant 0 : i32
    return %arg0, %c0_i32 : i32, i32
  }
  func.func @transform_5(%arg0: i32, %arg1: i32) -> (i32, i32) {
    %c0_i32 = arith.constant 0 : i32
    %c0_i32_0 = arith.constant 0 : i32
    return %arg0, %c0_i32 : i32, i32
  }
}

</mosaic_0001>

<bundles_post_ra>
// kernel: tpu_custom_call.1
= control target key start
LH: loop header
LB: loop body
LE: loop exit
PB: predicated region body
PF: predicated region fallthrough
CT: control target
= control target key end

     0   :  { %s6796_s0 = inlined_call_operand.vmem [shape: f32[400,128], index: 0, kind: input, shape index: {}]   ;;  %s6797_s1 = inlined_call_operand.hbm [shape: bf16[128,384], index: 1, kind: input, shape index: {}]   ;;  %s6798_s2 = inlined_call_operand.vmem [shape: f32[1,384], index: 2, kind: input, shape index: {}]   ;;  %s6799_s3 = inlined_call_operand.vmem [shape: s32[400,1], index: 3, kind: input, shape index: {}]   ;;  %s6800_s4 = inlined_call_operand.hbm [shape: f32[16,128], index: 4, kind: output, shape index: {0}]   ;;  %s6801_s5 = inlined_call_operand.hbm [shape: s32[16,128], index: 5, kind: output, shape index: {1}]  }
   0x1   :  { %7093 = sst [smem:[#allocation219_spill]] %s6797_s1 }
   0x2   :  { %11 = vsyncpa [#allocation6], 0 }
   0x3   :  { %13 = vsyncpa [#allocation6 + $0x1], 0 }
   0x4   :  { %14 = vsyncpa [#allocation7], 0 }
   0x5   :  { %16 = vsyncpa [#allocation7 + $0x1], 0 }
   0x6   :  { %17 = vsyncpa [#allocation10], 0 }
   0x7   :  { %19 = vsyncpa [#allocation10 + $0x1], 0  ;;  %s3780_s18 = smov 0   ;;  %s3782_s19 = smov 0  }
   0x8   :  { %s3784_s20 = smov 0   ;;  %s3786_s21 = smov 0  }
   0x9   :  { %s3788_s22 = smov 0   ;;  %s3790_s23 = smov 0  }
   0xa   :  { %s3792_s24 = smov 0   ;;  %s3794_s25 = smov 0  }
   0xb   :  { %s3796_s26 = smov 0   ;;  %s3798_s27 = smov 0  }
   0xc   :  { %s3800_s28 = smov 0  }
   0xd LB: > { %7094 = sst [smem:[#allocation14_spill]] %s3719_s23  ;;  %s3098_s29 = sadd.s32 4294967295, %s3739_s28   ;;  %s3739_s28 = sphi %s3800_s28, %s25_s28   ;;  %s3735_s27 = sphi %s3798_s27, %s7845_s27   ;;  %s3731_s26 = sphi %s3796_s26, %s7844_s26   ;;  %s3727_s25 = sphi %s3794_s25, %s7843_s25   ;;  %s3723_s24 = sphi %s3792_s24, %s7842_s24   ;;  %s3719_s23 = sphi %s3790_s23, %s7841_s23   ;;  %s3715_s22 = sphi %s3788_s22, %s7850_s22   ;;  %s3711_s21 = sphi %s3786_s21, %s7849_s21   ;;  %s3707_s20 = sphi %s3784_s20, %s7848_s20   ;;  %s3703_s19 = sphi %s3782_s19, %s7847_s19   ;;  %s3699_s18 = sphi %s3780_s18, %s7846_s18  }
   0xe   : > { %7095 = sst [smem:[#allocation15_spill]] %s3731_s26  ;;  %s3099_s30 = sadd.s32 4294967294, %s3739_s28  }
   0xf   : > { %7096 = sst [smem:[#allocation16_spill]] %s3735_s27  ;;  %s34_s6 = sadd.s32 1, %s3731_s26 }
  0x10   : > { %s37_s7 = sadd.s32 1, %s3735_s27  ;;  %p35_p0 = scmp.ge.s32.totalorder %s34_s6, 2 }
  0x11   : > { %s70_s8 = sadd.s32 1, %s3719_s23  ;;  %p77_p1 = scmp.ne.s32.totalorder %s3719_s23, %s3715_s22 }
  0x12   : > { %p78_p2 = scmp.eq.s32.totalorder %s3739_s28, 0  ;;  %s7852_s6 = smov (%p35_p0, %s34_s6), 0 }
  0x13   : > { %7097 = sst [smem:[#allocation17_spill]] %s7852_s6  ;;  %s7854_s7 = smov (!%p35_p0, %s37_s7), %s3735_s27 }
  0x14   : > { %s67_s9 = ssub.s32 %s3731_s26, %s7852_s6  ;;  %p3846_p3 = por %p78_p2, %p77_p1 }
  0x15   : > { %p39_p4 = scmp.ge.s32.totalorder %s7854_s7, 2  ;;  %p68_p5 = scmp.eq.s32.totalorder %s67_s9, 0 }
  0x16   : > { %p83_p6 = scmp.ne.s32.totalorder %s3715_s22, %s3711_s21  ;;  %p84_p7 = scmp.eq.s32.totalorder %s3098_s29, 0 }
  0x17   : > { %s7856_s7 = smov (%p39_p4, %s7854_s7), 0  ;;  %s148_s14 = sadd.s32 1, %s3707_s20 }
  0x18   : > { %7099 = sst [smem:[#allocation18_spill]] %s7856_s7  ;;  %p3856_p8 = por %p84_p7, %p83_p6 }
  0x19   : > { %s3854_s11 = scalar_select %p68_p5, %s3719_s23, %s70_s8  }
  0x1a   : > { %s145_s13 = ssub.s32 %s3735_s27, %s7856_s7  ;;  %p158_p10 = scmp.ne.s32.totalorder %s3707_s20, %s3703_s19 }
  0x1b   : > { %7100 = sst [smem:[#allocation19_spill]] %s3854_s11  ;;  %p146_p9 = scmp.eq.s32.totalorder %s145_s13, 0 }
  0x1c   : > { %p159_p11 = scmp.eq.s32.totalorder %s3098_s29, 3  ;;  %p164_p13 = scmp.ne.s32.totalorder %s3703_s19, %s3699_s18 }
  0x1d   : > { %s3866_s15 = scalar_select %p146_p9, %s3707_s20, %s148_s14  }
  0x1e   : > { %p3868_p12 = por %p159_p11, %p158_p10  ;;  %p165_p0 = scmp.eq.s32.totalorder %s3099_s30, 3 }
  0x1f   : > { %p3101_p2 = scmp.ge.s32.totalorder %s3739_s28, 4 }
  0x20   : > { %p3874_p1 = por %p165_p0, %p164_p13 }
  0x21   : > { %207 = sbr.rel (%p3101_p2) target bundleno = 80 (0x50), region = 16 }
  0x22   : > { %s7103_s17 = scalar_select %p3874_p1, 1, 0 }
  0x28   : > { %227 = sbr.rel (!%p3846_p3) target bundleno = 80 (0x50), region = 24  ;;  %s228_s21 = sand.u32 (%p3846_p3), 1, %s3719_s23  }
  0x29   : > { %s3103_s29 = sshll.u32 (%p3846_p3), %s3731_s26, 1  ;;  %s3102_s8 = sshll.u32 (%p3846_p3), %s228_s21, 7 }
  0x2a   : > { %s234_s9 = ssub.s32 (%p3846_p3), 3, %s3103_s29  ;;  %s3889_s14 = scalar_lea.sflag (%p3846_p3), [#allocation6], %s228_s21 }
  0x2b   : > { %p235_p4 = scmp.lt.s32.totalorder (%p3846_p3), %s234_s9, 2  ;;  %s232_s7 = scalar_lea.vmem (%p3846_p3), [#allocation5], %s3102_s8 }
  0x2f   : > { %s7858_s9 = smov (!%p235_p4, %s234_s9), 2 }
  0x30   : > { %s3886_s30 = sshll.u32 %s7858_s9, 10 }
  0x31   : > { %s239_s13 = ssub.s32 2048, %s3886_s30 }
  0x32   : > { %240 = vsyncadd %s3889_s14, %s239_s13  ;;  %p3105_p3 = scmp.ne.s32.totalorder %s3886_s30, 0  ;;  %s3145_s10 = sshll.u32 %s3731_s26, 7 }
  0x33   : > { %s7104_s1 = sld [smem:[#allocation219_spill]]  ;;  %s3107_s21 = sshll.u32 %s7858_s9, 2 }
  0x34   : > { %s246_s11 = sshll.u32 %s232_s7, 4  ;;  %s3900_s11 = int_to_ptr.vmem [resolvable:$true] %s246_s11 }
  0x39   : > { %s3897_s27 = scalar_lea.hbm %s7104_s1, %s3145_s10  ;;  %s3561_s23 = scalar_lea.hbm %s7104_s1, 3072 }
  0x3a   : > { %s3557_s8 = scalar_lea.hbm %s3897_s27, %s3886_s30  ;;  %p3562_p9 = scmp.lt.u32.totalorder %s3897_s27, %s7104_s1 }
  0x3b   : > { %p3558_p5 = scmp.ne.s32.totalorder %s3897_s27, %s3557_s8  ;;  %p3563_p10 = scmp.lt.u32.totalorder %s3561_s23, %s3557_s8 }
  0x3c   : > { %p3565_p13 = scmp.lt.u32.totalorder %s3557_s8, %s3897_s27 }
  0x3d   : > { %p3559_p6 = pnand %p3558_p5, %p3105_p3  ;;  %p3564_p11 = por %p3563_p10, %p3562_p9 }
  0x3f   : > { %p3560_p7 = pneg %p3559_p6  ;;  %p3566_p0 = por %p3565_p13, %p3564_p11 }
  0x41   : > { %p3567_p2 = pnand %p3566_p0, %p3560_p7 }
  0x43   : > { %3570 = shalt.err (!%p3567_p2)
}
  0x44   : > { %s3571_s7 = scalar_lea.vmem %s3900_s11, %s3886_s30  ;;  %s3741_s26 = smov [#allocation5]  }
  0x45   : > { %p3572_p4 = scmp.ne.s32.totalorder %s3900_s11, %s3571_s7  ;;  %s3575_s29 = sshll.u32 %s3741_s26, 4  ;;  %s3576_s29 = int_to_ptr.vmem [resolvable:$false] %s3575_s29 }
  0x46   : > { %s3577_s13 = scalar_lea.vmem %s3576_s29, 4096  ;;  %p3578_p1 = scmp.lt.s32.totalorder %s3900_s11, %s3576_s29 }
  0x47   : > { %p3573_p5 = pnand %p3572_p4, %p3105_p3  ;;  %p3579_p9 = scmp.lt.s32.totalorder %s3577_s13, %s3571_s7 }
  0x49   : > { %p3574_p6 = pneg %p3573_p5  ;;  %p3580_p10 = por %p3579_p9, %p3578_p1 }
  0x4b   : > { %p3581_p11 = pnand %p3580_p10, %p3574_p6 }
  0x4d   : > { %3584 = shalt.err (!%p3581_p11)
}
  0x4e   : > { %s3742_s23 = smov 192   ;;  %s3743_s8 = smov 128  }
  0x4f   : > { %252 = dma.hbm_to_vmem [thread:$0]  (%p3105_p3), %s3897_s27, %s3886_s30, %s3900_s11, %s3889_s14, %s3742_s23, %s3743_s8, %s3107_s21  }
  0x50 PF: > { %p3110_p7 = scmp.ge.s32.totalorder %s3739_s28, 1  ;;  %p287_p13 = scmp.lt.s32.totalorder %s3739_s28, 5 }
  0x52   : > { %p288_p1 = pnand %p3110_p7, %p287_p13 }
  0x54   : > { %291 = sbr.rel (%p288_p1) target bundleno = 1422 (0x58e), region = 36 }
  0x5b   : > { %s293_s6 = sand.u32 1, %s3715_s22  }
  0x5c   : > { %s3111_s10 = sshll.u32 %s293_s6, 7  ;;  %s294_s7 = scalar_lea.sflag [#allocation6], %s293_s6 }
  0x5d   : > { %s3932_s26 = scalar_lea.vmem [#allocation5], %s3111_s10 }
  0x5e   : > { %3686 = dma.done.wait (%p3856_p8), %s294_s7, 2048  }
  0x5f   : > { %3688 = vsyncadd (%p3856_p8), %s294_s7, 4294965248  ;;  %s3939_s27 = sand.u32 1, %s3703_s19   ;;  %s3114_s11 = sshll.u32 %s3727_s25, 5 }
  0x60   : > { %s3112_s9 = sshll.u32 %s3939_s27, 3  ;;  %p360_p3 = scmp.lt.s32.totalorder %s3114_s11, 49 }
  0x61   : > { %s3116_s30 = sshll.u32 %s3723_s24, 1  ;;  %s3960_s1 = scalar_lea.vmem [#allocation8], %s3112_s9 }
  0x62   : > { %s7860_s11 = smov (!%p360_p3, %s3114_s11), 49  ;;  %p379_p0 = scmp.lt.s32.totalorder %s3116_s30, 2 }
  0x63   : > { %s3115_s14 = sshll.u32 %s7860_s11, 3  ;;  %s3962_s11 = scalar_lea.vmem [#allocation9], %s3112_s9 }
  0x64   : > { %s3947_s13 = scalar_lea.vmem %s6796_s0, %s3115_s14  ;;  %s3952_s8 = scalar_lea.vmem %s6799_s3, %s3115_s14 }
  0x65   : > { %s7862_s30 = smov (!%p379_p0, %s3116_s30), 2  ;;  %p3119_p8 = scmp.ne.s32.totalorder %s3723_s24, 0 }
  0x66   : > { %s381_s7 = scalar_lea.vmem %s6798_s2, %s7862_s30  ;;  %vm406_vm0 = vcmask (!%p3119_p8), 7168   ;;  %v3744_v0 = vmov (!%p3119_p8), -inf   ;;  %v3745_v1 = vmov (!%p3119_p8), 0.0  }
  0x67   : > { %405 = sbr.rel (%p3119_p8) target bundleno = 151 (0x97), region = 44  ;;  %407 = vst.msk [vmem:[#allocation2] sm:$0xff] (!%p3119_p8), %vm406_vm0, %v3744_v0  ;;  %408 = vst.msk [vmem:[#allocation2 + $0x8] sm:$0xff] (!%p3119_p8), %vm406_vm0, %v3744_v0 }
  0x68   : > { %409 = vst.msk [vmem:[#allocation2 + $0x10] sm:$0xff] (!%p3119_p8), %vm406_vm0, %v3744_v0  ;;  %410 = vst.msk [vmem:[#allocation2 + $0x18] sm:$0xff] (!%p3119_p8), %vm406_vm0, %v3744_v0 }
  0x69   : > { %411 = vst.msk [vmem:[#allocation2 + $0x20] sm:$0xff] (!%p3119_p8), %vm406_vm0, %v3744_v0  ;;  %412 = vst.msk [vmem:[#allocation2 + $0x28] sm:$0xff] (!%p3119_p8), %vm406_vm0, %v3744_v0 }
  0x6a   : > { %413 = vst.msk [vmem:[#allocation2 + $0x30] sm:$0xff] (!%p3119_p8), %vm406_vm0, %v3744_v0  ;;  %414 = vst.msk [vmem:[#allocation2 + $0x38] sm:$0xff] (!%p3119_p8), %vm406_vm0, %v3744_v0 }
  0x6b   : > { %415 = vst.msk [vmem:[#allocation2 + $0x40] sm:$0xff] (!%p3119_p8), %vm406_vm0, %v3744_v0  ;;  %416 = vst.msk [vmem:[#allocation2 + $0x48] sm:$0xff] (!%p3119_p8), %vm406_vm0, %v3744_v0 }
  0x6c   : > { %417 = vst.msk [vmem:[#allocation2 + $0x50] sm:$0xff] (!%p3119_p8), %vm406_vm0, %v3744_v0  ;;  %418 = vst.msk [vmem:[#allocation2 + $0x58] sm:$0xff] (!%p3119_p8), %vm406_vm0, %v3744_v0 }
  0x6d   : > { %419 = vst.msk [vmem:[#allocation2 + $0x60] sm:$0xff] (!%p3119_p8), %vm406_vm0, %v3744_v0  ;;  %420 = vst.msk [vmem:[#allocation2 + $0x68] sm:$0xff] (!%p3119_p8), %vm406_vm0, %v3744_v0 }
  0x6e   : > { %421 = vst.msk [vmem:[#allocation2 + $0x70] sm:$0xff] %vm406_vm0, %v3744_v0  ;;  %422 = vst.msk [vmem:[#allocation2 + $0x78] sm:$0xff] %vm406_vm0, %v3744_v0 }
  0x6f   : > { %423 = vst.msk [vmem:[#allocation2 + $0x80] sm:$0xff] %vm406_vm0, %v3744_v0  ;;  %424 = vst.msk [vmem:[#allocation2 + $0x88] sm:$0xff] %vm406_vm0, %v3744_v0 }
  0x70   : > { %425 = vst.msk [vmem:[#allocation2 + $0x90] sm:$0xff] %vm406_vm0, %v3744_v0  ;;  %426 = vst.msk [vmem:[#allocation2 + $0x98] sm:$0xff] %vm406_vm0, %v3744_v0 }
  0x71   : > { %427 = vst.msk [vmem:[#allocation2 + $0xa0] sm:$0xff] %vm406_vm0, %v3744_v0  ;;  %428 = vst.msk [vmem:[#allocation2 + $0xa8] sm:$0xff] %vm406_vm0, %v3744_v0 }
  0x72   : > { %429 = vst.msk [vmem:[#allocation2 + $0xb0] sm:$0xff] %vm406_vm0, %v3744_v0  ;;  %430 = vst.msk [vmem:[#allocation2 + $0xb8] sm:$0xff] %vm406_vm0, %v3744_v0 }
  0x73   : > { %431 = vst.msk [vmem:[#allocation2 + $0xc0] sm:$0xff] %vm406_vm0, %v3744_v0  ;;  %432 = vst.msk [vmem:[#allocation2 + $0xc8] sm:$0xff] %vm406_vm0, %v3744_v0 }
  0x74   : > { %433 = vst.msk [vmem:[#allocation2 + $0xd0] sm:$0xff] %vm406_vm0, %v3744_v0  ;;  %434 = vst.msk [vmem:[#allocation2 + $0xd8] sm:$0xff] %vm406_vm0, %v3744_v0 }
  0x75   : > { %435 = vst.msk [vmem:[#allocation2 + $0xe0] sm:$0xff] %vm406_vm0, %v3744_v0  ;;  %436 = vst.msk [vmem:[#allocation2 + $0xe8] sm:$0xff] %vm406_vm0, %v3744_v0 }
  0x76   : > { %437 = vst.msk [vmem:[#allocation2 + $0xf0] sm:$0xff] %vm406_vm0, %v3744_v0  ;;  %438 = vst.msk [vmem:[#allocation2 + $0xf8] sm:$0xff] %vm406_vm0, %v3744_v0 }
  0x77   : > { %439 = vst.msk [vmem:[#allocation3] sm:$0xff] %vm406_vm0, %v3745_v1  ;;  %440 = vst.msk [vmem:[#allocation3 + $0x8] sm:$0xff] %vm406_vm0, %v3745_v1 }
  0x78   : > { %441 = vst.msk [vmem:[#allocation3 + $0x10] sm:$0xff] %vm406_vm0, %v3745_v1  ;;  %442 = vst.msk [vmem:[#allocation3 + $0x18] sm:$0xff] %vm406_vm0, %v3745_v1 }
  0x79   : > { %443 = vst.msk [vmem:[#allocation3 + $0x20] sm:$0xff] %vm406_vm0, %v3745_v1  ;;  %444 = vst.msk [vmem:[#allocation3 + $0x28] sm:$0xff] %vm406_vm0, %v3745_v1 }
  0x7a   : > { %445 = vst.msk [vmem:[#allocation3 + $0x30] sm:$0xff] %vm406_vm0, %v3745_v1  ;;  %446 = vst.msk [vmem:[#allocation3 + $0x38] sm:$0xff] %vm406_vm0, %v3745_v1 }
  0x7b   : > { %447 = vst.msk [vmem:[#allocation3 + $0x40] sm:$0xff] %vm406_vm0, %v3745_v1  ;;  %448 = vst.msk [vmem:[#allocation3 + $0x48] sm:$0xff] %vm406_vm0, %v3745_v1 }
  0x7c   : > { %449 = vst.msk [vmem:[#allocation3 + $0x50] sm:$0xff] %vm406_vm0, %v3745_v1  ;;  %450 = vst.msk [vmem:[#allocation3 + $0x58] sm:$0xff] %vm406_vm0, %v3745_v1 }
  0x7d   : > { %451 = vst.msk [vmem:[#allocation3 + $0x60] sm:$0xff] %vm406_vm0, %v3745_v1  ;;  %452 = vst.msk [vmem:[#allocation3 + $0x68] sm:$0xff] %vm406_vm0, %v3745_v1 }
  0x7e   : > { %453 = vst.msk [vmem:[#allocation3 + $0x70] sm:$0xff] %vm406_vm0, %v3745_v1  ;;  %454 = vst.msk [vmem:[#allocation3 + $0x78] sm:$0xff] %vm406_vm0, %v3745_v1 }
  0x7f   : > { %455 = vst.msk [vmem:[#allocation3 + $0x80] sm:$0xff] %vm406_vm0, %v3745_v1  ;;  %456 = vst.msk [vmem:[#allocation3 + $0x88] sm:$0xff] %vm406_vm0, %v3745_v1 }
  0x80   : > { %457 = vst.msk [vmem:[#allocation3 + $0x90] sm:$0xff] %vm406_vm0, %v3745_v1  ;;  %458 = vst.msk [vmem:[#allocation3 + $0x98] sm:$0xff] %vm406_vm0, %v3745_v1 }
  0x81   : > { %459 = vst.msk [vmem:[#allocation3 + $0xa0] sm:$0xff] %vm406_vm0, %v3745_v1  ;;  %460 = vst.msk [vmem:[#allocation3 + $0xa8] sm:$0xff] %vm406_vm0, %v3745_v1 }
  0x82   : > { %461 = vst.msk [vmem:[#allocation3 + $0xb0] sm:$0xff] %vm406_vm0, %v3745_v1  ;;  %462 = vst.msk [vmem:[#allocation3 + $0xb8] sm:$0xff] %vm406_vm0, %v3745_v1 }
  0x83   : > { %463 = vst.msk [vmem:[#allocation3 + $0xc0] sm:$0xff] %vm406_vm0, %v3745_v1  ;;  %464 = vst.msk [vmem:[#allocation3 + $0xc8] sm:$0xff] %vm406_vm0, %v3745_v1 }
  0x84   : > { %465 = vst.msk [vmem:[#allocation3 + $0xd0] sm:$0xff] %vm406_vm0, %v3745_v1  ;;  %466 = vst.msk [vmem:[#allocation3 + $0xd8] sm:$0xff] %vm406_vm0, %v3745_v1 }
  0x85   : > { %467 = vst.msk [vmem:[#allocation3 + $0xe0] sm:$0xff] %vm406_vm0, %v3745_v1  ;;  %468 = vst.msk [vmem:[#allocation3 + $0xe8] sm:$0xff] %vm406_vm0, %v3745_v1 }
  0x86   : > { %469 = vst.msk [vmem:[#allocation3 + $0xf0] sm:$0xff] %vm406_vm0, %v3745_v1  ;;  %470 = vst.msk [vmem:[#allocation3 + $0xf8] sm:$0xff] %vm406_vm0, %v3745_v1 }
  0x87   : > { %471 = vst.msk [vmem:[#allocation4] sm:$0xff] %vm406_vm0, %v3745_v1  ;;  %472 = vst.msk [vmem:[#allocation4 + $0x8] sm:$0xff] %vm406_vm0, %v3745_v1 }
  0x88   : > { %473 = vst.msk [vmem:[#allocation4 + $0x10] sm:$0xff] %vm406_vm0, %v3745_v1  ;;  %474 = vst.msk [vmem:[#allocation4 + $0x18] sm:$0xff] %vm406_vm0, %v3745_v1 }
  0x89   : > { %475 = vst.msk [vmem:[#allocation4 + $0x20] sm:$0xff] %vm406_vm0, %v3745_v1  ;;  %476 = vst.msk [vmem:[#allocation4 + $0x28] sm:$0xff] %vm406_vm0, %v3745_v1 }
  0x8a   : > { %477 = vst.msk [vmem:[#allocation4 + $0x30] sm:$0xff] %vm406_vm0, %v3745_v1  ;;  %478 = vst.msk [vmem:[#allocation4 + $0x38] sm:$0xff] %vm406_vm0, %v3745_v1 }
  0x8b   : > { %479 = vst.msk [vmem:[#allocation4 + $0x40] sm:$0xff] %vm406_vm0, %v3745_v1  ;;  %480 = vst.msk [vmem:[#allocation4 + $0x48] sm:$0xff] %vm406_vm0, %v3745_v1 }
  0x8c   : > { %481 = vst.msk [vmem:[#allocation4 + $0x50] sm:$0xff] %vm406_vm0, %v3745_v1  ;;  %482 = vst.msk [vmem:[#allocation4 + $0x58] sm:$0xff] %vm406_vm0, %v3745_v1 }
  0x8d   : > { %483 = vst.msk [vmem:[#allocation4 + $0x60] sm:$0xff] %vm406_vm0, %v3745_v1  ;;  %484 = vst.msk [vmem:[#allocation4 + $0x68] sm:$0xff] %vm406_vm0, %v3745_v1 }
  0x8e   : > { %485 = vst.msk [vmem:[#allocation4 + $0x70] sm:$0xff] %vm406_vm0, %v3745_v1  ;;  %486 = vst.msk [vmem:[#allocation4 + $0x78] sm:$0xff] %vm406_vm0, %v3745_v1 }
  0x8f   : > { %487 = vst.msk [vmem:[#allocation4 + $0x80] sm:$0xff] %vm406_vm0, %v3745_v1  ;;  %488 = vst.msk [vmem:[#allocation4 + $0x88] sm:$0xff] %vm406_vm0, %v3745_v1 }
  0x90   : > { %489 = vst.msk [vmem:[#allocation4 + $0x90] sm:$0xff] %vm406_vm0, %v3745_v1  ;;  %490 = vst.msk [vmem:[#allocation4 + $0x98] sm:$0xff] %vm406_vm0, %v3745_v1 }
  0x91   : > { %491 = vst.msk [vmem:[#allocation4 + $0xa0] sm:$0xff] %vm406_vm0, %v3745_v1  ;;  %492 = vst.msk [vmem:[#allocation4 + $0xa8] sm:$0xff] %vm406_vm0, %v3745_v1 }
  0x92   : > { %493 = vst.msk [vmem:[#allocation4 + $0xb0] sm:$0xff] %vm406_vm0, %v3745_v1  ;;  %494 = vst.msk [vmem:[#allocation4 + $0xb8] sm:$0xff] %vm406_vm0, %v3745_v1 }
  0x93   : > { %495 = vst.msk [vmem:[#allocation4 + $0xc0] sm:$0xff] %vm406_vm0, %v3745_v1  ;;  %496 = vst.msk [vmem:[#allocation4 + $0xc8] sm:$0xff] %vm406_vm0, %v3745_v1 }
  0x94   : > { %497 = vst.msk [vmem:[#allocation4 + $0xd0] sm:$0xff] %vm406_vm0, %v3745_v1  ;;  %498 = vst.msk [vmem:[#allocation4 + $0xd8] sm:$0xff] %vm406_vm0, %v3745_v1 }
  0x95   : > { %499 = vst.msk [vmem:[#allocation4 + $0xe0] sm:$0xff] %vm406_vm0, %v3745_v1  ;;  %500 = vst.msk [vmem:[#allocation4 + $0xe8] sm:$0xff] %vm406_vm0, %v3745_v1 }
  0x96   : > { %501 = vst.msk [vmem:[#allocation4 + $0xf0] sm:$0xff] %vm406_vm0, %v3745_v1  ;;  %502 = vst.msk [vmem:[#allocation4 + $0xf8] sm:$0xff] %vm406_vm0, %v3745_v1 }
  0x97 PF: > { %v3277_v2 = vld [vmem:[%s3932_s26 + $0x4] ss:$8 sps:$4 sm:$0xff]   ;;  %v3279_v3 = vld [vmem:[%s3932_s26] ss:$8 sps:$4 sm:$0xff]   ;;  %v3746_v4 = vmov 0   ;;  %v4147_v14 = vld [vmem:[%s3952_s8 + $0x10] sm:$0xff] }
  0x98   : > { %691 = vmatprep.mubr.bf16.mxu0 %v3746_v4  ;;  %771 = vmatprep.mubr.bf16.mxu1 %v3746_v4  ;;  %v3280_v5 = vld [vmem:[%s3932_s26 + $0x14] ss:$8 sps:$4 sm:$0xff]   ;;  %v3282_v6 = vld [vmem:[%s3932_s26 + $0x10] ss:$8 sps:$4 sm:$0xff]   ;;  %v3283_v7 = vld [vmem:[%s3932_s26 + $0x24] ss:$8 sps:$4 sm:$0xff]  }
  0x99   : > { %659 = vmatprep.subr.bf16.mxu0 %v3277_v2  ;;  %3148 = vmatprep.subr.bf16.mxu1 %v3277_v2  ;;  %v3285_v8 = vld [vmem:[%s3932_s26 + $0x20] ss:$8 sps:$4 sm:$0xff]   ;;  %v3286_v9 = vld [vmem:[%s3932_s26 + $0x34] ss:$8 sps:$4 sm:$0xff]   ;;  %v3288_v10 = vld [vmem:[%s3932_s26 + $0x30] ss:$8 sps:$4 sm:$0xff]  }
  0x9a   : > { %660 = vmatpush1.bf16.msra.mxu0 %v3279_v3  ;;  %3156 = vmatpush1.bf16.msra.mxu1 %v3279_v3  ;;  %v3289_v11 = vld [vmem:[%s3932_s26 + $0x44] ss:$8 sps:$4 sm:$0xff]   ;;  %7107 = vst [vmem:[#allocation22_spill] sm:$0xff] %v4147_v14  ;;  %v4150_v15 = vld [vmem:[%s3952_s8 + $0x18] sm:$0xff]  ;;  %v3291_v16 = vld [vmem:[%s3932_s26 + $0x40] ss:$8 sps:$4 sm:$0xff]  }
  0x9b   : > { %661 = vmatprep.subr.bf16.mxu0 %v3280_v5  ;;  %3149 = vmatprep.subr.bf16.mxu1 %v3280_v5  ;;  %v4139_v12 = vld [vmem:[%s3952_s8 + $0x8] sm:$0xff]  ;;  %v4142_v13 = vld [vmem:[%s3952_s8] sm:$0xff]  ;;  %7108 = vst [vmem:[#allocation23_spill] sm:$0xff] %v4150_v15  ;;  %v3292_v17 = vld [vmem:[%s3932_s26 + $0x54] ss:$8 sps:$4 sm:$0xff]   ;;  %p3137_p2 = scmp.ne.s32.totalorder %s3723_s24, 1 }
  0x9c   : > { %3276 = vset.pattern.permute.xlu1 %v3746_v4  ;;  %3275 = vset.pattern.permute.xlu0 %v3746_v4  ;;  %7105 = vst [vmem:[#allocation20_spill] sm:$0xff] %v4139_v12  ;;  %7106 = vst [vmem:[#allocation21_spill] sm:$0xff] %v4142_v13  ;;  %v4157_v18 = vld [vmem:[%s3952_s8 + $0x20] sm:$0xff]  ;;  %v4160_v19 = vld [vmem:[%s3952_s8 + $0x28] sm:$0xff] }
  0x9d   : > { %1858 = vperm.xlu1 %3276, %v4139_v12   ;;  %1855 = vperm.xlu0 %3275, %v4142_v13   ;;  %7109 = vst [vmem:[#allocation24_spill] sm:$0xff] %v4157_v18  ;;  %7110 = vst [vmem:[#allocation25_spill] sm:$0xff] %v4160_v19  ;;  %v3294_v20 = vld [vmem:[%s3932_s26 + $0x50] ss:$8 sps:$4 sm:$0xff]   ;;  %v3295_v21 = vld [vmem:[%s3932_s26 + $0x64] ss:$8 sps:$4 sm:$0xff]  }
  0x9e   : > { %662 = vmatpush1.bf16.msra.mxu0 %v3282_v6  ;;  %3157 = vmatpush1.bf16.msra.mxu1 %v3282_v6  ;;  %v4167_v22 = vld [vmem:[%s3952_s8 + $0x30] sm:$0xff]  ;;  %v4170_v23 = vld [vmem:[%s3952_s8 + $0x38] sm:$0xff]  ;;  %v3297_v24 = vld [vmem:[%s3932_s26 + $0x60] ss:$8 sps:$4 sm:$0xff]  }
  0x9f   : > { %663 = vmatprep.subr.bf16.mxu0 %v3283_v7  ;;  %3150 = vmatprep.subr.bf16.mxu1 %v3283_v7  ;;  %7111 = vst [vmem:[#allocation26_spill] sm:$0xff] %v4167_v22  ;;  %7112 = vst [vmem:[#allocation27_spill] sm:$0xff] %v4170_v23  ;;  %v3298_v25 = vld [vmem:[%s3932_s26 + $0x74] ss:$8 sps:$4 sm:$0xff]   ;;  %v3300_v26 = vld [vmem:[%s3932_s26 + $0x70] ss:$8 sps:$4 sm:$0xff]  }
  0xa0   : > { %v503_v27 = vld [vmem:[%s3947_s13] sm:$0xff]  ;;  %v4182_v29 = vld [vmem:[%s3952_s8 + $0x48] sm:$0xff]  ;;  %v4190_v35 = vld [vmem:[%s3952_s8 + $0x50] sm:$0xff]  ;;  %s3136_s26 = sshll.u32 %s3723_s24, 8 }
  0xa1   : > { %1861 = vperm.xlu1 %3276, %v4147_v14   ;;  %1864 = vperm.xlu0 %3275, %v4150_v15   ;;  %v4179_v28 = vld [vmem:[%s3952_s8 + $0x40] sm:$0xff]  ;;  %7114 = vst [vmem:[#allocation29_spill] sm:$0xff] %v4182_v29  ;;  %v504_v30 = vld [vmem:[%s3947_s13 + $0x8] sm:$0xff]  ;;  %7115 = vst [vmem:[#allocation30_spill] sm:$0xff] %v4190_v35 }
  0xa2   : > { %664 = vmatpush1.bf16.msra.mxu0 %v3285_v8  ;;  %3158 = vmatpush1.bf16.msra.mxu1 %v3285_v8  ;;  %7113 = vst [vmem:[#allocation28_spill] sm:$0xff] %v4179_v28  ;;  %v519_v31 = vld [vmem:[%s3947_s13 + $0x80] sm:$0xff]  ;;  %v520_v32 = vld [vmem:[%s3947_s13 + $0x88] sm:$0xff]  ;;  %v535_v33 = vpack.c.bf16 %v504_v30, %v503_v27  ;;  %v4193_v36 = vld [vmem:[%s3952_s8 + $0x58] sm:$0xff] }
  0xa3   : > { %665 = vmatprep.subr.bf16.mxu0 %v3286_v9  ;;  %3151 = vmatprep.subr.bf16.mxu1 %v3286_v9  ;;  %v543_v34 = vpack.c.bf16 %v520_v32, %v519_v31  ;;  %7116 = vst [vmem:[#allocation31_spill] sm:$0xff] %v4193_v36  ;;  %v505_v37 = vld [vmem:[%s3947_s13 + $0x10] sm:$0xff]  ;;  %v4199_v38 = vld [vmem:[%s3952_s8 + $0x60] sm:$0xff]  ;;  %v4202_v39 = vld [vmem:[%s3952_s8 + $0x68] sm:$0xff] }
  0xa4   : > { %7117 = vst [vmem:[#allocation32_spill] sm:$0xff] %v4199_v38  ;;  %7118 = vst [vmem:[#allocation33_spill] sm:$0xff] %v4202_v39  ;;  %v506_v40 = vld [vmem:[%s3947_s13 + $0x18] sm:$0xff]  ;;  %v521_v41 = vld [vmem:[%s3947_s13 + $0x90] sm:$0xff] }
  0xa5   : > { %1867 = vperm.xlu1 %3276, %v4157_v18   ;;  %1870 = vperm.xlu0 %3275, %v4160_v19   ;;  %v522_v42 = vld [vmem:[%s3947_s13 + $0x98] sm:$0xff]  ;;  %v536_v43 = vpack.c.bf16 %v506_v40, %v505_v37  ;;  %v4212_v45 = vld [vmem:[%s3952_s8 + $0x70] sm:$0xff]  ;;  %v507_v47 = vld [vmem:[%s3947_s13 + $0x20] sm:$0xff] }
  0xa6   : > { %666 = vmatpush1.bf16.msra.mxu0 %v3288_v10  ;;  %3159 = vmatpush1.bf16.msra.mxu1 %v3288_v10  ;;  %v544_v44 = vpack.c.bf16 %v522_v42, %v521_v41  ;;  %7119 = vst [vmem:[#allocation34_spill] sm:$0xff] %v4212_v45  ;;  %v4215_v46 = vld [vmem:[%s3952_s8 + $0x78] sm:$0xff]  ;;  %v4221_v48 = vld [vmem:[%s3952_s8 + $0x80] sm:$0xff]  ;;  %v4224_v49 = vld [vmem:[%s3952_s8 + $0x88] sm:$0xff] }
  0xa7   : > { %667 = vmatprep.subr.bf16.mxu0 %v3289_v11  ;;  %3152 = vmatprep.subr.bf16.mxu1 %v3289_v11  ;;  %7120 = vst [vmem:[#allocation35_spill] sm:$0xff] %v4215_v46  ;;  %7121 = vst [vmem:[#allocation36_spill] sm:$0xff] %v4221_v48  ;;  %v508_v50 = vld [vmem:[%s3947_s13 + $0x28] sm:$0xff]  ;;  %v523_v51 = vld [vmem:[%s3947_s13 + $0xa0] sm:$0xff] }
  0xa8   : > { %7122 = vst [vmem:[#allocation37_spill] sm:$0xff] %v4224_v49  ;;  %v524_v52 = vld [vmem:[%s3947_s13 + $0xa8] sm:$0xff]  ;;  %v537_v53 = vpack.c.bf16 %v508_v50, %v507_v47  ;;  %v4234_v55 = vld [vmem:[%s3952_s8 + $0x90] sm:$0xff]  ;;  %v4237_v56 = vld [vmem:[%s3952_s8 + $0x98] sm:$0xff] }
  0xa9   : > { %1873 = vperm.xlu1 %3276, %v4167_v22   ;;  %1876 = vperm.xlu0 %3275, %v4170_v23   ;;  %v545_v54 = vpack.c.bf16 %v524_v52, %v523_v51  ;;  %7123 = vst [vmem:[#allocation38_spill] sm:$0xff] %v4234_v55  ;;  %7124 = vst [vmem:[#allocation39_spill] sm:$0xff] %v4237_v56  ;;  %v509_v57 = vld [vmem:[%s3947_s13 + $0x30] sm:$0xff]  ;;  %v4243_v58 = vld [vmem:[%s3952_s8 + $0xa0] sm:$0xff] }
  0xaa   : > { %668 = vmatpush1.bf16.msra.mxu0 %v3291_v16  ;;  %3160 = vmatpush1.bf16.msra.mxu1 %v3291_v16  ;;  %7125 = vst [vmem:[#allocation40_spill] sm:$0xff] %v4243_v58  ;;  %v4246_v59 = vld [vmem:[%s3952_s8 + $0xa8] sm:$0xff]  ;;  %v510_v60 = vld [vmem:[%s3947_s13 + $0x38] sm:$0xff]  ;;  %v525_v61 = vld [vmem:[%s3947_s13 + $0xb0] sm:$0xff] }
  0xab   : > { %669 = vmatprep.subr.bf16.mxu0 %v3292_v17  ;;  %3153 = vmatprep.subr.bf16.mxu1 %v3292_v17  ;;  %7126 = vst [vmem:[#allocation41_spill] sm:$0xff] %v4246_v59  ;;  %v526_v62 = vld [vmem:[%s3947_s13 + $0xb8] sm:$0xff]  ;;  %v538_v63 = vpack.c.bf16 %v510_v60, %v509_v57  ;;  %v4256_v1 = vld [vmem:[%s3952_s8 + $0xb0] sm:$0xff]  ;;  %v511_v3 = vld [vmem:[%s3947_s13 + $0x40] sm:$0xff] }
  0xac   : > { %v546_v0 = vpack.c.bf16 %v526_v62, %v525_v61  ;;  %7127 = vst [vmem:[#allocation42_spill] sm:$0xff] %v4256_v1  ;;  %v4259_v2 = vld [vmem:[%s3952_s8 + $0xb8] sm:$0xff]  ;;  %v4265_v5 = vld [vmem:[%s3952_s8 + $0xc0] sm:$0xff]  ;;  %v4268_v6 = vld [vmem:[%s3952_s8 + $0xc8] sm:$0xff] }
  0xad   : > { %1879 = vperm.xlu1 %3276, %v4179_v28   ;;  %1882 = vperm.xlu0 %3275, %v4182_v29   ;;  %7128 = vst [vmem:[#allocation43_spill] sm:$0xff] %v4259_v2  ;;  %7129 = vst [vmem:[#allocation44_spill] sm:$0xff] %v4265_v5  ;;  %v512_v7 = vld [vmem:[%s3947_s13 + $0x48] sm:$0xff]  ;;  %v527_v8 = vld [vmem:[%s3947_s13 + $0xc0] sm:$0xff] }
  0xae   : > { %670 = vmatpush1.bf16.msra.mxu0 %v3294_v20  ;;  %3161 = vmatpush1.bf16.msra.mxu1 %v3294_v20  ;;  %7130 = vst [vmem:[#allocation45_spill] sm:$0xff] %v4268_v6  ;;  %v528_v9 = vld [vmem:[%s3947_s13 + $0xc8] sm:$0xff]  ;;  %v539_v10 = vpack.c.bf16 %v512_v7, %v511_v3  ;;  %v4278_v16 = vld [vmem:[%s3952_s8 + $0xd0] sm:$0xff]  ;;  %v4281_v17 = vld [vmem:[%s3952_s8 + $0xd8] sm:$0xff] }
  0xaf   : > { %671 = vmatprep.subr.bf16.mxu0 %v3295_v21  ;;  %3154 = vmatprep.subr.bf16.mxu1 %v3295_v21  ;;  %v547_v11 = vpack.c.bf16 %v528_v9, %v527_v8  ;;  %7131 = vst [vmem:[#allocation46_spill] sm:$0xff] %v4278_v16  ;;  %7132 = vst [vmem:[#allocation47_spill] sm:$0xff] %v4281_v17  ;;  %v513_v20 = vld [vmem:[%s3947_s13 + $0x50] sm:$0xff]  ;;  %v4287_v21 = vld [vmem:[%s3952_s8 + $0xe0] sm:$0xff] }
  0xb0   : > { %7133 = vst [vmem:[#allocation48_spill] sm:$0xff] %v4287_v21  ;;  %v530_v27 = vld [vmem:[%s3947_s13 + $0xd8] sm:$0xff]  ;;  %v4300_v32 = vld [vmem:[%s3952_s8 + $0xf0] sm:$0xff]  ;;  %v516_v37 = vld [vmem:[%s3947_s13 + $0x68] sm:$0xff] }
  0xb1   : > { %1885 = vperm.xlu1 %3276, %v4190_v35   ;;  %1888 = vperm.xlu0 %3275, %v4193_v36   ;;  %7135 = vst [vmem:[#allocation50_spill] sm:$0xff] %v4300_v32  ;;  %v531_v40 = vld [vmem:[%s3947_s13 + $0xe0] sm:$0xff]  ;;  %v532_v41 = vld [vmem:[%s3947_s13 + $0xe8] sm:$0xff]  ;;  %v518_v47 = vld [vmem:[%s3947_s13 + $0x78] sm:$0xff] }
  0xb2   : > { %672 = vmatpush1.bf16.msra.mxu0 %v3297_v24  ;;  %3162 = vmatpush1.bf16.msra.mxu1 %v3297_v24  ;;  %v4290_v24 = vld [vmem:[%s3952_s8 + $0xe8] sm:$0xff]  ;;  %v533_v50 = vld [vmem:[%s3947_s13 + $0xf0] sm:$0xff]  ;;  %v534_v51 = vld [vmem:[%s3947_s13 + $0xf8] sm:$0xff] }
  0xb3   : > { %673 = vmatprep.subr.bf16.mxu0 %v3298_v25  ;;  %3155 = vmatprep.subr.bf16.mxu1 %v3298_v25  ;;  %7134 = vst [vmem:[#allocation49_spill] sm:$0xff] %v4290_v24  ;;  %v514_v25 = vld [vmem:[%s3947_s13 + $0x58] sm:$0xff] }
  0xb4   : > { %v540_v30 = vpack.c.bf16 %v514_v25, %v513_v20 }
  0xb5   : > { %1891 = vperm.xlu1 %3276, %v4199_v38   ;;  %1894 = vperm.xlu0 %3275, %v4202_v39  }
  0xb6   : > { %674 = vmatpush1.bf16.msra.mxu0 %v3300_v26  ;;  %3163 = vmatpush1.bf16.msra.mxu1 %v3300_v26  ;;  %v529_v26 = vld [vmem:[%s3947_s13 + $0xd0] sm:$0xff] }
  0xb7   : > { %v548_v31 = vpack.c.bf16 %v530_v27, %v529_v26 }
  0xb9   : > { %692 = vmatmul.mubr.bf16.vlgmr.msra.gmra.mrb[0].mxu0 %v535_v33  ;;  %772 = vmatmul.mubr.bf16.vlgmr.msra.gmra.mrb[0].mxu1 %v543_v34  ;;  %v4303_v33 = vld [vmem:[%s3952_s8 + $0xf8] sm:$0xff]  ;;  %v515_v34 = vld [vmem:[%s3947_s13 + $0x60] sm:$0xff] }
  0xba   : > { %701 = vmatprep.mubr.bf16.mxu0 %v3746_v4  ;;  %781 = vmatprep.mubr.bf16.mxu1 %v3746_v4  ;;  %7136 = vst [vmem:[#allocation51_spill] sm:$0xff] %v4303_v33  ;;  %v541_v42 = vpack.c.bf16 %v516_v37, %v515_v34  ;;  %v888_v34 = vstv %s3136_s26 }
  0xbb   : > { %1897 = vperm.xlu1 %3276, %v4212_v45   ;;  %1900 = vperm.xlu0 %3275, %v4215_v46  }
  0xbf   : > { %1903 = vperm.xlu1 %3276, %v4221_v48   ;;  %1906 = vperm.xlu0 %3275, %v4224_v49  }
  0xc1   : > { %702 = vmatmul.mubr.bf16.gmra.mrb[4].mxu0 %v536_v43  ;;  %782 = vmatmul.mubr.bf16.gmra.mrb[4].mxu1 %v544_v44  ;;  %v549_v43 = vpack.c.bf16 %v532_v41, %v531_v40  ;;  %v517_v44 = vld [vmem:[%s3947_s13 + $0x70] sm:$0xff] }
  0xc2   : > { %711 = vmatprep.mubr.bf16.mxu0 %v3746_v4  ;;  %791 = vmatprep.mubr.bf16.mxu1 %v3746_v4  ;;  %v542_v52 = vpack.c.bf16 %v518_v47, %v517_v44 }
  0xc3   : > { %1909 = vperm.xlu1 %3276, %v4234_v55   ;;  %1912 = vperm.xlu0 %3275, %v4237_v56  }
  0xc7   : > { %1915 = vperm.xlu1 %3276, %v4243_v58   ;;  %1918 = vperm.xlu0 %3275, %v4246_v59  }
  0xc9   : > { %712 = vmatmul.mubr.bf16.gmra.mrb[8].mxu0 %v537_v53  ;;  %792 = vmatmul.mubr.bf16.gmra.mrb[8].mxu1 %v545_v54  ;;  %v550_v53 = vpack.c.bf16 %v534_v51, %v533_v50 }
  0xca   : > { %721 = vmatprep.mubr.bf16.mxu0 %v3746_v4  ;;  %801 = vmatprep.mubr.bf16.mxu1 %v3746_v4 }
  0xcb   : > { %1921 = vperm.xlu1 %3276, %v4256_v1   ;;  %1924 = vperm.xlu0 %3275, %v4259_v2  }
  0xcf   : > { %1927 = vperm.xlu1 %3276, %v4265_v5   ;;  %1930 = vperm.xlu0 %3275, %v4268_v6  }
  0xd1   : > { %722 = vmatmul.mubr.bf16.gmra.mrb[12].mxu0 %v538_v63  ;;  %802 = vmatmul.mubr.bf16.gmra.mrb[12].mxu1 %v546_v0 }
  0xd2   : > { %731 = vmatprep.mubr.bf16.mxu0 %v3746_v4  ;;  %811 = vmatprep.mubr.bf16.mxu1 %v3746_v4 }
  0xd3   : > { %1933 = vperm.xlu1 %3276, %v4278_v16   ;;  %1936 = vperm.xlu0 %3275, %v4281_v17  }
  0xd7   : > { %1939 = vperm.xlu1 %3276, %v4287_v21   ;;  %1942 = vperm.xlu0 %3275, %v4290_v24  }
  0xd9   : > { %732 = vmatmul.mubr.bf16.gmra.mrb[16].mxu0 %v539_v10  ;;  %812 = vmatmul.mubr.bf16.gmra.mrb[16].mxu1 %v547_v11  ;;  %v569_v10 = vlaneseq }
  0xda   : > { %741 = vmatprep.mubr.bf16.mxu0 %v3746_v4  ;;  %821 = vmatprep.mubr.bf16.mxu1 %v3746_v4 }
  0xdb   : > { %1945 = vperm.xlu1 %3276, %v4300_v32   ;;  %1948 = vperm.xlu0 %3275, %v4303_v33   ;;  %v4341_v11 = vshrl.u32 %v569_v10, 7  ;;  %v4343_v20 = vand.u32 127, %v569_v10 }
  0xdd   : > { %7137 = vst [vmem:[#allocation52_spill] sm:$0xff] %v4341_v11  ;;  %7138 = vst [vmem:[#allocation53_spill] sm:$0xff] %v4343_v20  ;;  %v571_v27 = vsub.s32 0, %v4341_v11  ;;  %v887_v37 = vadd.s32 128, %v4343_v20  ;;  %v4361_v41 = vadd.s32 %v888_v34, %v4343_v20 }
  0xdf   : > { %v4369_v47 = vadd.s32 %v888_v34, %v887_v37  ;;  %vm891_vm1 = vcmp.lt.s32.totalorder %v4361_v41, 384 }
  0xe1   : > { %742 = vmatmul.mubr.bf16.gmra.mrb[20].mxu0 %v540_v30  ;;  %822 = vmatmul.mubr.bf16.gmra.mrb[20].mxu1 %v548_v31  ;;  %v567_v30 = vld [vmem:[%s381_s7] sm:$0x3]  ;;  %v575_v31 = vsub.s32 1, %v4341_v11  ;;  %vm892_vm2 = vcmp.lt.s32.totalorder %v4369_v47, 384 }
  0xe2   : > { %751 = vmatprep.mubr.bf16.mxu0 %v3746_v4  ;;  %831 = vmatprep.mubr.bf16.mxu1 %v3746_v4  ;;  %v4358_v40 = vrot.slane %v567_v30, %v571_v27 }
  0xe9   : > { %752 = vmatmul.mubr.bf16.gmra.mrb[24].mxu0 %v541_v42  ;;  %832 = vmatmul.mubr.bf16.gmra.mrb[24].mxu1 %v549_v43  ;;  %v4363_v42 = vrot.slane %v567_v30, %v575_v31 }
  0xea   : > { %761 = vmatprep.mubr.bf16.mxu0 %v3746_v4  ;;  %841 = vmatprep.mubr.bf16.mxu1 %v3746_v4 }
  0xf1   : > { %762 = vmatmul.mubr.bf16.gmra.mrb[28].mxu0 %v542_v52  ;;  %842 = vmatmul.mubr.bf16.gmra.mrb[28].mxu1 %v550_v53 }
 0x11c   : > { %v4319_v54 = vpop.permute.xlu1 %1858  ;;  %v1856_v57 = vpop.permute.xlu0 %1855 }
 0x11d   : > { %vm1950_vm3 = vcmp.eq.s32.totalorder %v4361_v41, %v1856_v57  ;;  %vm1951_vm4 = vcmp.eq.s32.totalorder %v4369_v47, %v1856_v57  ;;  %vm1952_vm9 = vcmp.eq.s32.totalorder %v4361_v41, %v4319_v54  ;;  %vm1953_vm10 = vcmp.eq.s32.totalorder %v4369_v47, %v4319_v54 }
 0x120   : > { %v4321_v60 = vpop.permute.xlu1 %1861  ;;  %v4323_v61 = vpop.permute.xlu0 %1864 }
 0x121   : > { %vm1954_vm11 = vcmp.eq.s32.totalorder %v4361_v41, %v4321_v60  ;;  %vm1955_vm12 = vcmp.eq.s32.totalorder %v4369_v47, %v4321_v60  ;;  %vm1956_vm13 = vcmp.eq.s32.totalorder %v4361_v41, %v4323_v61  ;;  %vm1957_vm14 = vcmp.eq.s32.totalorder %v4369_v47, %v4323_v61 }
 0x124   : > { %v4325_v62 = vpop.permute.xlu1 %1867  ;;  %v4327_v63 = vpop.permute.xlu0 %1870 }
 0x128   : > { %v4329_v4 = vpop.permute.xlu1 %1873  ;;  %v4331_v0 = vpop.permute.xlu0 %1876 }
 0x12c   : > { %v4333_v3 = vpop.permute.xlu1 %1879  ;;  %v4335_v7 = vpop.permute.xlu0 %1882 }
 0x130   : > { %v4337_v8 = vpop.permute.xlu1 %1885  ;;  %v4339_v9 = vpop.permute.xlu0 %1888 }
 0x134   : > { %v4346_v25 = vpop.permute.xlu1 %1891  ;;  %v4348_v26 = vpop.permute.xlu0 %1894 }
 0x13a   : > { %v4365_v43 = vpop.permute.xlu1 %1897  ;;  %v4367_v44 = vpop.permute.xlu0 %1900 }
 0x13e   : > { %v1904_v21 = vpop.permute.xlu1 %1903  ;;  %v1907_v17 = vpop.permute.xlu0 %1906 }
 0x13f   : > { %vm1982_vm5 = vcmp.eq.s32.totalorder %v4361_v41, %v1904_v21  ;;  %vm1983_vm6 = vcmp.eq.s32.totalorder %v4369_v47, %v1904_v21  ;;  %vm1984_vm7 = vcmp.eq.s32.totalorder %v4361_v41, %v1907_v17  ;;  %vm1985_vm8 = vcmp.eq.s32.totalorder %v4369_v47, %v1907_v17 }
 0x142   : > { %v1913_v14 = vpop.permute.xlu0 %1912 }
 0x18c   : > { %v693_v50 = vpop.f32.mrb[0].mxu0  ;;  %v773_v51 = vpop.f32.mrb[0].mxu1 }
 0x18d   : > { %v694_v52 = vadd.f32 %v693_v50, %v4358_v40  ;;  %v695_v53 = vpop.f32.mrb[1].mxu0  ;;  %v775_v10 = vpop.f32.mrb[1].mxu1  ;;  %v774_v27 = vadd.f32 %v773_v51, %v4358_v40 }
 0x18e   : > { %v696_v30 = vadd.f32 %v695_v53, %v4363_v42  ;;  %v776_v31 = vadd.f32 %v775_v10, %v4363_v42  ;;  %v697_v20 = vpop.f32.mrb[2].mxu0  ;;  %v777_v33 = vpop.f32.mrb[2].mxu1 }
 0x18f   : > { %v4379_v34 = vsel %vm891_vm1, %v694_v52, -inf  ;;  %v699_v37 = vpop.f32.mrb[3].mxu0  ;;  %v779_v32 = vpop.f32.mrb[3].mxu1  ;;  %v778_v51 = vadd.f32 %v777_v33, %v4358_v40  ;;  %v4394_v10 = vsel %vm891_vm1, %v774_v27, -inf }
 0x190   : > { %v4383_v50 = vsel %vm892_vm2, %v696_v30, -inf  ;;  %v780_v24 = vadd.f32 %v779_v32, %v4363_v42  ;;  %v2014_v52 = vsel %vm1950_vm3, %v4379_v34, 0.0  ;;  %v4398_v30 = vsel %vm892_vm2, %v776_v31, -inf }
 0x191   : > { %7139 = vst [vmem:[#allocation54_spill] sm:$0xff] %v4383_v50  ;;  %v989_v53 = vmax.f32 %v4379_v34, %v4383_v50  ;;  %7140 = vst [vmem:[#allocation55_spill] sm:$0xff] %v4398_v30  ;;  %v2015_v32 = vsel %vm1951_vm4, %v4383_v50, 0.0  ;;  %v1037_v16 = vmax.f32 %v4394_v10, %v4398_v30  ;;  %v4409_v5 = vsel %vm891_vm1, %v778_v51, -inf }
 0x192   : > { %v2078_v33 = vadd.f32 %v2015_v32, %v2014_v52  ;;  %v4405_v57 = vsel %vm892_vm2, %v780_v24, -inf  ;;  %7142 = vst [vmem:[#allocation57_spill] sm:$0xff] %v4409_v5  ;;  %v700_v52 = vadd.f32 %v699_v37, %v4363_v42  ;;  %v2046_v1 = vsel %vm1982_vm5, %v4394_v10, 0.0 }
 0x193   : > { %990 = vmax.xlane.f32.xlu0 %v989_v53  ;;  %7141 = vst [vmem:[#allocation56_spill] sm:$0xff] %v4405_v57  ;;  %v698_v53 = vadd.f32 %v697_v20, %v4358_v40  ;;  %v2047_v59 = vsel %vm1983_vm6, %v4398_v30, 0.0  ;;  %v2048_v37 = vsel %vm1984_vm7, %v4409_v5, 0.0  ;;  %v2049_v56 = vsel %vm1985_vm8, %v4405_v57, 0.0 }
 0x194   : > { %v703_v6 = vpop.f32.mrb[4].mxu0  ;;  %v783_v27 = vpop.f32.mrb[4].mxu1  ;;  %2079 = vadd.xlane.f32.xlu1 %v2078_v33  ;;  %v1040_v33 = vmax.f32 %v4409_v5, %v4405_v57  ;;  %v2126_v55 = vadd.f32 %v2047_v59, %v2046_v1  ;;  %v4431_v49 = vsel %vm892_vm2, %v700_v52, -inf  ;;  %v2129_v17 = vadd.f32 %v2049_v56, %v2048_v37 }
 0x195   : > { %v705_v31 = vpop.f32.mrb[5].mxu0  ;;  %v785_v2 = vpop.f32.mrb[5].mxu1  ;;  %v704_v21 = vadd.f32 %v703_v6, %v4358_v40  ;;  %7144 = vst [vmem:[#allocation59_spill] sm:$0xff] %v4431_v49  ;;  %v784_v1 = vadd.f32 %v783_v27, %v4358_v40  ;;  %vm1988_vm3 = vcmp.eq.s32.totalorder %v4361_v41, %v1913_v14  ;;  %vm1989_vm4 = vcmp.eq.s32.totalorder %v4369_v47, %v1913_v14 }
 0x196   : > { %v707_v32 = vpop.f32.mrb[6].mxu0  ;;  %v787_v24 = vpop.f32.mrb[6].mxu1  ;;  %v706_v20 = vadd.f32 %v705_v31, %v4363_v42  ;;  %vm1958_vm5 = vcmp.eq.s32.totalorder %v4361_v41, %v4325_v62  ;;  %vm1959_vm6 = vcmp.eq.s32.totalorder %v4369_v47, %v4325_v62  ;;  %vm1960_vm7 = vcmp.eq.s32.totalorder %v4361_v41, %v4327_v63 }
 0x197   : > { %v709_v58 = vpop.f32.mrb[7].mxu0  ;;  %v789_v51 = vpop.f32.mrb[7].mxu1  ;;  %1038 = vmax.xlane.f32.xlu0 %v1037_v16  ;;  %v4427_v16 = vsel %vm891_vm1, %v698_v53, -inf  ;;  %v4435_v6 = vsel %vm891_vm1, %v704_v21, -inf  ;;  %v708_v37 = vadd.f32 %v707_v32, %v4358_v40  ;;  %v788_v45 = vadd.f32 %v787_v24, %v4358_v40 }
 0x198   : > { %1041 = vmax.xlane.f32.xlu1 %v1040_v33  ;;  %7143 = vst [vmem:[#allocation58_spill] sm:$0xff] %v4427_v16  ;;  %7145 = vst [vmem:[#allocation60_spill] sm:$0xff] %v4435_v6  ;;  %v4439_v31 = vsel %vm892_vm2, %v706_v20, -inf  ;;  %v992_v53 = vmax.f32 %v4427_v16, %v4431_v49  ;;  %v2016_v21 = vsel %vm1952_vm9, %v4427_v16, 0.0  ;;  %v786_v20 = vadd.f32 %v785_v2, %v4363_v42  ;;  %v1910_v24 = vpop.permute.xlu1 %1909 }
 0x199   : > { %7146 = vst [vmem:[#allocation61_spill] sm:$0xff] %v4439_v31  ;;  %v995_v52 = vmax.f32 %v4435_v6, %v4439_v31  ;;  %v710_v54 = vadd.f32 %v709_v58, %v4363_v42  ;;  %v790_v38 = vadd.f32 %v789_v51, %v4363_v42  ;;  %v4469_v58 = vsel %vm891_vm1, %v784_v1, -inf }
 0x19a   : > { %7147 = vst [vmem:[#allocation62_spill] sm:$0xff] %v4469_v58  ;;  %v4473_v32 = vsel %vm892_vm2, %v786_v20, -inf  ;;  %v4477_v36 = vsel %vm891_vm1, %v708_v37, -inf  ;;  %v4501_v20 = vsel %vm891_vm1, %v788_v45, -inf  ;;  %vm1986_vm15 = vcmp.eq.s32.totalorder %v4361_v41, %v1910_v24 }
 0x19b   : > { %2127 = vadd.xlane.f32.xlu0 %v2126_v55  ;;  %7148 = vst [vmem:[#allocation63_spill] sm:$0xff] %v4473_v32  ;;  %7149 = vst [vmem:[#allocation64_spill] sm:$0xff] %v4477_v36  ;;  %v1043_v1 = vmax.f32 %v4469_v58, %v4473_v32  ;;  %v4505_v37 = vsel %vm892_vm2, %v790_v38, -inf  ;;  %vm1987_vm0 = vcmp.eq.s32.totalorder %v4369_v47, %v1910_v24  ;;  %v2018_v35 = vsel %vm1954_vm11, %v4435_v6, 0.0 }
 0x19c   : > { %v713_v33 = vpop.f32.mrb[8].mxu0  ;;  %v793_v59 = vpop.f32.mrb[8].mxu1  ;;  %2130 = vadd.xlane.f32.xlu1 %v2129_v17  ;;  %v2017_v17 = vsel %vm1953_vm10, %v4431_v49, 0.0  ;;  %7151 = vst [vmem:[#allocation66_spill] sm:$0xff] %v4501_v20  ;;  %7152 = vst [vmem:[#allocation67_spill] sm:$0xff] %v4505_v37  ;;  %v1046_v45 = vmax.f32 %v4501_v20, %v4505_v37  ;;  %v2019_v38 = vsel %vm1955_vm12, %v4439_v31, 0.0  ;;  %vm1961_vm8 = vcmp.eq.s32.totalorder %v4369_v47, %v4327_v63 }
 0x19d   : > { %v715_v55 = vpop.f32.mrb[9].mxu0  ;;  %v4446_v56 = vpop.f32.mrb[9].mxu1  ;;  %v2081_v2 = vadd.f32 %v2017_v17, %v2016_v21  ;;  %v714_v29 = vadd.f32 %v713_v33, %v4358_v40  ;;  %v2050_v22 = vsel %vm1986_vm15, %v4469_v58, 0.0  ;;  %v2051_v19 = vsel %vm1987_vm0, %v4473_v32, 0.0 }
 0x19e   : > { %v4456_v48 = vpop.f32.mrb[10].mxu0  ;;  %v4458_v27 = vpop.f32.mrb[10].mxu1  ;;  %v794_v18 = vadd.f32 %v793_v59, %v4358_v40  ;;  %v716_v15 = vadd.f32 %v715_v55, %v4363_v42  ;;  %v2084_v33 = vadd.f32 %v2019_v38, %v2018_v35  ;;  %v2132_v13 = vadd.f32 %v2051_v19, %v2050_v22 }
 0x19f   : > { %v4461_v46 = vpop.f32.mrb[11].mxu0  ;;  %v4463_v39 = vpop.f32.mrb[11].mxu1  ;;  %993 = vmax.xlane.f32.xlu0 %v992_v53  ;;  %v4481_v53 = vsel %vm892_vm2, %v710_v54, -inf  ;;  %v796_v59 = vadd.f32 %v4446_v56, %v4363_v42  ;;  %v2052_v35 = vsel %vm1988_vm3, %v4501_v20, 0.0  ;;  %v2053_v19 = vsel %vm1989_vm4, %v4505_v37, 0.0 }
 0x1a0   : > { %996 = vmax.xlane.f32.xlu1 %v995_v52  ;;  %7150 = vst [vmem:[#allocation65_spill] sm:$0xff] %v4481_v53  ;;  %v998_v51 = vmax.f32 %v4477_v36, %v4481_v53  ;;  %v2021_v24 = vsel %vm1957_vm14, %v4481_v53, 0.0  ;;  %v4539_v61 = vpop.permute.xlu1 %1915  ;;  %v4557_v14 = vsel %vm891_vm1, %v794_v18, -inf  ;;  %v4561_v22 = vsel %vm892_vm2, %v716_v15, -inf  ;;  %v1919_v37 = vpop.permute.xlu0 %1918 }
 0x1a1   : > { %7154 = vst [vmem:[#allocation69_spill] sm:$0xff] %v4557_v14  ;;  %7155 = vst [vmem:[#allocation70_spill] sm:$0xff] %v4561_v22  ;;  %v798_v55 = vadd.f32 %v4458_v27, %v4358_v40  ;;  %vm1990_vm9 = vcmp.eq.s32.totalorder %v4361_v41, %v4539_v61  ;;  %vm1991_vm10 = vcmp.eq.s32.totalorder %v4369_v47, %v4539_v61 }
 0x1a2   : > { %v720_v18 = vadd.f32 %v4461_v46, %v4363_v42  ;;  %v800_v15 = vadd.f32 %v4463_v39, %v4363_v42  ;;  %vm1992_vm11 = vcmp.eq.s32.totalorder %v4361_v41, %v1919_v37  ;;  %v2054_v62 = vsel %vm1990_vm9, %v4557_v14, 0.0 }
 0x1a3   : > { %2082 = vadd.xlane.f32.xlu0 %v2081_v2  ;;  %vm1993_vm12 = vcmp.eq.s32.totalorder %v4369_v47, %v1919_v37  ;;  %vm1963_vm14 = vcmp.eq.s32.totalorder %v4369_v47, %v4329_v4  ;;  %vm1964_vm15 = vcmp.eq.s32.totalorder %v4361_v41, %v4331_v0  ;;  %vm1965_vm0 = vcmp.eq.s32.totalorder %v4369_v47, %v4331_v0 }
 0x1a4   : > { %v4487_v52 = vpop.f32.mrb[12].mxu0  ;;  %v4489_v21 = vpop.f32.mrb[12].mxu1  ;;  %999 = vmax.xlane.f32.xlu1 %v998_v51  ;;  %v2020_v51 = vsel %vm1956_vm13, %v4477_v36, 0.0  ;;  %v2135_v36 = vadd.f32 %v2053_v19, %v2052_v35  ;;  %vm1962_vm13 = vcmp.eq.s32.totalorder %v4361_v41, %v4329_v4 }
 0x1a5   : > { %v4507_v54 = vpop.f32.mrb[13].mxu0  ;;  %v4509_v17 = vpop.f32.mrb[13].mxu1  ;;  %v2087_v12 = vadd.f32 %v2021_v24, %v2020_v51  ;;  %v724_v63 = vadd.f32 %v4487_v52, %v4358_v40 }
 0x1a6   : > { %v4513_v60 = vpop.f32.mrb[14].mxu0  ;;  %v4515_v2 = vpop.f32.mrb[14].mxu1 }
 0x1a7   : > { %v4523_v28 = vpop.f32.mrb[15].mxu0  ;;  %v4525_v23 = vpop.f32.mrb[15].mxu1  ;;  %1044 = vmax.xlane.f32.xlu0 %v1043_v1  ;;  %v4543_v1 = vsel %vm891_vm1, %v714_v29, -inf  ;;  %v718_v29 = vadd.f32 %v4456_v48, %v4358_v40 }
 0x1a8   : > { %1047 = vmax.xlane.f32.xlu1 %v1046_v45  ;;  %7153 = vst [vmem:[#allocation68_spill] sm:$0xff] %v4543_v1  ;;  %v1001_v46 = vmax.f32 %v4543_v1, %v4561_v22  ;;  %v730_v37 = vadd.f32 %v4523_v28, %v4363_v42 }
 0x1ab   : > { %2085 = vadd.xlane.f32.xlu0 %v2084_v33 }
 0x1ac   : > { %v733_v56 = vpop.f32.mrb[16].mxu0  ;;  %v813_v45 = vpop.f32.mrb[16].mxu1  ;;  %2088 = vadd.xlane.f32.xlu1 %v2087_v12 }
 0x1ad   : > { %v734_v38 = vadd.f32 %v733_v56, %v4358_v40  ;;  %v814_v48 = vadd.f32 %v813_v45, %v4358_v40  ;;  %v735_v27 = vpop.f32.mrb[17].mxu0  ;;  %v815_v51 = vpop.f32.mrb[17].mxu1 }
 0x1ae   : > { %v736_v24 = vadd.f32 %v735_v27, %v4363_v42  ;;  %v816_v33 = vadd.f32 %v815_v51, %v4363_v42  ;;  %v737_v11 = vpop.f32.mrb[18].mxu0  ;;  %v817_v53 = vpop.f32.mrb[18].mxu1 }
 0x1af   : > { %v4583_v39 = vsel %vm891_vm1, %v734_v38, -inf  ;;  %v4587_v56 = vsel %vm891_vm1, %v814_v48, -inf  ;;  %v738_v12 = vadd.f32 %v737_v11, %v4358_v40  ;;  %v818_v45 = vadd.f32 %v817_v53, %v4358_v40  ;;  %v739_v27 = vpop.f32.mrb[19].mxu0  ;;  %v819_v51 = vpop.f32.mrb[19].mxu1  ;;  %2133 = vadd.xlane.f32.xlu0 %v2132_v13 }
 0x1b0   : > { %v4593_v35 = vsel %vm892_vm2, %v736_v24, -inf  ;;  %v4597_v19 = vsel %vm892_vm2, %v816_v33, -inf  ;;  %v740_v38 = vadd.f32 %v739_v27, %v4363_v42  ;;  %v820_v48 = vadd.f32 %v819_v51, %v4363_v42  ;;  %2136 = vadd.xlane.f32.xlu1 %v2135_v36 }
 0x1b1   : > { %v4603_v11 = vsel %vm891_vm1, %v718_v29, -inf  ;;  %v4607_v13 = vsel %vm892_vm2, %v720_v18, -inf  ;;  %v4611_v53 = vsel %vm891_vm1, %v738_v12, -inf  ;;  %v4615_v24 = vsel %vm891_vm1, %v818_v45, -inf }
 0x1b2   : > { %7156 = vst [vmem:[#allocation71_spill] sm:$0xff] %v4603_v11  ;;  %7157 = vst [vmem:[#allocation72_spill] sm:$0xff] %v4607_v13  ;;  %v4619_v33 = vsel %vm892_vm2, %v796_v59, -inf  ;;  %v4623_v29 = vsel %vm891_vm1, %v798_v55, -inf  ;;  %v4627_v18 = vsel %vm892_vm2, %v740_v38, -inf  ;;  %v4631_v12 = vsel %vm892_vm2, %v820_v48, -inf }
 0x1b3   : > { %7158 = vst [vmem:[#allocation73_spill] sm:$0xff] %v4619_v33  ;;  %7159 = vst [vmem:[#allocation74_spill] sm:$0xff] %v4623_v29  ;;  %v4636_v36 = vsel %vm892_vm2, %v800_v15, -inf  ;;  %1002 = vmax.xlane.f32.xlu0 %v1001_v46  ;;  %v1004_v59 = vmax.f32 %v4603_v11, %v4607_v13  ;;  %v1049_v55 = vmax.f32 %v4557_v14, %v4619_v33  ;;  %v2022_v45 = vsel %vm1958_vm5, %v4543_v1, 0.0 }
 0x1b4   : > { %7160 = vst [vmem:[#allocation75_spill] sm:$0xff] %v4636_v36  ;;  %v743_v27 = vpop.f32.mrb[20].mxu0  ;;  %v823_v51 = vpop.f32.mrb[20].mxu1  ;;  %v1052_v38 = vmax.f32 %v4623_v29, %v4636_v36  ;;  %v2023_v15 = vsel %vm1959_vm6, %v4561_v22, 0.0  ;;  %v2024_v46 = vsel %vm1960_vm7, %v4603_v11, 0.0  ;;  %v2025_v48 = vsel %vm1961_vm8, %v4607_v13, 0.0 }
 0x1b5   : > { %v744_v1 = vadd.f32 %v743_v27, %v4358_v40  ;;  %v824_v20 = vadd.f32 %v823_v51, %v4358_v40  ;;  %1005 = vmax.xlane.f32.xlu1 %v1004_v59  ;;  %v745_v32 = vpop.f32.mrb[21].mxu0  ;;  %v825_v58 = vpop.f32.mrb[21].mxu1  ;;  %v2055_v11 = vsel %vm1991_vm10, %v4619_v33, 0.0  ;;  %v726_v27 = vadd.f32 %v4507_v54, %v4363_v42 }
 0x1b6   : > { %v746_v59 = vadd.f32 %v745_v32, %v4363_v42  ;;  %v826_v51 = vadd.f32 %v825_v58, %v4363_v42  ;;  %v747_v13 = vpop.f32.mrb[22].mxu0  ;;  %v827_v22 = vpop.f32.mrb[22].mxu1  ;;  %vm1967_vm6 = vcmp.eq.s32.totalorder %v4369_v47, %v4333_v3  ;;  %vm1968_vm7 = vcmp.eq.s32.totalorder %v4361_v41, %v4335_v7 }
 0x1b7   : > { %v4678_v14 = vsel %vm891_vm1, %v744_v1, -inf  ;;  %v4682_v61 = vsel %vm891_vm1, %v824_v20, -inf  ;;  %v748_v33 = vadd.f32 %v747_v13, %v4358_v40  ;;  %v828_v52 = vadd.f32 %v827_v22, %v4358_v40  ;;  %v749_v31 = vpop.f32.mrb[23].mxu0  ;;  %v829_v54 = vpop.f32.mrb[23].mxu1  ;;  %1050 = vmax.xlane.f32.xlu0 %v1049_v55 }
 0x1b8   : > { %v4688_v58 = vsel %vm892_vm2, %v746_v59, -inf  ;;  %v4692_v32 = vsel %vm892_vm2, %v826_v51, -inf  ;;  %v750_v1 = vadd.f32 %v749_v31, %v4363_v42  ;;  %v830_v20 = vadd.f32 %v829_v54, %v4363_v42 }
 0x1b9   : > { %v4698_v13 = vsel %vm891_vm1, %v748_v33, -inf  ;;  %v4702_v22 = vsel %vm891_vm1, %v828_v52, -inf  ;;  %1053 = vmax.xlane.f32.xlu1 %v1052_v38  ;;  %v2090_v55 = vadd.f32 %v2023_v15, %v2022_v45  ;;  %v804_v59 = vadd.f32 %v4489_v21, %v4358_v40 }
 0x1ba   : > { %v4709_v31 = vsel %vm892_vm2, %v750_v1, -inf  ;;  %v4713_v51 = vsel %vm892_vm2, %v830_v20, -inf  ;;  %v2093_v33 = vadd.f32 %v2025_v48, %v2024_v46  ;;  %v806_v52 = vadd.f32 %v4509_v17, %v4363_v42 }
 0x1bb   : > { %2091 = vadd.xlane.f32.xlu0 %v2090_v55  ;;  %v2138_v38 = vadd.f32 %v2055_v11, %v2054_v62  ;;  %v2056_v45 = vsel %vm1992_vm11, %v4623_v29, 0.0  ;;  %v2057_v21 = vsel %vm1993_vm12, %v4636_v36, 0.0  ;;  %v4723_v15 = vsel %vm891_vm1, %v724_v63, -inf }
 0x1bc   : > { %7161 = vst [vmem:[#allocation76_spill] sm:$0xff] %v4723_v15  ;;  %v4727_v54 = vsel %vm892_vm2, %v726_v27, -inf  ;;  %v728_v46 = vadd.f32 %v4513_v60, %v4358_v40  ;;  %v808_v17 = vadd.f32 %v4515_v2, %v4358_v40  ;;  %v753_v11 = vpop.f32.mrb[24].mxu0  ;;  %v833_v48 = vpop.f32.mrb[24].mxu1  ;;  %v810_v62 = vadd.f32 %v4525_v23, %v4363_v42 }
 0x1bd   : > { %7162 = vst [vmem:[#allocation77_spill] sm:$0xff] %v4727_v54  ;;  %v754_v63 = vadd.f32 %v753_v11, %v4358_v40  ;;  %v834_v27 = vadd.f32 %v833_v48, %v4358_v40  ;;  %2094 = vadd.xlane.f32.xlu1 %v2093_v33  ;;  %v755_v60 = vpop.f32.mrb[25].mxu0  ;;  %v835_v1 = vpop.f32.mrb[25].mxu1  ;;  %v2141_v28 = vadd.f32 %v2057_v21, %v2056_v45 }
 0x1be   : > { %v756_v2 = vadd.f32 %v755_v60, %v4363_v42  ;;  %v836_v20 = vadd.f32 %v835_v1, %v4363_v42  ;;  %v757_v55 = vpop.f32.mrb[26].mxu0  ;;  %v837_v36 = vpop.f32.mrb[26].mxu1  ;;  %v1007_v23 = vmax.f32 %v4723_v15, %v4727_v54  ;;  %vm1969_vm8 = vcmp.eq.s32.totalorder %v4369_v47, %v4335_v7 }
 0x1bf   : > { %v4749_v11 = vsel %vm891_vm1, %v754_v63, -inf  ;;  %v4753_v33 = vsel %vm891_vm1, %v834_v27, -inf  ;;  %v758_v48 = vadd.f32 %v757_v55, %v4358_v40  ;;  %v838_v60 = vadd.f32 %v837_v36, %v4358_v40  ;;  %v759_v29 = vpop.f32.mrb[27].mxu0  ;;  %v839_v1 = vpop.f32.mrb[27].mxu1  ;;  %2139 = vadd.xlane.f32.xlu0 %v2138_v38 }
 0x1c0   : > { %v4759_v45 = vsel %vm892_vm2, %v756_v2, -inf  ;;  %v4763_v21 = vsel %vm892_vm2, %v836_v20, -inf  ;;  %v760_v63 = vadd.f32 %v759_v29, %v4363_v42  ;;  %v840_v27 = vadd.f32 %v839_v1, %v4363_v42 }
 0x1c1   : > { %v4769_v55 = vsel %vm891_vm1, %v804_v59, -inf  ;;  %v4773_v36 = vsel %vm892_vm2, %v806_v52, -inf  ;;  %v4777_v38 = vsel %vm891_vm1, %v758_v48, -inf  ;;  %v4781_v2 = vsel %vm891_vm1, %v838_v60, -inf  ;;  %2142 = vadd.xlane.f32.xlu1 %v2141_v28  ;;  %v1922_v48 = vpop.permute.xlu1 %1921 }
 0x1c2   : > { %v4785_v29 = vsel %vm891_vm1, %v728_v46, -inf  ;;  %v4789_v59 = vsel %vm892_vm2, %v730_v37, -inf  ;;  %v4793_v52 = vsel %vm892_vm2, %v760_v63, -inf  ;;  %v4797_v20 = vsel %vm892_vm2, %v840_v27, -inf }
 0x1c3   : > { %7163 = vst [vmem:[#allocation78_spill] sm:$0xff] %v4785_v29  ;;  %1008 = vmax.xlane.f32.xlu0 %v1007_v23  ;;  %v1010_v28 = vmax.f32 %v4785_v29, %v4789_v59  ;;  %v1055_v46 = vmax.f32 %v4769_v55, %v4773_v36  ;;  %v4809_v37 = vsel %vm891_vm1, %v808_v17, -inf  ;;  %v4813_v60 = vsel %vm892_vm2, %v810_v62, -inf }
 0x1c4   : > { %v763_v23 = vpop.f32.mrb[28].mxu0  ;;  %v843_v1 = vpop.f32.mrb[28].mxu1  ;;  %vm1994_vm3 = vcmp.eq.s32.totalorder %v4361_v41, %v1922_v48  ;;  %vm1995_vm4 = vcmp.eq.s32.totalorder %v4369_v47, %v1922_v48  ;;  %v1058_v17 = vmax.f32 %v4809_v37, %v4813_v60  ;;  %v2026_v62 = vsel %vm1962_vm13, %v4723_v15, 0.0 }
 0x1c5   : > { %v764_v63 = vadd.f32 %v763_v23, %v4358_v40  ;;  %v844_v27 = vadd.f32 %v843_v1, %v4358_v40  ;;  %1011 = vmax.xlane.f32.xlu1 %v1010_v28  ;;  %v765_v6 = vpop.f32.mrb[29].mxu0  ;;  %v845_v49 = vpop.f32.mrb[29].mxu1  ;;  %v2027_v28 = vsel %vm1963_vm14, %v4727_v54, 0.0  ;;  %v2028_v23 = vsel %vm1964_vm15, %v4785_v29, 0.0 }
 0x1c6   : > { %v766_v16 = vadd.f32 %v765_v6, %v4363_v42  ;;  %v846_v57 = vadd.f32 %v845_v49, %v4363_v42  ;;  %v767_v5 = vpop.f32.mrb[30].mxu0  ;;  %v847_v50 = vpop.f32.mrb[30].mxu1  ;;  %v2058_v0 = vsel %vm1994_vm3, %v4769_v55, 0.0  ;;  %v1013_v48 = vmax.f32 %v4583_v39, %v4593_v35 }
 0x1c7   : > { %v4837_v1 = vsel %vm891_vm1, %v764_v63, -inf  ;;  %v4841_v6 = vsel %vm891_vm1, %v844_v27, -inf  ;;  %v768_v49 = vadd.f32 %v767_v5, %v4358_v40  ;;  %v848_v15 = vadd.f32 %v847_v50, %v4358_v40  ;;  %v769_v30 = vpop.f32.mrb[31].mxu0  ;;  %v849_v4 = vpop.f32.mrb[31].mxu1  ;;  %1056 = vmax.xlane.f32.xlu0 %v1055_v46 }
 0x1c8   : > { %v4847_v54 = vsel %vm892_vm2, %v766_v16, -inf  ;;  %v4851_v29 = vsel %vm892_vm2, %v846_v57, -inf  ;;  %v770_v63 = vadd.f32 %v769_v30, %v4363_v42  ;;  %v2029_v5 = vsel %vm1965_vm0, %v4789_v59, 0.0  ;;  %v1925_v46 = vpop.permute.xlu0 %1924 }
 0x1c9   : > { %v4860_v40 = vsel %vm891_vm1, %v768_v49, -inf  ;;  %v4864_v50 = vsel %vm891_vm1, %v848_v15, -inf  ;;  %v850_v16 = vadd.f32 %v849_v4, %v4363_v42  ;;  %1059 = vmax.xlane.f32.xlu1 %v1058_v17  ;;  %v2096_v57 = vadd.f32 %v2027_v28, %v2026_v62 }
 0x1ca   : > { %v4869_v30 = vsel %vm892_vm2, %v770_v63, -inf  ;;  %v2059_v27 = vsel %vm1995_vm4, %v4773_v36, 0.0  ;;  %v2099_v42 = vadd.f32 %v2029_v5, %v2028_v23  ;;  %vm1996_vm1 = vcmp.eq.s32.totalorder %v4361_v41, %v1925_v46 }
 0x1cb   : > { %v4879_v15 = vsel %vm892_vm2, %v850_v16, -inf  ;;  %2097 = vadd.xlane.f32.xlu0 %v2096_v57  ;;  %vm1997_vm5 = vcmp.eq.s32.totalorder %v4369_v47, %v1925_v46  ;;  %v2060_v17 = vsel %vm1996_vm1, %v4809_v37, 0.0  ;;  %v2144_v28 = vadd.f32 %v2059_v27, %v2058_v0  ;;  %v1928_v57 = vpop.permute.xlu1 %1927 }
 0x1cc   : > { %v2061_v62 = vsel %vm1997_vm5, %v4813_v60, 0.0  ;;  %v1016_v23 = vmax.f32 %v4611_v53, %v4627_v18  ;;  %v1061_v4 = vmax.f32 %v4587_v56, %v4597_v19  ;;  %vm1966_vm2 = vcmp.eq.s32.totalorder %v4361_v41, %v4333_v3  ;;  %v1931_v27 = vpop.permute.xlu0 %1930 }
 0x1cd   : > { %2100 = vadd.xlane.f32.xlu1 %v2099_v42  ;;  %v2147_v49 = vadd.f32 %v2061_v62, %v2060_v17  ;;  %v2030_v63 = vsel %vm1966_vm2, %v4583_v39, 0.0  ;;  %v2031_v5 = vsel %vm1967_vm6, %v4593_v35, 0.0  ;;  %v1064_v16 = vmax.f32 %v4615_v24, %v4631_v12 }
 0x1ce   : > { %v2032_v46 = vsel %vm1968_vm7, %v4611_v53, 0.0  ;;  %v2033_v0 = vsel %vm1969_vm8, %v4627_v18, 0.0  ;;  %v2102_v3 = vadd.f32 %v2031_v5, %v2030_v63  ;;  %vm1998_vm9 = vcmp.eq.s32.totalorder %v4361_v41, %v1928_v57 }
 0x1cf   : > { %2145 = vadd.xlane.f32.xlu0 %v2144_v28  ;;  %vm1999_vm10 = vcmp.eq.s32.totalorder %v4369_v47, %v1928_v57  ;;  %v2062_v42 = vsel %vm1998_vm9, %v4587_v56, 0.0  ;;  %v2105_v62 = vadd.f32 %v2033_v0, %v2032_v46  ;;  %vm2000_vm11 = vcmp.eq.s32.totalorder %v4361_v41, %v1931_v27  ;;  %v1934_v46 = vpop.permute.xlu1 %1933 }
 0x1d0   : > { %v2063_v17 = vsel %vm1999_vm10, %v4597_v19, 0.0  ;;  %vm2001_vm12 = vcmp.eq.s32.totalorder %v4369_v47, %v1931_v27  ;;  %v2064_v7 = vsel %vm2000_vm11, %v4615_v24, 0.0  ;;  %v1067_v63 = vmax.f32 %v4682_v61, %v4692_v32  ;;  %v1937_v27 = vpop.permute.xlu0 %1936 }
 0x1d1   : > { %2148 = vadd.xlane.f32.xlu1 %v2147_v49  ;;  %v2065_v28 = vsel %vm2001_vm12, %v4631_v12, 0.0  ;;  %v2150_v49 = vadd.f32 %v2063_v17, %v2062_v42  ;;  %vm1970_vm13 = vcmp.eq.s32.totalorder %v4361_v41, %v4337_v8  ;;  %vm1971_vm14 = vcmp.eq.s32.totalorder %v4369_v47, %v4337_v8 }
 0x1d2   : > { %v2034_v5 = vsel %vm1970_vm13, %v4678_v14, 0.0  ;;  %v1070_v57 = vmax.f32 %v4702_v22, %v4713_v51  ;;  %vm1972_vm15 = vcmp.eq.s32.totalorder %v4361_v41, %v4339_v9  ;;  %vm1973_vm0 = vcmp.eq.s32.totalorder %v4369_v47, %v4339_v9 }
 0x1d3   : > { %1014 = vmax.xlane.f32.xlu0 %v1013_v48  ;;  %v2153_v48 = vadd.f32 %v2065_v28, %v2064_v7  ;;  %v2036_v0 = vsel %vm1972_vm15, %v4698_v13, 0.0  ;;  %vm2002_vm3 = vcmp.eq.s32.totalorder %v4361_v41, %v1934_v46  ;;  %vm2003_vm4 = vcmp.eq.s32.totalorder %v4369_v47, %v1934_v46 }
 0x1d4   : > { %v2066_v42 = vsel %vm2002_vm3, %v4682_v61, 0.0  ;;  %v2067_v17 = vsel %vm2003_vm4, %v4692_v32, 0.0  ;;  %vm2004_vm1 = vcmp.eq.s32.totalorder %v4361_v41, %v1937_v27  ;;  %vm2005_vm5 = vcmp.eq.s32.totalorder %v4369_v47, %v1937_v27 }
 0x1d5   : > { %1017 = vmax.xlane.f32.xlu1 %v1016_v23  ;;  %v1019_v23 = vmax.f32 %v4678_v14, %v4688_v58  ;;  %v2068_v9 = vsel %vm2004_vm1, %v4702_v22, 0.0  ;;  %v2069_v7 = vsel %vm2005_vm5, %v4713_v51, 0.0  ;;  %v2156_v28 = vadd.f32 %v2067_v17, %v2066_v42 }
 0x1d6   : > { %vm1974_vm2 = vcmp.eq.s32.totalorder %v4361_v41, %v4346_v25  ;;  %vm1975_vm6 = vcmp.eq.s32.totalorder %v4369_v47, %v4346_v25  ;;  %vm1976_vm7 = vcmp.eq.s32.totalorder %v4361_v41, %v4348_v26  ;;  %vm1977_vm8 = vcmp.eq.s32.totalorder %v4369_v47, %v4348_v26 }
 0x1d7   : > { %1062 = vmax.xlane.f32.xlu0 %v1061_v4  ;;  %v1022_v4 = vmax.f32 %v4698_v13, %v4709_v31  ;;  %v2040_v46 = vsel %vm1976_vm7, %v4777_v38, 0.0  ;;  %v1034_v26 = vmax.f32 %v4860_v40, %v4869_v30  ;;  %v1031_v17 = vmax.f32 %v4837_v1, %v4847_v54 }
 0x1d8   : > { %vm1980_vm11 = vcmp.eq.s32.totalorder %v4361_v41, %v4367_v44  ;;  %vm1981_vm12 = vcmp.eq.s32.totalorder %v4369_v47, %v4367_v44  ;;  %vm1978_vm13 = vcmp.eq.s32.totalorder %v4361_v41, %v4365_v43  ;;  %vm6964_vm15 = vcmask 7168  }
 0x1d9   : > { %1065 = vmax.xlane.f32.xlu1 %v1064_v16  ;;  %v2035_v16 = vsel %vm1971_vm14, %v4688_v58, 0.0  ;;  %vm1979_vm14 = vcmp.eq.s32.totalorder %v4369_v47, %v4365_v43  ;;  %v1822_v43 = vld [vmem:[#allocation4] sm:$0xff] }
 0x1da   : > { %v2108_v8 = vadd.f32 %v2035_v16, %v2034_v5  ;;  %v2039_v5 = vsel %vm1975_vm6, %v4759_v45, 0.0  ;;  %v1076_v16 = vmax.f32 %v4781_v2, %v4797_v20 }
 0x1db   : > { %2103 = vadd.xlane.f32.xlu0 %v2102_v3  ;;  %v2037_v3 = vsel %vm1973_vm0, %v4709_v31, 0.0 }
 0x1dd   : > { %2106 = vadd.xlane.f32.xlu1 %v2105_v62  ;;  %v2111_v62 = vadd.f32 %v2037_v3, %v2036_v0  ;;  %v2041_v0 = vsel %vm1977_vm8, %v4793_v52, 0.0 }
 0x1de   : > { %v2117_v27 = vadd.f32 %v2041_v0, %v2040_v46 }
 0x1df   : > { %2151 = vadd.xlane.f32.xlu0 %v2150_v49  ;;  %v2159_v49 = vadd.f32 %v2069_v7, %v2068_v9  ;;  %v2044_v9 = vsel %vm1980_vm11, %v4860_v40, 0.0  ;;  %v2045_v7 = vsel %vm1981_vm12, %v4869_v30, 0.0 }
 0x1e0   : > { %v2123_v44 = vadd.f32 %v2045_v7, %v2044_v9  ;;  %v5052_v9 = vld [vmem:[#allocation2 + $0x98] sm:$0xff] }
 0x1e1   : > { %2154 = vadd.xlane.f32.xlu1 %v2153_v48  ;;  %v1025_v48 = vmax.f32 %v4749_v11, %v4759_v45  ;;  %7178 = vst [vmem:[#allocation93_spill] sm:$0xff] %v5052_v9 }
 0x1e3   : > { %1020 = vmax.xlane.f32.xlu0 %v1019_v23  ;;  %v1028_v23 = vmax.f32 %v4777_v38, %v4793_v52 }
 0x1e5   : > { %1023 = vmax.xlane.f32.xlu1 %v1022_v4  ;;  %v1073_v4 = vmax.f32 %v4753_v33, %v4763_v21 }
 0x1e7   : > { %1068 = vmax.xlane.f32.xlu0 %v1067_v63  ;;  %v2038_v63 = vsel %vm1974_vm2, %v4749_v11, 0.0 }
 0x1e8   : > { %v2114_v25 = vadd.f32 %v2039_v5, %v2038_v63 }
 0x1e9   : > { %1071 = vmax.xlane.f32.xlu1 %v1070_v57  ;;  %v1940_v57 = vpop.permute.xlu1 %1939 }
 0x1ea   : > { %vm2006_vm9 = vcmp.eq.s32.totalorder %v4361_v41, %v1940_v57  ;;  %vm2007_vm10 = vcmp.eq.s32.totalorder %v4369_v47, %v1940_v57 }
 0x1eb   : > { %2109 = vadd.xlane.f32.xlu0 %v2108_v8  ;;  %v2070_v3 = vsel %vm2006_vm9, %v4753_v33, 0.0  ;;  %v2071_v8 = vsel %vm2007_vm10, %v4763_v21, 0.0 }
 0x1ec   : > { %v2162_v42 = vadd.f32 %v2071_v8, %v2070_v3 }
 0x1ed   : > { %2112 = vadd.xlane.f32.xlu1 %v2111_v62  ;;  %v1082_v62 = vmax.f32 %v4864_v50, %v4879_v15  ;;  %v4989_v5 = vpop.permute.xlu1 %1945 }
 0x1ee   : > { %7164 = vst [vmem:[#allocation79_spill] sm:$0xff] %v4989_v5  ;;  %v7241_v5 = vld [vmem:[#allocation64_spill] sm:$0xff] }
 0x1ef   : > { %2157 = vadd.xlane.f32.xlu0 %v2156_v28  ;;  %v1079_v28 = vmax.f32 %v4841_v6, %v4851_v29 }
 0x1f1   : > { %2160 = vadd.xlane.f32.xlu1 %v2159_v49  ;;  %v2042_v49 = vsel %vm1978_vm13, %v4837_v1, 0.0 }
 0x1f3   : > { %1026 = vmax.xlane.f32.xlu0 %v1025_v48  ;;  %v2043_v48 = vsel %vm1979_vm14, %v4847_v54, 0.0 }
 0x1f5   : > { %1029 = vmax.xlane.f32.xlu1 %v1028_v23  ;;  %v2120_v23 = vadd.f32 %v2043_v48, %v2042_v49  ;;  %v1839_v49 = vld [vmem:[#allocation4 + $0x88] sm:$0xff] }
 0x1f6   : > { %v1823_v48 = vld [vmem:[#allocation4 + $0x8] sm:$0xff] }
 0x1f7   : > { %1074 = vmax.xlane.f32.xlu0 %v1073_v4  ;;  %v4985_v4 = vpop.permute.xlu0 %1942 }
 0x1f8   : > { %vm2008_vm0 = vcmp.eq.s32.totalorder %v4361_v41, %v4985_v4  ;;  %vm2009_vm3 = vcmp.eq.s32.totalorder %v4369_v47, %v4985_v4 }
 0x1f9   : > { %1077 = vmax.xlane.f32.xlu1 %v1076_v16  ;;  %v4991_v16 = vld [vmem:[#allocation2] sm:$0xff] }
 0x1fa   : > { %7165 = vst [vmem:[#allocation80_spill] sm:$0xff] %v4991_v16 }
 0x1fb   : > { %2115 = vadd.xlane.f32.xlu0 %v2114_v25  ;;  %v4987_v63 = vpop.permute.xlu0 %1948  ;;  %v4996_v25 = vld [vmem:[#allocation2 + $0x80] sm:$0xff] }
 0x1fc   : > { %7167 = vst [vmem:[#allocation82_spill] sm:$0xff] %v4996_v25  ;;  %vm2012_vm4 = vcmp.eq.s32.totalorder %v4361_v41, %v4987_v63  ;;  %vm2013_vm1 = vcmp.eq.s32.totalorder %v4369_v47, %v4987_v63 }
 0x1fd   : > { %2118 = vadd.xlane.f32.xlu1 %v2117_v27 }
 0x1ff   : > { %2163 = vadd.xlane.f32.xlu0 %v2162_v42  ;;  %v5003_v42 = vld [vmem:[#allocation2 + $0x88] sm:$0xff] }
 0x200   : > { %7168 = vst [vmem:[#allocation83_spill] sm:$0xff] %v5003_v42 }
 0x201   : > { %1035 = vmax.xlane.f32.xlu1 %v1034_v26 }
 0x203   : > { %1032 = vmax.xlane.f32.xlu0 %v1031_v17 }
 0x205   : > { %1083 = vmax.xlane.f32.xlu1 %v1082_v62  ;;  %v1838_v62 = vld [vmem:[#allocation4 + $0x80] sm:$0xff] }
 0x207   : > { %1080 = vmax.xlane.f32.xlu0 %v1079_v28 }
 0x209   : > { %2124 = vadd.xlane.f32.xlu1 %v2123_v44 }
 0x20b   : > { %2121 = vadd.xlane.f32.xlu0 %v2120_v23 }
 0x220   : > { %v991_v57 = vpop.xlane.xlu0 %990 }
 0x221   : > { %v4994_v46 = vmax.f32 %v4991_v16, %v991_v57  ;;  %v2080_v0 = vpop.xlane.xlu1 %2079  ;;  %v5022_v57 = vld [vmem:[#allocation2 + $0x8] sm:$0xff]  ;;  %v7232_v16 = vld [vmem:[#allocation56_spill] sm:$0xff] }
 0x222   : > { %v2174_v8 = vadd.f32 %v2080_v0, %v1822_v43  ;;  %7171 = vst [vmem:[#allocation86_spill] sm:$0xff] %v5022_v57 }
 0x223   : > { %7166 = vst [vmem:[#allocation81_spill] sm:$0xff] %v4994_v46  ;;  %1790 = vst.msk [vmem:[#allocation2] sm:$0xff] %vm6964_vm15, %v4994_v46  ;;  %1215 = vperm.xlu0 %3275, %v4994_v46  }
 0x224   : > { %v1039_v27 = vpop.xlane.xlu0 %1038  ;;  %2206 = vst.msk [vmem:[#allocation4] sm:$0xff] %vm6964_vm15, %v2174_v8  ;;  %v5025_v8 = vld [vmem:[#allocation2 + $0x10] sm:$0xff] }
 0x225   : > { %v5007_v26 = vmax.f32 %v4996_v25, %v1039_v27  ;;  %v1042_v17 = vpop.xlane.xlu1 %1041  ;;  %7172 = vst [vmem:[#allocation87_spill] sm:$0xff] %v5025_v8 }
 0x226   : > { %v5014_v7 = vmax.f32 %v5003_v42, %v1042_v17 }
 0x227   : > { %7169 = vst [vmem:[#allocation84_spill] sm:$0xff] %v5007_v26  ;;  %1806 = vst.msk [vmem:[#allocation2 + $0x80] sm:$0xff] %vm6964_vm15, %v5007_v26  ;;  %1295 = vperm.xlu1 %3276, %v5007_v26  }
 0x228   : > { %7170 = vst [vmem:[#allocation85_spill] sm:$0xff] %v5014_v7  ;;  %v2128_v28 = vpop.xlane.xlu0 %2127  ;;  %1807 = vst.msk [vmem:[#allocation2 + $0x88] sm:$0xff] %vm6964_vm15, %v5014_v7  ;;  %1300 = vperm.xlu0 %3275, %v5014_v7  }
 0x229   : > { %v2190_v44 = vadd.f32 %v2128_v28, %v1838_v62  ;;  %v2131_v23 = vpop.xlane.xlu1 %2130 }
 0x22a   : > { %v2191_v43 = vadd.f32 %v2131_v23, %v1839_v49  ;;  %v5039_v49 = vld [vmem:[#allocation2 + $0x18] sm:$0xff] }
 0x22b   : > { %2222 = vst.msk [vmem:[#allocation4 + $0x80] sm:$0xff] %vm6964_vm15, %v2190_v44  ;;  %7175 = vst [vmem:[#allocation90_spill] sm:$0xff] %v5039_v49 }
 0x22c   : > { %v994_v0 = vpop.xlane.xlu0 %993  ;;  %2223 = vst.msk [vmem:[#allocation4 + $0x88] sm:$0xff] %vm6964_vm15, %v2191_v43 }
 0x22d   : > { %v5029_v27 = vmax.f32 %v5022_v57, %v994_v0  ;;  %v997_v17 = vpop.xlane.xlu1 %996  ;;  %v5045_v0 = vld [vmem:[#allocation2 + $0x90] sm:$0xff]  ;;  %v5212_v57 = vld [vmem:[#allocation2 + $0x58] sm:$0xff] }
 0x22e   : > { %v5036_v62 = vmax.f32 %v5025_v8, %v997_v17  ;;  %7176 = vst [vmem:[#allocation91_spill] sm:$0xff] %v5045_v0  ;;  %v1824_v8 = vld [vmem:[#allocation4 + $0x10] sm:$0xff]  ;;  %7206 = vst [vmem:[#allocation121_spill] sm:$0xff] %v5212_v57 }
 0x22f   : > { %7173 = vst [vmem:[#allocation88_spill] sm:$0xff] %v5029_v27  ;;  %1791 = vst.msk [vmem:[#allocation2 + $0x8] sm:$0xff] %vm6964_vm15, %v5029_v27  ;;  %1220 = vperm.xlu1 %3276, %v5029_v27  }
 0x230   : > { %7174 = vst [vmem:[#allocation89_spill] sm:$0xff] %v5036_v62  ;;  %v2083_v28 = vpop.xlane.xlu0 %2082  ;;  %1792 = vst.msk [vmem:[#allocation2 + $0x10] sm:$0xff] %vm6964_vm15, %v5036_v62 }
 0x231   : > { %v2175_v23 = vadd.f32 %v2083_v28, %v1823_v48  ;;  %v1000_v43 = vpop.xlane.xlu1 %999 }
 0x232   : > { %v5049_v17 = vmax.f32 %v5039_v49, %v1000_v43  ;;  %v1825_v49 = vld [vmem:[#allocation4 + $0x18] sm:$0xff] }
 0x233   : > { %2207 = vst.msk [vmem:[#allocation4 + $0x8] sm:$0xff] %vm6964_vm15, %v2175_v23  ;;  %1225 = vperm.xlu1 %3276, %v5036_v62   ;;  %v5077_v62 = vld [vmem:[#allocation2 + $0x20] sm:$0xff] }
 0x234   : > { %7177 = vst [vmem:[#allocation92_spill] sm:$0xff] %v5049_v17  ;;  %v1045_v3 = vpop.xlane.xlu0 %1044  ;;  %1793 = vst.msk [vmem:[#allocation2 + $0x18] sm:$0xff] %vm6964_vm15, %v5049_v17 }
 0x235   : > { %v5059_v48 = vmax.f32 %v5045_v0, %v1045_v3  ;;  %v1048_v28 = vpop.xlane.xlu1 %1047  ;;  %v1840_v0 = vld [vmem:[#allocation4 + $0x90] sm:$0xff]  ;;  %7181 = vst [vmem:[#allocation96_spill] sm:$0xff] %v5077_v62 }
 0x236   : > { %v5066_v43 = vmax.f32 %v5052_v9, %v1048_v28 }
 0x237   : > { %7179 = vst [vmem:[#allocation94_spill] sm:$0xff] %v5059_v48  ;;  %1808 = vst.msk [vmem:[#allocation2 + $0x90] sm:$0xff] %vm6964_vm15, %v5059_v48  ;;  %1305 = vperm.xlu1 %3276, %v5059_v48   ;;  %v1841_v48 = vld [vmem:[#allocation4 + $0x98] sm:$0xff] }
 0x238   : > { %7180 = vst [vmem:[#allocation95_spill] sm:$0xff] %v5066_v43  ;;  %v2086_v44 = vpop.xlane.xlu0 %2085  ;;  %1809 = vst.msk [vmem:[#allocation2 + $0x98] sm:$0xff] %vm6964_vm15, %v5066_v43  ;;  %1310 = vperm.xlu0 %3275, %v5066_v43  }
 0x239   : > { %v2176_v3 = vadd.f32 %v2086_v44, %v1824_v8  ;;  %v2089_v23 = vpop.xlane.xlu1 %2088  ;;  %v5080_v8 = vld [vmem:[#allocation2 + $0x28] sm:$0xff] }
 0x23a   : > { %v2177_v7 = vadd.f32 %v2089_v23, %v1825_v49  ;;  %7182 = vst [vmem:[#allocation97_spill] sm:$0xff] %v5080_v8  ;;  %v5086_v23 = vld [vmem:[#allocation2 + $0xa0] sm:$0xff] }
 0x23b   : > { %2208 = vst.msk [vmem:[#allocation4 + $0x10] sm:$0xff] %vm6964_vm15, %v2176_v3  ;;  %1230 = vperm.xlu1 %3276, %v5049_v17   ;;  %7184 = vst [vmem:[#allocation99_spill] sm:$0xff] %v5086_v23  ;;  %v1826_v3 = vld [vmem:[#allocation4 + $0x20] sm:$0xff] }
 0x23c   : > { %v2134_v28 = vpop.xlane.xlu0 %2133  ;;  %2209 = vst.msk [vmem:[#allocation4 + $0x18] sm:$0xff] %vm6964_vm15, %v2177_v7  ;;  %v1827_v7 = vld [vmem:[#allocation4 + $0x28] sm:$0xff] }
 0x23d   : > { %v2192_v42 = vadd.f32 %v2134_v28, %v1840_v0  ;;  %v2137_v27 = vpop.xlane.xlu1 %2136  ;;  %v5096_v0 = vld [vmem:[#allocation2 + $0xa8] sm:$0xff] }
 0x23e   : > { %v2193_v9 = vadd.f32 %v2137_v27, %v1841_v48  ;;  %7186 = vst [vmem:[#allocation101_spill] sm:$0xff] %v5096_v0 }
 0x23f   : > { %2224 = vst.msk [vmem:[#allocation4 + $0x90] sm:$0xff] %vm6964_vm15, %v2192_v42 }
 0x240   : > { %v1003_v43 = vpop.xlane.xlu0 %1002  ;;  %2225 = vst.msk [vmem:[#allocation4 + $0x98] sm:$0xff] %vm6964_vm15, %v2193_v9 }
 0x241   : > { %v5084_v49 = vmax.f32 %v5077_v62, %v1003_v43 }
 0x242   : > { %v1006_v44 = vpop.xlane.xlu1 %1005 }
 0x243   : > { %7183 = vst [vmem:[#allocation98_spill] sm:$0xff] %v5084_v49  ;;  %1794 = vst.msk [vmem:[#allocation2 + $0x20] sm:$0xff] %vm6964_vm15, %v5084_v49  ;;  %v5093_v42 = vmax.f32 %v5080_v8, %v1006_v44  ;;  %1235 = vperm.xlu1 %3276, %v5084_v49   ;;  %v5121_v8 = vld [vmem:[#allocation2 + $0x30] sm:$0xff] }
 0x244   : > { %v1051_v27 = vpop.xlane.xlu0 %1050  ;;  %7189 = vst [vmem:[#allocation104_spill] sm:$0xff] %v5121_v8 }
 0x245   : > { %7185 = vst [vmem:[#allocation100_spill] sm:$0xff] %v5093_v42  ;;  %1795 = vst.msk [vmem:[#allocation2 + $0x28] sm:$0xff] %vm6964_vm15, %v5093_v42  ;;  %v5103_v48 = vmax.f32 %v5086_v23, %v1051_v27  ;;  %v1842_v23 = vld [vmem:[#allocation4 + $0xa0] sm:$0xff] }
 0x246   : > { %v1054_v43 = vpop.xlane.xlu1 %1053 }
 0x247   : > { %7187 = vst [vmem:[#allocation102_spill] sm:$0xff] %v5103_v48  ;;  %1810 = vst.msk [vmem:[#allocation2 + $0xa0] sm:$0xff] %vm6964_vm15, %v5103_v48  ;;  %v5110_v44 = vmax.f32 %v5096_v0, %v1054_v43  ;;  %1315 = vperm.xlu1 %3276, %v5103_v48   ;;  %v1843_v48 = vld [vmem:[#allocation4 + $0xa8] sm:$0xff] }
 0x248   : > { %v2092_v9 = vpop.xlane.xlu0 %2091 }
 0x249   : > { %7188 = vst [vmem:[#allocation103_spill] sm:$0xff] %v5110_v44  ;;  %1811 = vst.msk [vmem:[#allocation2 + $0xa8] sm:$0xff] %vm6964_vm15, %v5110_v44  ;;  %1320 = vperm.xlu0 %3275, %v5110_v44   ;;  %v2178_v27 = vadd.f32 %v2092_v9, %v1826_v3  ;;  %v5124_v9 = vld [vmem:[#allocation2 + $0x38] sm:$0xff] }
 0x24a   : > { %v2095_v28 = vpop.xlane.xlu1 %2094  ;;  %7190 = vst [vmem:[#allocation105_spill] sm:$0xff] %v5124_v9 }
 0x24b   : > { %2210 = vst.msk [vmem:[#allocation4 + $0x20] sm:$0xff] %vm6964_vm15, %v2178_v27  ;;  %v2179_v49 = vadd.f32 %v2095_v28, %v1827_v7  ;;  %1240 = vperm.xlu1 %3276, %v5093_v42   ;;  %v5130_v28 = vld [vmem:[#allocation2 + $0xb0] sm:$0xff] }
 0x24c   : > { %v2140_v43 = vpop.xlane.xlu0 %2139  ;;  %7192 = vst [vmem:[#allocation107_spill] sm:$0xff] %v5130_v28  ;;  %v1828_v27 = vld [vmem:[#allocation4 + $0x30] sm:$0xff] }
 0x24d   : > { %2211 = vst.msk [vmem:[#allocation4 + $0x28] sm:$0xff] %vm6964_vm15, %v2179_v49  ;;  %v2194_v62 = vadd.f32 %v2140_v43, %v1842_v23  ;;  %v5140_v23 = vld [vmem:[#allocation2 + $0xb8] sm:$0xff] }
 0x24e   : > { %v2143_v17 = vpop.xlane.xlu1 %2142  ;;  %7194 = vst [vmem:[#allocation109_spill] sm:$0xff] %v5140_v23  ;;  %v1829_v49 = vld [vmem:[#allocation4 + $0x38] sm:$0xff] }
 0x24f   : > { %2226 = vst.msk [vmem:[#allocation4 + $0xa0] sm:$0xff] %vm6964_vm15, %v2194_v62  ;;  %v2195_v0 = vadd.f32 %v2143_v17, %v1843_v48 }
 0x250   : > { %v1009_v44 = vpop.xlane.xlu0 %1008 }
 0x251   : > { %2227 = vst.msk [vmem:[#allocation4 + $0xa8] sm:$0xff] %vm6964_vm15, %v2195_v0  ;;  %v5128_v7 = vmax.f32 %v5121_v8, %v1009_v44 }
 0x252   : > { %v1012_v3 = vpop.xlane.xlu1 %1011 }
 0x253   : > { %7191 = vst [vmem:[#allocation106_spill] sm:$0xff] %v5128_v7  ;;  %1796 = vst.msk [vmem:[#allocation2 + $0x30] sm:$0xff] %vm6964_vm15, %v5128_v7  ;;  %v5137_v62 = vmax.f32 %v5124_v9, %v1012_v3  ;;  %1245 = vperm.xlu1 %3276, %v5128_v7   ;;  %v5165_v9 = vld [vmem:[#allocation2 + $0x40] sm:$0xff] }
 0x254   : > { %v1057_v17 = vpop.xlane.xlu0 %1056  ;;  %7197 = vst [vmem:[#allocation112_spill] sm:$0xff] %v5165_v9 }
 0x255   : > { %7193 = vst [vmem:[#allocation108_spill] sm:$0xff] %v5137_v62  ;;  %1797 = vst.msk [vmem:[#allocation2 + $0x38] sm:$0xff] %vm6964_vm15, %v5137_v62  ;;  %v5147_v48 = vmax.f32 %v5130_v28, %v1057_v17  ;;  %v1844_v28 = vld [vmem:[#allocation4 + $0xb0] sm:$0xff] }
 0x256   : > { %v1060_v44 = vpop.xlane.xlu1 %1059 }
 0x257   : > { %7195 = vst [vmem:[#allocation110_spill] sm:$0xff] %v5147_v48  ;;  %1812 = vst.msk [vmem:[#allocation2 + $0xb0] sm:$0xff] %vm6964_vm15, %v5147_v48  ;;  %v5154_v3 = vmax.f32 %v5140_v23, %v1060_v44  ;;  %1325 = vperm.xlu1 %3276, %v5147_v48   ;;  %v1845_v48 = vld [vmem:[#allocation4 + $0xb8] sm:$0xff] }
 0x258   : > { %v2098_v0 = vpop.xlane.xlu0 %2097 }
 0x259   : > { %7196 = vst [vmem:[#allocation111_spill] sm:$0xff] %v5154_v3  ;;  %1813 = vst.msk [vmem:[#allocation2 + $0xb8] sm:$0xff] %vm6964_vm15, %v5154_v3  ;;  %1330 = vperm.xlu0 %3275, %v5154_v3   ;;  %v2180_v17 = vadd.f32 %v2098_v0, %v1828_v27  ;;  %v5168_v0 = vld [vmem:[#allocation2 + $0x48] sm:$0xff] }
 0x25a   : > { %v2101_v43 = vpop.xlane.xlu1 %2100  ;;  %7198 = vst [vmem:[#allocation113_spill] sm:$0xff] %v5168_v0 }
 0x25b   : > { %2212 = vst.msk [vmem:[#allocation4 + $0x30] sm:$0xff] %vm6964_vm15, %v2180_v17  ;;  %v2181_v7 = vadd.f32 %v2101_v43, %v1829_v49  ;;  %1250 = vperm.xlu1 %3276, %v5137_v62   ;;  %v5174_v43 = vld [vmem:[#allocation2 + $0xc0] sm:$0xff]  ;;  %v5209_v62 = vld [vmem:[#allocation2 + $0x50] sm:$0xff] }
 0x25c   : > { %v2146_v44 = vpop.xlane.xlu0 %2145  ;;  %7200 = vst [vmem:[#allocation115_spill] sm:$0xff] %v5174_v43  ;;  %v1830_v17 = vld [vmem:[#allocation4 + $0x40] sm:$0xff]  ;;  %7205 = vst [vmem:[#allocation120_spill] sm:$0xff] %v5209_v62 }
 0x25d   : > { %2213 = vst.msk [vmem:[#allocation4 + $0x38] sm:$0xff] %vm6964_vm15, %v2181_v7  ;;  %v2196_v8 = vadd.f32 %v2146_v44, %v1844_v28  ;;  %v5184_v28 = vld [vmem:[#allocation2 + $0xc8] sm:$0xff] }
 0x25e   : > { %v2149_v42 = vpop.xlane.xlu1 %2148  ;;  %7202 = vst [vmem:[#allocation117_spill] sm:$0xff] %v5184_v28  ;;  %v1831_v7 = vld [vmem:[#allocation4 + $0x48] sm:$0xff] }
 0x25f   : > { %2228 = vst.msk [vmem:[#allocation4 + $0xb0] sm:$0xff] %vm6964_vm15, %v2196_v8  ;;  %v2197_v23 = vadd.f32 %v2149_v42, %v1845_v48 }
 0x260   : > { %v1015_v3 = vpop.xlane.xlu0 %1014 }
 0x261   : > { %2229 = vst.msk [vmem:[#allocation4 + $0xb8] sm:$0xff] %vm6964_vm15, %v2197_v23  ;;  %v5172_v49 = vmax.f32 %v5165_v9, %v1015_v3 }
 0x262   : > { %v1018_v27 = vpop.xlane.xlu1 %1017 }
 0x263   : > { %7199 = vst [vmem:[#allocation114_spill] sm:$0xff] %v5172_v49  ;;  %1798 = vst.msk [vmem:[#allocation2 + $0x40] sm:$0xff] %vm6964_vm15, %v5172_v49  ;;  %v5181_v8 = vmax.f32 %v5168_v0, %v1018_v27  ;;  %1255 = vperm.xlu1 %3276, %v5172_v49   ;;  %v1847_v49 = vld [vmem:[#allocation4 + $0xc8] sm:$0xff] }
 0x264   : > { %v1063_v42 = vpop.xlane.xlu0 %1062 }
 0x265   : > { %7201 = vst [vmem:[#allocation116_spill] sm:$0xff] %v5181_v8  ;;  %1799 = vst.msk [vmem:[#allocation2 + $0x48] sm:$0xff] %vm6964_vm15, %v5181_v8  ;;  %1260 = vperm.xlu0 %3275, %v5181_v8   ;;  %v5192_v48 = vmax.f32 %v5174_v43, %v1063_v42  ;;  %v1846_v43 = vld [vmem:[#allocation4 + $0xc0] sm:$0xff] }
 0x266   : > { %v1066_v3 = vpop.xlane.xlu1 %1065 }
 0x267   : > { %7203 = vst [vmem:[#allocation118_spill] sm:$0xff] %v5192_v48  ;;  %1814 = vst.msk [vmem:[#allocation2 + $0xc0] sm:$0xff] %vm6964_vm15, %v5192_v48  ;;  %v5199_v27 = vmax.f32 %v5184_v28, %v1066_v3  ;;  %1335 = vperm.xlu1 %3276, %v5192_v48  }
 0x268   : > { %v2104_v23 = vpop.xlane.xlu0 %2103 }
 0x269   : > { %7204 = vst [vmem:[#allocation119_spill] sm:$0xff] %v5199_v27  ;;  %1815 = vst.msk [vmem:[#allocation2 + $0xc8] sm:$0xff] %vm6964_vm15, %v5199_v27  ;;  %1340 = vperm.xlu0 %3275, %v5199_v27   ;;  %v2182_v42 = vadd.f32 %v2104_v23, %v1830_v17  ;;  %v5218_v17 = vld [vmem:[#allocation2 + $0xd0] sm:$0xff]  ;;  %v5256_v27 = vld [vmem:[#allocation2 + $0x68] sm:$0xff] }
 0x26a   : > { %v2107_v44 = vpop.xlane.xlu1 %2106  ;;  %7208 = vst [vmem:[#allocation123_spill] sm:$0xff] %v5218_v17  ;;  %7214 = vst [vmem:[#allocation129_spill] sm:$0xff] %v5256_v27 }
 0x26b   : > { %2214 = vst.msk [vmem:[#allocation4 + $0x40] sm:$0xff] %vm6964_vm15, %v2182_v42  ;;  %v2183_v0 = vadd.f32 %v2107_v44, %v1831_v7  ;;  %v1832_v44 = vld [vmem:[#allocation4 + $0x50] sm:$0xff] }
 0x26c   : > { %v2152_v3 = vpop.xlane.xlu0 %2151 }
 0x26d   : > { %2215 = vst.msk [vmem:[#allocation4 + $0x48] sm:$0xff] %vm6964_vm15, %v2183_v0  ;;  %v2198_v48 = vadd.f32 %v2152_v3, %v1846_v43 }
 0x26e   : > { %v2155_v9 = vpop.xlane.xlu1 %2154 }
 0x26f   : > { %2230 = vst.msk [vmem:[#allocation4 + $0xc0] sm:$0xff] %vm6964_vm15, %v2198_v48  ;;  %v2199_v8 = vadd.f32 %v2155_v9, %v1847_v49  ;;  %v5228_v49 = vld [vmem:[#allocation2 + $0xd8] sm:$0xff] }
 0x270   : > { %v1021_v28 = vpop.xlane.xlu0 %1020  ;;  %7210 = vst [vmem:[#allocation125_spill] sm:$0xff] %v5228_v49 }
 0x271   : > { %2231 = vst.msk [vmem:[#allocation4 + $0xc8] sm:$0xff] %vm6964_vm15, %v2199_v8  ;;  %v5216_v23 = vmax.f32 %v5209_v62, %v1021_v28  ;;  %v1833_v8 = vld [vmem:[#allocation4 + $0x58] sm:$0xff]  ;;  %v5253_v62 = vld [vmem:[#allocation2 + $0x60] sm:$0xff] }
 0x272   : > { %v1024_v7 = vpop.xlane.xlu1 %1023  ;;  %7213 = vst [vmem:[#allocation128_spill] sm:$0xff] %v5253_v62 }
 0x273   : > { %7207 = vst [vmem:[#allocation122_spill] sm:$0xff] %v5216_v23  ;;  %1800 = vst.msk [vmem:[#allocation2 + $0x50] sm:$0xff] %vm6964_vm15, %v5216_v23  ;;  %v5225_v43 = vmax.f32 %v5212_v57, %v1024_v7  ;;  %1265 = vperm.xlu1 %3276, %v5216_v23   ;;  %v1849_v57 = vld [vmem:[#allocation4 + $0xd8] sm:$0xff] }
 0x274   : > { %v1069_v9 = vpop.xlane.xlu0 %1068 }
 0x275   : > { %7209 = vst [vmem:[#allocation124_spill] sm:$0xff] %v5225_v43  ;;  %1801 = vst.msk [vmem:[#allocation2 + $0x58] sm:$0xff] %vm6964_vm15, %v5225_v43  ;;  %1270 = vperm.xlu0 %3275, %v5225_v43   ;;  %v5236_v28 = vmax.f32 %v5218_v17, %v1069_v9  ;;  %v1848_v17 = vld [vmem:[#allocation4 + $0xd0] sm:$0xff] }
 0x276   : > { %v1072_v48 = vpop.xlane.xlu1 %1071 }
 0x277   : > { %7211 = vst [vmem:[#allocation126_spill] sm:$0xff] %v5236_v28  ;;  %1816 = vst.msk [vmem:[#allocation2 + $0xd0] sm:$0xff] %vm6964_vm15, %v5236_v28  ;;  %v5243_v3 = vmax.f32 %v5228_v49, %v1072_v48  ;;  %1345 = vperm.xlu1 %3276, %v5236_v28  }
 0x278   : > { %v2110_v7 = vpop.xlane.xlu0 %2109 }
 0x279   : > { %7212 = vst [vmem:[#allocation127_spill] sm:$0xff] %v5243_v3  ;;  %1817 = vst.msk [vmem:[#allocation2 + $0xd8] sm:$0xff] %vm6964_vm15, %v5243_v3  ;;  %1350 = vperm.xlu0 %3275, %v5243_v3   ;;  %v2184_v9 = vadd.f32 %v2110_v7, %v1832_v44  ;;  %v1834_v7 = vld [vmem:[#allocation4 + $0x60] sm:$0xff] }
 0x27a   : > { %v2113_v42 = vpop.xlane.xlu1 %2112 }
 0x27b   : > { %2216 = vst.msk [vmem:[#allocation4 + $0x50] sm:$0xff] %vm6964_vm15, %v2184_v9  ;;  %v2185_v43 = vadd.f32 %v2113_v42, %v1833_v8  ;;  %v5262_v42 = vld [vmem:[#allocation2 + $0xe0] sm:$0xff] }
 0x27c   : > { %v2158_v48 = vpop.xlane.xlu0 %2157  ;;  %7216 = vst [vmem:[#allocation131_spill] sm:$0xff] %v5262_v42 }
 0x27d   : > { %2217 = vst.msk [vmem:[#allocation4 + $0x58] sm:$0xff] %vm6964_vm15, %v2185_v43  ;;  %v2200_v28 = vadd.f32 %v2158_v48, %v1848_v17 }
 0x27e   : > { %v2161_v23 = vpop.xlane.xlu1 %2160 }
 0x27f   : > { %2232 = vst.msk [vmem:[#allocation4 + $0xd0] sm:$0xff] %vm6964_vm15, %v2200_v28  ;;  %v2201_v0 = vadd.f32 %v2161_v23, %v1849_v57  ;;  %v5272_v23 = vld [vmem:[#allocation2 + $0xe8] sm:$0xff] }
 0x280   : > { %v1027_v49 = vpop.xlane.xlu0 %1026  ;;  %7218 = vst [vmem:[#allocation133_spill] sm:$0xff] %v5272_v23 }
 0x281   : > { %2233 = vst.msk [vmem:[#allocation4 + $0xd8] sm:$0xff] %vm6964_vm15, %v2201_v0  ;;  %v5260_v44 = vmax.f32 %v5253_v62, %v1027_v49  ;;  %v1835_v0 = vld [vmem:[#allocation4 + $0x68] sm:$0xff]  ;;  %v5299_v62 = vld [vmem:[#allocation2 + $0x70] sm:$0xff] }
 0x282   : > { %v1030_v8 = vpop.xlane.xlu1 %1029  ;;  %7222 = vst [vmem:[#allocation137_spill] sm:$0xff] %v5299_v62 }
 0x283   : > { %7215 = vst [vmem:[#allocation130_spill] sm:$0xff] %v5260_v44  ;;  %1802 = vst.msk [vmem:[#allocation2 + $0x60] sm:$0xff] %vm6964_vm15, %v5260_v44  ;;  %v5269_v43 = vmax.f32 %v5256_v27, %v1030_v8  ;;  %1275 = vperm.xlu1 %3276, %v5260_v44   ;;  %v5296_v27 = vld [vmem:[#allocation2 + $0x78] sm:$0xff] }
 0x284   : > { %v1075_v57 = vpop.xlane.xlu0 %1074  ;;  %7221 = vst [vmem:[#allocation136_spill] sm:$0xff] %v5296_v27 }
 0x285   : > { %7217 = vst [vmem:[#allocation132_spill] sm:$0xff] %v5269_v43  ;;  %1803 = vst.msk [vmem:[#allocation2 + $0x68] sm:$0xff] %vm6964_vm15, %v5269_v43  ;;  %1280 = vperm.xlu0 %3275, %v5269_v43   ;;  %v5280_v49 = vmax.f32 %v5262_v42, %v1075_v57  ;;  %v1850_v42 = vld [vmem:[#allocation4 + $0xe0] sm:$0xff] }
 0x286   : > { %v1078_v28 = vpop.xlane.xlu1 %1077 }
 0x287   : > { %7219 = vst [vmem:[#allocation134_spill] sm:$0xff] %v5280_v49  ;;  %1818 = vst.msk [vmem:[#allocation2 + $0xe0] sm:$0xff] %vm6964_vm15, %v5280_v49  ;;  %v5287_v48 = vmax.f32 %v5272_v23, %v1078_v28  ;;  %1355 = vperm.xlu1 %3276, %v5280_v49  }
 0x288   : > { %v2116_v8 = vpop.xlane.xlu0 %2115 }
 0x289   : > { %7220 = vst [vmem:[#allocation135_spill] sm:$0xff] %v5287_v48  ;;  %1819 = vst.msk [vmem:[#allocation2 + $0xe8] sm:$0xff] %vm6964_vm15, %v5287_v48  ;;  %1360 = vperm.xlu0 %3275, %v5287_v48   ;;  %v2186_v57 = vadd.f32 %v2116_v8, %v1834_v7  ;;  %v5305_v8 = vld [vmem:[#allocation2 + $0xf8] sm:$0xff] }
 0x28a   : > { %v2119_v9 = vpop.xlane.xlu1 %2118  ;;  %7224 = vst [vmem:[#allocation139_spill] sm:$0xff] %v5305_v8  ;;  %v7229_v48 = vld [vmem:[#allocation55_spill] sm:$0xff] }
 0x28b   : > { %2218 = vst.msk [vmem:[#allocation4 + $0x60] sm:$0xff] %vm6964_vm15, %v2186_v57  ;;  %v2187_v43 = vadd.f32 %v2119_v9, %v1835_v0  ;;  %v5315_v9 = vld [vmem:[#allocation2 + $0xf0] sm:$0xff] }
 0x28c   : > { %v2164_v28 = vpop.xlane.xlu0 %2163  ;;  %7226 = vst [vmem:[#allocation141_spill] sm:$0xff] %v5315_v9 }
 0x28d   : > { %2219 = vst.msk [vmem:[#allocation4 + $0x68] sm:$0xff] %vm6964_vm15, %v2187_v43  ;;  %v2202_v49 = vadd.f32 %v2164_v28, %v1850_v42  ;;  %v1837_v28 = vld [vmem:[#allocation4 + $0x78] sm:$0xff] }
 0x28e   : > { %v1036_v44 = vpop.xlane.xlu1 %1035 }
 0x28f   : > { %2234 = vst.msk [vmem:[#allocation4 + $0xe0] sm:$0xff] %vm6964_vm15, %v2202_v49  ;;  %v5303_v17 = vmax.f32 %v5296_v27, %v1036_v44 }
 0x290   : > { %v1033_v7 = vpop.xlane.xlu0 %1032 }
 0x291   : > { %7223 = vst [vmem:[#allocation138_spill] sm:$0xff] %v5303_v17  ;;  %1805 = vst.msk [vmem:[#allocation2 + $0x78] sm:$0xff] %vm6964_vm15, %v5303_v17  ;;  %1290 = vperm.xlu0 %3275, %v5303_v17   ;;  %v5313_v42 = vmax.f32 %v5299_v62, %v1033_v7  ;;  %v1836_v62 = vld [vmem:[#allocation4 + $0x70] sm:$0xff] }
 0x292   : > { %v1084_v43 = vpop.xlane.xlu1 %1083 }
 0x293   : > { %7225 = vst [vmem:[#allocation140_spill] sm:$0xff] %v5313_v42  ;;  %1804 = vst.msk [vmem:[#allocation2 + $0x70] sm:$0xff] %vm6964_vm15, %v5313_v42  ;;  %v5322_v49 = vmax.f32 %v5305_v8, %v1084_v43  ;;  %1285 = vperm.xlu1 %3276, %v5313_v42  }
 0x294   : > { %v1081_v57 = vpop.xlane.xlu0 %1080 }
 0x295   : > { %7227 = vst [vmem:[#allocation142_spill] sm:$0xff] %v5322_v49  ;;  %1821 = vst.msk [vmem:[#allocation2 + $0xf8] sm:$0xff] %vm6964_vm15, %v5322_v49  ;;  %1370 = vperm.xlu0 %3275, %v5322_v49   ;;  %v5331_v44 = vmax.f32 %v5315_v9, %v1081_v57  ;;  %v7230_v9 = vld [vmem:[#allocation54_spill] sm:$0xff] }
 0x296   : > { %v2125_v0 = vpop.xlane.xlu1 %2124 }
 0x297   : > { %7228 = vst [vmem:[#allocation143_spill] sm:$0xff] %v5331_v44  ;;  %1820 = vst.msk [vmem:[#allocation2 + $0xf0] sm:$0xff] %vm6964_vm15, %v5331_v44  ;;  %v2189_v42 = vadd.f32 %v2125_v0, %v1837_v28  ;;  %1365 = vperm.xlu1 %3276, %v5331_v44   ;;  %v7231_v44 = vld [vmem:[#allocation57_spill] sm:$0xff] }
 0x298   : > { %v2122_v7 = vpop.xlane.xlu0 %2121 }
 0x299   : > { %2221 = vst.msk [vmem:[#allocation4 + $0x78] sm:$0xff] %vm6964_vm15, %v2189_v42  ;;  %v2188_v8 = vadd.f32 %v2122_v7, %v1836_v62 }
 0x29b   : > { %2220 = vst.msk [vmem:[#allocation4 + $0x70] sm:$0xff] %vm6964_vm15, %v2188_v8 }
 0x2a2   : > { %v1216_v49 = vpop.permute.xlu0 %1215 }
 0x2a3   : > { %v1373_v17 = vsub.f32 %v4379_v34, %v1216_v49  ;;  %v1374_v23 = vsub.f32 %v7230_v9, %v1216_v49 }
 0x2a5   : > { %v1437_v62 = vmul.f32 1.442695, %v1373_v17  ;;  %v1439_v8 = vmul.f32 1.442695, %v1374_v23  ;;  %v7236_v17 = vld [vmem:[#allocation61_spill] sm:$0xff] }
 0x2a6   : > { %v1296_v57 = vpop.permute.xlu1 %1295 }
 0x2a7   : > { %v1405_v27 = vsub.f32 %v4394_v10, %v1296_v57  ;;  %v1406_v43 = vsub.f32 %v7229_v48, %v1296_v57  ;;  %v1301_v3 = vpop.permute.xlu0 %1300  ;;  %v7233_v10 = vld [vmem:[#allocation58_spill] sm:$0xff]  ;;  %v7234_v48 = vld [vmem:[#allocation59_spill] sm:$0xff] }
 0x2a8   : > { %v1407_v46 = vsub.f32 %v7231_v44, %v1301_v3  ;;  %v1408_v42 = vsub.f32 %v7232_v16, %v1301_v3  ;;  %v7235_v16 = vld [vmem:[#allocation60_spill] sm:$0xff] }
 0x2a9   : > { %v1501_v0 = vmul.f32 1.442695, %v1405_v27  ;;  %v1503_v28 = vmul.f32 1.442695, %v1406_v43 }
 0x2aa   : > { %v1505_v7 = vmul.f32 1.442695, %v1407_v46  ;;  %v1507_v26 = vmul.f32 1.442695, %v1408_v42  ;;  %v7237_v42 = vld [vmem:[#allocation62_spill] sm:$0xff] }
 0x2ab   : > { %3301 = vpow2.f32 %v1501_v0 }
 0x2ac   : > { %3303 = vpow2.f32 %v1503_v28 }
 0x2ad   : > { %3305 = vpow2.f32 %v1437_v62 }
 0x2ae   : > { %v1221_v34 = vpop.permute.xlu1 %1220  ;;  %3307 = vpow2.f32 %v1439_v8  ;;  %v7238_v8 = vld [vmem:[#allocation63_spill] sm:$0xff] }
 0x2af   : > { %v1375_v25 = vsub.f32 %v7233_v10, %v1221_v34  ;;  %v1376_v57 = vsub.f32 %v7234_v48, %v1221_v34  ;;  %3309 = vpow2.f32 %v1505_v7 }
 0x2b0   : > { %3311 = vpow2.f32 %v1507_v26  ;;  %v2073_v26 = vsel %vm2009_vm3, %v4797_v20, 0.0 }
 0x2b1   : > { %v1441_v27 = vmul.f32 1.442695, %v1375_v25  ;;  %v1443_v9 = vmul.f32 1.442695, %v1376_v57  ;;  %v2072_v25 = vsel %vm2008_vm0, %v4781_v2, 0.0 }
 0x2b2   : > { %v1226_v44 = vpop.permute.xlu1 %1225  ;;  %v2165_v4 = vadd.f32 %v2073_v26, %v2072_v25 }
 0x2b3   : > { %3313 = vpow2.f32 %v1441_v27  ;;  %v1377_v3 = vsub.f32 %v7235_v16, %v1226_v44  ;;  %v1378_v23 = vsub.f32 %v7236_v17, %v1226_v44  ;;  %v7239_v44 = vld [vmem:[#allocation66_spill] sm:$0xff] }
 0x2b4   : > { %3315 = vpow2.f32 %v1443_v9 }
 0x2b5   : > { %v3302_v46 = vpop.eup %3301  ;;  %v1445_v49 = vmul.f32 1.442695, %v1377_v3  ;;  %v1447_v43 = vmul.f32 1.442695, %v1378_v23  ;;  %v7240_v23 = vld [vmem:[#allocation67_spill] sm:$0xff] }
 0x2b6   : > { %v3304_v0 = vpop.eup %3303  ;;  %v1306_v28 = vpop.permute.xlu1 %1305 }
 0x2b7   : > { %3317 = vpow2.f32 %v1445_v49  ;;  %v1409_v62 = vsub.f32 %v7237_v42, %v1306_v28  ;;  %v1410_v7 = vsub.f32 %v7238_v8, %v1306_v28  ;;  %v1677_v34 = vadd.f32 %v3304_v0, %v3302_v46  ;;  %v1311_v10 = vpop.permute.xlu0 %1310  ;;  %v3306_v48 = vpop.eup %3305  ;;  %v7242_v46 = vld [vmem:[#allocation65_spill] sm:$0xff] }
 0x2b8   : > { %3319 = vpow2.f32 %v1447_v43  ;;  %v3308_v9 = vpop.eup %3307  ;;  %v1411_v16 = vsub.f32 %v7239_v44, %v1311_v10  ;;  %v1412_v49 = vsub.f32 %v7240_v23, %v1311_v10  ;;  %v7244_v23 = vld [vmem:[#allocation70_spill] sm:$0xff] }
 0x2b9   : > { %v1509_v57 = vmul.f32 1.442695, %v1409_v62  ;;  %v1511_v27 = vmul.f32 1.442695, %v1410_v7  ;;  %1678 = vadd.xlane.f32.xlu0 %v1677_v34  ;;  %v3310_v17 = vpop.eup %3309  ;;  %v1629_v8 = vadd.f32 %v3308_v9, %v3306_v48 }
 0x2ba   : > { %v1231_v3 = vpop.permute.xlu1 %1230  ;;  %v3312_v28 = vpop.eup %3311  ;;  %v1513_v25 = vmul.f32 1.442695, %v1411_v16  ;;  %v1515_v34 = vmul.f32 1.442695, %v1412_v49 }
 0x2bb   : > { %3321 = vpow2.f32 %v1509_v57  ;;  %v1379_v42 = vsub.f32 %v7241_v5, %v1231_v3  ;;  %2166 = vadd.xlane.f32.xlu1 %v2165_v4  ;;  %v1380_v43 = vsub.f32 %v7242_v46, %v1231_v3  ;;  %v1680_v10 = vadd.f32 %v3312_v28, %v3310_v17  ;;  %v7246_v17 = vld [vmem:[#allocation73_spill] sm:$0xff] }
 0x2bc   : > { %3323 = vpow2.f32 %v1511_v27  ;;  %v7243_v27 = vld [vmem:[#allocation68_spill] sm:$0xff] }
 0x2bd   : > { %v3314_v0 = vpop.eup %3313  ;;  %v1449_v62 = vmul.f32 1.442695, %v1379_v42  ;;  %v1451_v26 = vmul.f32 1.442695, %v1380_v43 }
 0x2be   : > { %v3316_v7 = vpop.eup %3315 }
 0x2bf   : > { %3325 = vpow2.f32 %v1449_v62  ;;  %1630 = vadd.xlane.f32.xlu1 %v1629_v8  ;;  %v1632_v44 = vadd.f32 %v3316_v7, %v3314_v0  ;;  %v7245_v0 = vld [vmem:[#allocation69_spill] sm:$0xff] }
 0x2c0   : > { %3327 = vpow2.f32 %v1451_v26 }
 0x2c1   : > { %v3318_v57 = vpop.eup %3317  ;;  %1633 = vadd.xlane.f32.xlu0 %v1632_v44  ;;  %3329 = vpow2.f32 %v1513_v25 }
 0x2c2   : > { %v3320_v5 = vpop.eup %3319  ;;  %v1236_v4 = vpop.permute.xlu1 %1235  ;;  %3331 = vpow2.f32 %v1515_v34 }
 0x2c3   : > { %v1381_v3 = vsub.f32 %v7243_v27, %v1236_v4  ;;  %v1382_v42 = vsub.f32 %v7244_v23, %v1236_v4  ;;  %1681 = vadd.xlane.f32.xlu1 %v1680_v10  ;;  %v1635_v48 = vadd.f32 %v3320_v5, %v3318_v57  ;;  %v7247_v57 = vld [vmem:[#allocation74_spill] sm:$0xff]  ;;  %v7248_v4 = vld [vmem:[#allocation75_spill] sm:$0xff] }
 0x2c5   : > { %v3322_v9 = vpop.eup %3321  ;;  %v1453_v16 = vmul.f32 1.442695, %v1381_v3  ;;  %v1455_v49 = vmul.f32 1.442695, %v1382_v42  ;;  %1636 = vadd.xlane.f32.xlu0 %v1635_v48  ;;  %v7249_v3 = vld [vmem:[#allocation71_spill] sm:$0xff]  ;;  %v7250_v48 = vld [vmem:[#allocation72_spill] sm:$0xff] }
 0x2c6   : > { %v3324_v46 = vpop.eup %3323  ;;  %v1316_v43 = vpop.permute.xlu1 %1315 }
 0x2c7   : > { %3333 = vpow2.f32 %v1453_v16  ;;  %v1413_v62 = vsub.f32 %v7245_v0, %v1316_v43  ;;  %v1414_v28 = vsub.f32 %v7246_v17, %v1316_v43  ;;  %v1683_v8 = vadd.f32 %v3324_v46, %v3322_v9 }
 0x2c8   : > { %3335 = vpow2.f32 %v1455_v49  ;;  %v1321_v7 = vpop.permute.xlu0 %1320 }
 0x2c9   : > { %v3326_v25 = vpop.eup %3325  ;;  %v1517_v26 = vmul.f32 1.442695, %v1413_v62  ;;  %v1519_v34 = vmul.f32 1.442695, %v1414_v28  ;;  %1684 = vadd.xlane.f32.xlu0 %v1683_v8  ;;  %v1415_v10 = vsub.f32 %v7247_v57, %v1321_v7  ;;  %v1416_v27 = vsub.f32 %v7248_v4, %v1321_v7  ;;  %v7252_v57 = vld [vmem:[#allocation77_spill] sm:$0xff] }
 0x2ca   : > { %v3328_v44 = vpop.eup %3327  ;;  %v1241_v5 = vpop.permute.xlu1 %1240 }
 0x2cb   : > { %3337 = vpow2.f32 %v1517_v26  ;;  %v1383_v23 = vsub.f32 %v7249_v3, %v1241_v5  ;;  %v3330_v42 = vpop.eup %3329  ;;  %v1384_v16 = vsub.f32 %v7250_v48, %v1241_v5  ;;  %v1638_v9 = vadd.f32 %v3328_v44, %v3326_v25  ;;  %v7251_v26 = vld [vmem:[#allocation76_spill] sm:$0xff] }
 0x2cc   : > { %3339 = vpow2.f32 %v1519_v34  ;;  %v3332_v49 = vpop.eup %3331  ;;  %v1521_v43 = vmul.f32 1.442695, %v1415_v10  ;;  %v1523_v62 = vmul.f32 1.442695, %v1416_v27 }
 0x2cd   : > { %v1457_v46 = vmul.f32 1.442695, %v1383_v23  ;;  %v1459_v0 = vmul.f32 1.442695, %v1384_v16  ;;  %1639 = vadd.xlane.f32.xlu1 %v1638_v9  ;;  %v1686_v17 = vadd.f32 %v3332_v49, %v3330_v42 }
 0x2cf   : > { %3341 = vpow2.f32 %v1457_v46 }
 0x2d0   : > { %3343 = vpow2.f32 %v1459_v0 }
 0x2d1   : > { %v3334_v28 = vpop.eup %3333  ;;  %3345 = vpow2.f32 %v1521_v43  ;;  %1687 = vadd.xlane.f32.xlu1 %v1686_v17 }
 0x2d2   : > { %v3336_v8 = vpop.eup %3335  ;;  %v1246_v7 = vpop.permute.xlu1 %1245  ;;  %3347 = vpow2.f32 %v1523_v62 }
 0x2d3   : > { %v1385_v34 = vsub.f32 %v7251_v26, %v1246_v7  ;;  %v1386_v5 = vsub.f32 %v7252_v57, %v1246_v7  ;;  %v1641_v25 = vadd.f32 %v3336_v8, %v3334_v28  ;;  %v7253_v28 = vld [vmem:[#allocation78_spill] sm:$0xff] }
 0x2d5   : > { %v3338_v44 = vpop.eup %3337  ;;  %v1461_v4 = vmul.f32 1.442695, %v1385_v34  ;;  %v1463_v10 = vmul.f32 1.442695, %v1386_v5  ;;  %1642 = vadd.xlane.f32.xlu0 %v1641_v25 }
 0x2d6   : > { %v3340_v3 = vpop.eup %3339  ;;  %v1326_v27 = vpop.permute.xlu1 %1325 }
 0x2d7   : > { %3349 = vpow2.f32 %v1461_v4  ;;  %v1417_v23 = vsub.f32 %v4769_v55, %v1326_v27  ;;  %v1418_v42 = vsub.f32 %v4773_v36, %v1326_v27  ;;  %v1689_v48 = vadd.f32 %v3340_v3, %v3338_v44 }
 0x2d8   : > { %3351 = vpow2.f32 %v1463_v10  ;;  %v1331_v16 = vpop.permute.xlu0 %1330 }
 0x2d9   : > { %v3342_v9 = vpop.eup %3341  ;;  %v1525_v49 = vmul.f32 1.442695, %v1417_v23  ;;  %v1527_v46 = vmul.f32 1.442695, %v1418_v42  ;;  %v1419_v43 = vsub.f32 %v4809_v37, %v1331_v16  ;;  %1690 = vadd.xlane.f32.xlu0 %v1689_v48  ;;  %v1420_v62 = vsub.f32 %v4813_v60, %v1331_v16 }
 0x2da   : > { %v3344_v0 = vpop.eup %3343  ;;  %v1251_v17 = vpop.permute.xlu1 %1250 }
 0x2db   : > { %3353 = vpow2.f32 %v1525_v49  ;;  %v1387_v8 = vsub.f32 %v7253_v28, %v1251_v17  ;;  %v3346_v7 = vpop.eup %3345  ;;  %v1388_v55 = vsub.f32 %v4789_v59, %v1251_v17  ;;  %v1644_v36 = vadd.f32 %v3344_v0, %v3342_v9 }
 0x2dc   : > { %3355 = vpow2.f32 %v1527_v46  ;;  %v3348_v26 = vpop.eup %3347  ;;  %v1529_v34 = vmul.f32 1.442695, %v1419_v43  ;;  %v1531_v5 = vmul.f32 1.442695, %v1420_v62 }
 0x2dd   : > { %v1465_v57 = vmul.f32 1.442695, %v1387_v8  ;;  %v1467_v25 = vmul.f32 1.442695, %v1388_v55  ;;  %1645 = vadd.xlane.f32.xlu1 %v1644_v36  ;;  %v1692_v37 = vadd.f32 %v3348_v26, %v3346_v7 }
 0x2df   : > { %3357 = vpow2.f32 %v1465_v57 }
 0x2e0   : > { %3359 = vpow2.f32 %v1467_v25 }
 0x2e1   : > { %v3350_v44 = vpop.eup %3349  ;;  %3361 = vpow2.f32 %v1529_v34  ;;  %1693 = vadd.xlane.f32.xlu1 %v1692_v37 }
 0x2e2   : > { %v3352_v60 = vpop.eup %3351  ;;  %3363 = vpow2.f32 %v1531_v5  ;;  %v1256_v4 = vpop.permute.xlu1 %1255 }
 0x2e3   : > { %v1389_v10 = vsub.f32 %v4583_v39, %v1256_v4  ;;  %v1390_v59 = vsub.f32 %v4593_v35, %v1256_v4  ;;  %v1647_v3 = vadd.f32 %v3352_v60, %v3350_v44 }
 0x2e4   : > { %v1261_v27 = vpop.permute.xlu0 %1260 }
 0x2e5   : > { %v3354_v23 = vpop.eup %3353  ;;  %v1469_v42 = vmul.f32 1.442695, %v1389_v10  ;;  %v1471_v48 = vmul.f32 1.442695, %v1390_v59  ;;  %v1391_v16 = vsub.f32 %v4611_v53, %v1261_v27  ;;  %v1392_v9 = vsub.f32 %v4627_v18, %v1261_v27  ;;  %1648 = vadd.xlane.f32.xlu0 %v1647_v3 }
 0x2e6   : > { %v3356_v49 = vpop.eup %3355  ;;  %v1336_v46 = vpop.permute.xlu1 %1335 }
 0x2e7   : > { %3365 = vpow2.f32 %v1469_v42  ;;  %v1473_v43 = vmul.f32 1.442695, %v1391_v16  ;;  %v1475_v0 = vmul.f32 1.442695, %v1392_v9  ;;  %v1421_v62 = vsub.f32 %v4587_v56, %v1336_v46 }
 0x2e8   : > { %3367 = vpow2.f32 %v1471_v48  ;;  %v1422_v39 = vsub.f32 %v4597_v19, %v1336_v46  ;;  %v1341_v35 = vpop.permute.xlu0 %1340  ;;  %v1695_v17 = vadd.f32 %v3356_v49, %v3354_v23 }
 0x2e9   : > { %v3358_v28 = vpop.eup %3357  ;;  %3369 = vpow2.f32 %v1473_v43  ;;  %v1533_v8 = vmul.f32 1.442695, %v1421_v62  ;;  %v1423_v53 = vsub.f32 %v4615_v24, %v1341_v35  ;;  %v1424_v18 = vsub.f32 %v4631_v12, %v1341_v35 }
 0x2ea   : > { %v3360_v7 = vpop.eup %3359  ;;  %3371 = vpow2.f32 %v1475_v0  ;;  %v1535_v55 = vmul.f32 1.442695, %v1422_v39  ;;  %1696 = vadd.xlane.f32.xlu0 %v1695_v17 }
 0x2eb   : > { %v3362_v36 = vpop.eup %3361  ;;  %3373 = vpow2.f32 %v1533_v8  ;;  %v1537_v26 = vmul.f32 1.442695, %v1423_v53  ;;  %v1539_v56 = vmul.f32 1.442695, %v1424_v18  ;;  %v1650_v34 = vadd.f32 %v3360_v7, %v3358_v28 }
 0x2ec   : > { %v3364_v57 = vpop.eup %3363  ;;  %3375 = vpow2.f32 %v1535_v55 }
 0x2ed   : > { %3377 = vpow2.f32 %v1537_v26  ;;  %1651 = vadd.xlane.f32.xlu1 %v1650_v34  ;;  %v1698_v19 = vadd.f32 %v3364_v57, %v3362_v36 }
 0x2ee   : > { %3379 = vpow2.f32 %v1539_v56 }
 0x2f1   : > { %v3366_v5 = vpop.eup %3365  ;;  %1699 = vadd.xlane.f32.xlu1 %v1698_v19 }
 0x2f2   : > { %v3368_v24 = vpop.eup %3367  ;;  %v1266_v25 = vpop.permute.xlu1 %1265 }
 0x2f3   : > { %v3370_v12 = vpop.eup %3369  ;;  %v1393_v37 = vsub.f32 %v4678_v14, %v1266_v25  ;;  %v1394_v44 = vsub.f32 %v4688_v58, %v1266_v25  ;;  %v1653_v60 = vadd.f32 %v3368_v24, %v3366_v5 }
 0x2f4   : > { %v3372_v4 = vpop.eup %3371  ;;  %v1271_v10 = vpop.permute.xlu0 %1270 }
 0x2f5   : > { %v3374_v59 = vpop.eup %3373  ;;  %v1477_v3 = vmul.f32 1.442695, %v1393_v37  ;;  %v1479_v27 = vmul.f32 1.442695, %v1394_v44  ;;  %v1395_v23 = vsub.f32 %v4698_v13, %v1271_v10  ;;  %v1396_v42 = vsub.f32 %v4709_v31, %v1271_v10  ;;  %1654 = vadd.xlane.f32.xlu0 %v1653_v60 }
 0x2f6   : > { %v3376_v48 = vpop.eup %3375  ;;  %v1656_v16 = vadd.f32 %v3372_v4, %v3370_v12  ;;  %v1346_v9 = vpop.permute.xlu1 %1345 }
 0x2f7   : > { %v3378_v49 = vpop.eup %3377  ;;  %3381 = vpow2.f32 %v1477_v3  ;;  %v1481_v46 = vmul.f32 1.442695, %v1395_v23  ;;  %v1483_v14 = vmul.f32 1.442695, %v1396_v42  ;;  %v1425_v58 = vsub.f32 %v4682_v61, %v1346_v9 }
 0x2f8   : > { %v3380_v43 = vpop.eup %3379  ;;  %3383 = vpow2.f32 %v1479_v27  ;;  %1657 = vadd.xlane.f32.xlu1 %v1656_v16  ;;  %v1426_v0 = vsub.f32 %v4692_v32, %v1346_v9  ;;  %v1351_v62 = vpop.permute.xlu0 %1350  ;;  %v1701_v39 = vadd.f32 %v3376_v48, %v3374_v59 }
 0x2f9   : > { %3385 = vpow2.f32 %v1481_v46  ;;  %v1541_v13 = vmul.f32 1.442695, %v1425_v58  ;;  %v1427_v31 = vsub.f32 %v4702_v22, %v1351_v62  ;;  %v1428_v35 = vsub.f32 %v4713_v51, %v1351_v62 }
 0x2fa   : > { %3387 = vpow2.f32 %v1483_v14  ;;  %v1543_v17 = vmul.f32 1.442695, %v1426_v0  ;;  %1702 = vadd.xlane.f32.xlu0 %v1701_v39  ;;  %v1704_v28 = vadd.f32 %v3380_v43, %v3378_v49 }
 0x2fb   : > { %3389 = vpow2.f32 %v1541_v13  ;;  %v1545_v8 = vmul.f32 1.442695, %v1427_v31  ;;  %v1547_v61 = vmul.f32 1.442695, %v1428_v35 }
 0x2fc   : > { %3391 = vpow2.f32 %v1543_v17  ;;  %1705 = vadd.xlane.f32.xlu1 %v1704_v28 }
 0x2fd   : > { %3393 = vpow2.f32 %v1545_v8 }
 0x2fe   : > { %3395 = vpow2.f32 %v1547_v61 }
 0x301   : > { %v3382_v32 = vpop.eup %3381 }
 0x302   : > { %v3384_v53 = vpop.eup %3383  ;;  %v1276_v18 = vpop.permute.xlu1 %1275 }
 0x303   : > { %v3386_v7 = vpop.eup %3385  ;;  %v1397_v55 = vsub.f32 %v4749_v11, %v1276_v18  ;;  %v1398_v22 = vsub.f32 %v4759_v45, %v1276_v18  ;;  %v1659_v51 = vadd.f32 %v3384_v53, %v3382_v32 }
 0x304   : > { %v3388_v36 = vpop.eup %3387  ;;  %v1281_v26 = vpop.permute.xlu0 %1280 }
 0x305   : > { %v3390_v56 = vpop.eup %3389  ;;  %v1485_v34 = vmul.f32 1.442695, %v1397_v55  ;;  %v1487_v57 = vmul.f32 1.442695, %v1398_v22  ;;  %v1399_v19 = vsub.f32 %v4777_v38, %v1281_v26  ;;  %v1400_v5 = vsub.f32 %v4793_v52, %v1281_v26  ;;  %1660 = vadd.xlane.f32.xlu0 %v1659_v51 }
 0x306   : > { %v3392_v24 = vpop.eup %3391  ;;  %v1662_v25 = vadd.f32 %v3388_v36, %v3386_v7  ;;  %v1356_v12 = vpop.permute.xlu1 %1355 }
 0x307   : > { %v3394_v37 = vpop.eup %3393  ;;  %3397 = vpow2.f32 %v1485_v34  ;;  %v1489_v44 = vmul.f32 1.442695, %v1399_v19  ;;  %v1491_v11 = vmul.f32 1.442695, %v1400_v5  ;;  %v1429_v45 = vsub.f32 %v4753_v33, %v1356_v12 }
 0x308   : > { %v3396_v60 = vpop.eup %3395  ;;  %3399 = vpow2.f32 %v1487_v57  ;;  %1663 = vadd.xlane.f32.xlu1 %v1662_v25  ;;  %v1430_v4 = vsub.f32 %v4763_v21, %v1356_v12  ;;  %v1361_v10 = vpop.permute.xlu0 %1360  ;;  %v1707_v59 = vadd.f32 %v3392_v24, %v3390_v56 }
 0x309   : > { %3401 = vpow2.f32 %v1489_v44  ;;  %v1549_v38 = vmul.f32 1.442695, %v1429_v45  ;;  %v1431_v52 = vsub.f32 %v4781_v2, %v1361_v10  ;;  %v1432_v3 = vsub.f32 %v4797_v20, %v1361_v10  ;;  %v7254_v45 = vld [vmem:[#allocation79_spill] sm:$0xff] }
 0x30a   : > { %3403 = vpow2.f32 %v1491_v11  ;;  %v1551_v27 = vmul.f32 1.442695, %v1430_v4  ;;  %1708 = vadd.xlane.f32.xlu0 %v1707_v59  ;;  %v1710_v23 = vadd.f32 %v3396_v60, %v3394_v37  ;;  %v2076_v44 = vsel %vm2012_vm4, %v4864_v50, 0.0 }
 0x30b   : > { %3405 = vpow2.f32 %v1549_v38  ;;  %v1553_v42 = vmul.f32 1.442695, %v1431_v52  ;;  %v1555_v33 = vmul.f32 1.442695, %v1432_v3  ;;  %v2077_v11 = vsel %vm2013_vm1, %v4879_v15, 0.0  ;;  %v7256_v38 = vld [vmem:[#allocation84_spill] sm:$0xff] }
 0x30c   : > { %3407 = vpow2.f32 %v1551_v27  ;;  %1711 = vadd.xlane.f32.xlu1 %v1710_v23  ;;  %vm2010_vm5 = vcmp.eq.s32.totalorder %v4361_v41, %v7254_v45  ;;  %vm2011_vm2 = vcmp.eq.s32.totalorder %v4369_v47, %v7254_v45  ;;  %v2171_v63 = vadd.f32 %v2077_v11, %v2076_v44  ;;  %v7258_v41 = vld [vmem:[#allocation80_spill] sm:$0xff]  ;;  %v7259_v3 = vld [vmem:[#allocation81_spill] sm:$0xff]  ;;  %v7261_v23 = vld [vmem:[#allocation86_spill] sm:$0xff] }
 0x30d   : > { %3409 = vpow2.f32 %v1553_v42  ;;  %v2074_v4 = vsel %vm2010_vm5, %v4841_v6, 0.0  ;;  %v2075_v10 = vsel %vm2011_vm2, %v4851_v29, 0.0  ;;  %v7260_v27 = vsub.f32 %v7258_v41, %v7259_v3  ;;  %v7262_v42 = vld [vmem:[#allocation88_spill] sm:$0xff]  ;;  %v7280_v44 = vld [vmem:[#allocation98_spill] sm:$0xff] }
 0x30e   : > { %3411 = vpow2.f32 %v1555_v33  ;;  %v2168_v59 = vadd.f32 %v2075_v10, %v2074_v4  ;;  %v7263_v33 = vsub.f32 %v7261_v23, %v7262_v42 }
 0x30f   : > { %v1149_v47 = vmul.f32 1.442695, %v7260_v27 }
 0x310   : > { %v1291_v21 = vpop.permute.xlu0 %1290 }
 0x311   : > { %v3398_v48 = vpop.eup %3397  ;;  %v1403_v16 = vsub.f32 %v4860_v40, %v1291_v21  ;;  %v1404_v9 = vsub.f32 %v4869_v30, %v1291_v21  ;;  %v7265_v21 = vld [vmem:[#allocation85_spill] sm:$0xff] }
 0x312   : > { %v3400_v2 = vpop.eup %3399  ;;  %v1286_v49 = vpop.permute.xlu1 %1285 }
 0x313   : > { %v3402_v20 = vpop.eup %3401  ;;  %v1497_v46 = vmul.f32 1.442695, %v1403_v16  ;;  %v1499_v14 = vmul.f32 1.442695, %v1404_v9  ;;  %v1401_v58 = vsub.f32 %v4837_v1, %v1286_v49  ;;  %v1402_v43 = vsub.f32 %v4847_v54, %v1286_v49  ;;  %v7267_v9 = vld [vmem:[#allocation87_spill] sm:$0xff] }
 0x314   : > { %v3404_v0 = vpop.eup %3403  ;;  %v1371_v62 = vpop.permute.xlu0 %1370  ;;  %v1665_v39 = vadd.f32 %v3400_v2, %v3398_v48  ;;  %v7268_v2 = vld [vmem:[#allocation89_spill] sm:$0xff] }
 0x315   : > { %v3406_v13 = vpop.eup %3405  ;;  %3413 = vpow2.f32 %v1497_v46  ;;  %v1493_v31 = vmul.f32 1.442695, %v1401_v58  ;;  %v1495_v35 = vmul.f32 1.442695, %v1402_v43  ;;  %v1435_v40 = vsub.f32 %v4864_v50, %v1371_v62  ;;  %v7255_v50 = vld [vmem:[#allocation82_spill] sm:$0xff]  ;;  %v7270_v58 = vld [vmem:[#allocation91_spill] sm:$0xff] }
 0x316   : > { %v3408_v17 = vpop.eup %3407  ;;  %3415 = vpow2.f32 %v1499_v14  ;;  %v1436_v30 = vsub.f32 %v4879_v15, %v1371_v62  ;;  %1666 = vadd.xlane.f32.xlu0 %v1665_v39  ;;  %v1668_v28 = vadd.f32 %v3404_v0, %v3402_v20  ;;  %v1366_v8 = vpop.permute.xlu1 %1365  ;;  %v7257_v15 = vsub.f32 %v7255_v50, %v7256_v38  ;;  %v1581_v14 = vld [vmem:[#allocation3 + $0x80] sm:$0xff]  ;;  %v7271_v43 = vld [vmem:[#allocation94_spill] sm:$0xff] }
 0x317   : > { %v3410_v61 = vpop.eup %3409  ;;  %3417 = vpow2.f32 %v1493_v31  ;;  %v1561_v1 = vmul.f32 1.442695, %v1435_v40  ;;  %v1433_v54 = vsub.f32 %v4841_v6, %v1366_v8  ;;  %v1434_v32 = vsub.f32 %v4851_v29, %v1366_v8  ;;  %v7264_v29 = vld [vmem:[#allocation83_spill] sm:$0xff]  ;;  %v1851_v31 = vld [vmem:[#allocation4 + $0xe8] sm:$0xff]  ;;  %v7274_v8 = vld [vmem:[#allocation92_spill] sm:$0xff] }
 0x318   : > { %v3412_v53 = vpop.eup %3411  ;;  %3419 = vpow2.f32 %v1495_v35  ;;  %v1563_v18 = vmul.f32 1.442695, %v1436_v30  ;;  %1669 = vadd.xlane.f32.xlu1 %v1668_v28  ;;  %v1713_v7 = vadd.f32 %v3408_v17, %v3406_v13  ;;  %v1181_v52 = vmul.f32 1.442695, %v7257_v15  ;;  %v1565_v30 = vld [vmem:[#allocation3] sm:$0xff]  ;;  %v7273_v28 = vld [vmem:[#allocation90_spill] sm:$0xff] }
 0x319   : > { %3421 = vpow2.f32 %v1561_v1  ;;  %v1557_v55 = vmul.f32 1.442695, %v1433_v54  ;;  %v1559_v22 = vmul.f32 1.442695, %v1434_v32  ;;  %v1716_v51 = vadd.f32 %v3412_v53, %v3410_v61  ;;  %v1566_v53 = vld [vmem:[#allocation3 + $0x8] sm:$0xff]  ;;  %v1583_v50 = vld [vmem:[#allocation3 + $0x90] sm:$0xff] }
 0x31a   : > { %3423 = vpow2.f32 %v1563_v18  ;;  %1714 = vadd.xlane.f32.xlu0 %v1713_v7  ;;  %v1151_v6 = vmul.f32 1.442695, %v7263_v33  ;;  %v7266_v48 = vsub.f32 %v7264_v29, %v7265_v21  ;;  %v7269_v49 = vsub.f32 %v7267_v9, %v7268_v2  ;;  %v7282_v15 = vld [vmem:[#allocation99_spill] sm:$0xff]  ;;  %v7286_v29 = vld [vmem:[#allocation100_spill] sm:$0xff] }
 0x31b   : > { %3425 = vpow2.f32 %v1557_v55  ;;  %v7272_v0 = vsub.f32 %v7270_v58, %v7271_v43  ;;  %v7275_v61 = vsub.f32 %v7273_v28, %v7274_v8  ;;  %v1568_v33 = vld [vmem:[#allocation3 + $0x18] sm:$0xff] }
 0x31c   : > { %3427 = vpow2.f32 %v1559_v22  ;;  %1717 = vadd.xlane.f32.xlu1 %v1716_v51  ;;  %v1183_v16 = vmul.f32 1.442695, %v7266_v48  ;;  %v1153_v20 = vmul.f32 1.442695, %v7269_v49  ;;  %v1582_v22 = vld [vmem:[#allocation3 + $0x88] sm:$0xff]  ;;  %v1584_v49 = vld [vmem:[#allocation3 + $0x98] sm:$0xff] }
 0x31d   : > { %3429 = vpow2.f32 %v1181_v52  ;;  %v1185_v62 = vmul.f32 1.442695, %v7272_v0  ;;  %v1155_v1 = vmul.f32 1.442695, %v7275_v61  ;;  %v7276_v51 = vld [vmem:[#allocation93_spill] sm:$0xff]  ;;  %v7283_v52 = vld [vmem:[#allocation102_spill] sm:$0xff] }
 0x31e   : > { %3431 = vpow2.f32 %v1149_v47  ;;  %v7284_v41 = vsub.f32 %v7282_v15, %v7283_v52 }
 0x31f   : > { %v3414_v36 = vpop.eup %3413  ;;  %3433 = vpow2.f32 %v1151_v6  ;;  %v7285_v6 = vld [vmem:[#allocation97_spill] sm:$0xff] }
 0x320   : > { %v3416_v26 = vpop.eup %3415  ;;  %3435 = vpow2.f32 %v1183_v16  ;;  %v1189_v3 = vmul.f32 1.442695, %v7284_v41  ;;  %v7287_v21 = vsub.f32 %v7285_v6, %v7286_v29 }
 0x321   : > { %v3418_v56 = vpop.eup %3417  ;;  %v1674_v34 = vadd.f32 %v3416_v26, %v3414_v36  ;;  %3437 = vpow2.f32 %v1153_v20  ;;  %v7277_v36 = vld [vmem:[#allocation95_spill] sm:$0xff] }
 0x322   : > { %v3420_v57 = vpop.eup %3419  ;;  %3439 = vpow2.f32 %v1185_v62  ;;  %v7278_v26 = vsub.f32 %v7276_v51, %v7277_v36  ;;  %v1159_v48 = vmul.f32 1.442695, %v7287_v21  ;;  %v1587_v21 = vld [vmem:[#allocation3 + $0xb0] sm:$0xff] }
 0x323   : > { %v3422_v19 = vpop.eup %3421  ;;  %1675 = vadd.xlane.f32.xlu1 %v1674_v34  ;;  %v1671_v5 = vadd.f32 %v3420_v57, %v3418_v56  ;;  %3441 = vpow2.f32 %v1155_v1  ;;  %v1585_v1 = vld [vmem:[#allocation3 + $0xa0] sm:$0xff] }
 0x324   : > { %v3424_v24 = vpop.eup %3423  ;;  %v1187_v56 = vmul.f32 1.442695, %v7278_v26  ;;  %v1570_v26 = vld [vmem:[#allocation3 + $0x28] sm:$0xff] }
 0x325   : > { %v3426_v25 = vpop.eup %3425  ;;  %1672 = vadd.xlane.f32.xlu0 %v1671_v5  ;;  %v1722_v12 = vadd.f32 %v3424_v24, %v3422_v19  ;;  %v1567_v24 = vld [vmem:[#allocation3 + $0x10] sm:$0xff] }
 0x326   : > { %v3428_v37 = vpop.eup %3427  ;;  %3443 = vpow2.f32 %v1187_v56  ;;  %v7297_v56 = vld [vmem:[#allocation105_spill] sm:$0xff] }
 0x327   : > { %1723 = vadd.xlane.f32.xlu1 %v1722_v12  ;;  %v1719_v60 = vadd.f32 %v3428_v37, %v3426_v25  ;;  %v3430_v46 = vpop.eup %3429  ;;  %v7279_v37 = vld [vmem:[#allocation96_spill] sm:$0xff] }
 0x328   : > { %v1613_v39 = vmul.f32 %v3430_v46, %v1581_v14  ;;  %v3432_v40 = vpop.eup %3431  ;;  %v7281_v11 = vsub.f32 %v7279_v37, %v7280_v44  ;;  %v7288_v46 = vld [vmem:[#allocation101_spill] sm:$0xff]  ;;  %v7289_v14 = vld [vmem:[#allocation103_spill] sm:$0xff] }
 0x329   : > { %1720 = vadd.xlane.f32.xlu0 %v1719_v60  ;;  %v3434_v32 = vpop.eup %3433  ;;  %v1597_v18 = vmul.f32 %v3432_v40, %v1565_v30  ;;  %v7290_v58 = vsub.f32 %v7288_v46, %v7289_v14  ;;  %v7300_v37 = vld [vmem:[#allocation109_spill] sm:$0xff]  ;;  %v7301_v44 = vld [vmem:[#allocation111_spill] sm:$0xff] }
 0x32a   : > { %v3436_v7 = vpop.eup %3435  ;;  %v1598_v57 = vmul.f32 %v3434_v32, %v1566_v53  ;;  %v1157_v45 = vmul.f32 1.442695, %v7281_v11  ;;  %v7294_v32 = vld [vmem:[#allocation107_spill] sm:$0xff]  ;;  %v7295_v53 = vld [vmem:[#allocation110_spill] sm:$0xff]  ;;  %v7302_v11 = vsub.f32 %v7300_v37, %v7301_v44  ;;  %v7312_v14 = vld [vmem:[#allocation117_spill] sm:$0xff] }
 0x32b   : > { %2172 = vadd.xlane.f32.xlu1 %v2171_v63  ;;  %v3438_v19 = vpop.eup %3437  ;;  %v1614_v12 = vmul.f32 %v3436_v7, %v1582_v22  ;;  %v1191_v43 = vmul.f32 1.442695, %v7290_v58  ;;  %v1572_v46 = vld [vmem:[#allocation3 + $0x38] sm:$0xff]  ;;  %v7322_v37 = vld [vmem:[#allocation126_spill] sm:$0xff] }
 0x32c   : > { %v1599_v10 = vmul.f32 %v3438_v19, %v1567_v24  ;;  %v3440_v63 = vpop.eup %3439  ;;  %3445 = vpow2.f32 %v1157_v45  ;;  %v1195_v45 = vmul.f32 1.442695, %v7302_v11  ;;  %v7313_v58 = vld [vmem:[#allocation119_spill] sm:$0xff] }
 0x32d   : > { %2169 = vadd.xlane.f32.xlu0 %v2168_v59  ;;  %v1615_v27 = vmul.f32 %v3440_v63, %v1583_v50  ;;  %v3442_v23 = vpop.eup %3441  ;;  %3447 = vpow2.f32 %v1189_v3  ;;  %v1571_v63 = vld [vmem:[#allocation3 + $0x30] sm:$0xff]  ;;  %v7303_v50 = vld [vmem:[#allocation112_spill] sm:$0xff] }
 0x32e   : > { %v1600_v16 = vmul.f32 %v3442_v23, %v1568_v33  ;;  %3449 = vpow2.f32 %v1159_v48  ;;  %v7306_v23 = vld [vmem:[#allocation113_spill] sm:$0xff]  ;;  %v7309_v48 = vld [vmem:[#allocation115_spill] sm:$0xff] }
 0x32f   : > { %3451 = vpow2.f32 %v1191_v43  ;;  %v7314_v43 = vsub.f32 %v7312_v14, %v7313_v58 }
 0x330   : > { %v3444_v9 = vpop.eup %3443 }
 0x331   : > { %v1616_v62 = vmul.f32 %v3444_v9, %v1584_v49 }
 0x336   : > { %v3446_v0 = vpop.eup %3445 }
 0x337   : > { %v3448_v8 = vpop.eup %3447 }
 0x338   : > { %v3450_v51 = vpop.eup %3449 }
 0x339   : > { %v3452_v24 = vpop.eup %3451 }
 0x346   : > { %v1679_v13 = vpop.xlane.xlu0 %1678 }
 0x347   : > { %v1741_v35 = vadd.f32 %v1679_v13, %v1613_v39  ;;  %v1569_v39 = vld [vmem:[#allocation3 + $0x20] sm:$0xff] }
 0x348   : > { %v2167_v17 = vpop.xlane.xlu1 %2166  ;;  %v1601_v28 = vmul.f32 %v3446_v0, %v1569_v39  ;;  %v1199_v0 = vmul.f32 1.442695, %v7314_v43  ;;  %v1591_v43 = vld [vmem:[#allocation3 + $0xd0] sm:$0xff] }
 0x349   : > { %1774 = vst.msk [vmem:[#allocation3 + $0x80] sm:$0xff] %vm6964_vm15, %v1741_v35  ;;  %v2203_v54 = vadd.f32 %v2167_v17, %v1851_v31  ;;  %v7291_v31 = vld [vmem:[#allocation104_spill] sm:$0xff]  ;;  %v7292_v35 = vld [vmem:[#allocation106_spill] sm:$0xff] }
 0x34a   : > { %v7293_v40 = vsub.f32 %v7291_v31, %v7292_v35 }
 0x34b   : > { %2235 = vst.msk [vmem:[#allocation4 + $0xe8] sm:$0xff] %vm6964_vm15, %v2203_v54 }
 0x34c   : > { %v1631_v55 = vpop.xlane.xlu1 %1630  ;;  %v1161_v17 = vmul.f32 1.442695, %v7293_v40  ;;  %v1588_v40 = vld [vmem:[#allocation3 + $0xb8] sm:$0xff] }
 0x34d   : > { %v1725_v34 = vadd.f32 %v1631_v55, %v1597_v18  ;;  %v7296_v18 = vsub.f32 %v7294_v32, %v7295_v53  ;;  %v1617_v55 = vmul.f32 %v3448_v8, %v1585_v1  ;;  %v7316_v32 = vld [vmem:[#allocation122_spill] sm:$0xff] }
 0x34e   : > { %v1634_v5 = vpop.xlane.xlu0 %1633  ;;  %3453 = vpow2.f32 %v1161_v17 }
 0x34f   : > { %1758 = vst.msk [vmem:[#allocation3] sm:$0xff] %vm6964_vm15, %v1725_v34  ;;  %v1726_v25 = vadd.f32 %v1634_v5, %v1598_v57  ;;  %v1193_v7 = vmul.f32 1.442695, %v7296_v18  ;;  %v7298_v34 = vld [vmem:[#allocation108_spill] sm:$0xff]  ;;  %v1602_v5 = vmul.f32 %v3450_v51, %v1570_v26  ;;  %v7318_v26 = vld [vmem:[#allocation121_spill] sm:$0xff] }
 0x350   : > { %v1682_v60 = vpop.xlane.xlu1 %1681  ;;  %v7299_v57 = vsub.f32 %v7297_v56, %v7298_v34  ;;  %v7319_v56 = vld [vmem:[#allocation124_spill] sm:$0xff] }
 0x351   : > { %1759 = vst.msk [vmem:[#allocation3 + $0x8] sm:$0xff] %vm6964_vm15, %v1726_v25  ;;  %v1742_v4 = vadd.f32 %v1682_v60, %v1614_v12  ;;  %3455 = vpow2.f32 %v1193_v7  ;;  %v1586_v12 = vld [vmem:[#allocation3 + $0xa8] sm:$0xff]  ;;  %v7320_v34 = vsub.f32 %v7318_v26, %v7319_v56 }
 0x352   : > { %v1637_v59 = vpop.xlane.xlu0 %1636  ;;  %v1163_v19 = vmul.f32 1.442695, %v7299_v57 }
 0x353   : > { %1775 = vst.msk [vmem:[#allocation3 + $0x88] sm:$0xff] %vm6964_vm15, %v1742_v4  ;;  %v1727_v38 = vadd.f32 %v1637_v59, %v1599_v10  ;;  %v1618_v10 = vmul.f32 %v3452_v24, %v1586_v12  ;;  %v1171_v57 = vmul.f32 1.442695, %v7320_v34  ;;  %v7321_v12 = vld [vmem:[#allocation123_spill] sm:$0xff]  ;;  %v1577_v34 = vld [vmem:[#allocation3 + $0x60] sm:$0xff] }
 0x354   : > { %3457 = vpow2.f32 %v1163_v19  ;;  %v7323_v44 = vsub.f32 %v7321_v12, %v7322_v37  ;;  %v1578_v12 = vld [vmem:[#allocation3 + $0x68] sm:$0xff]  ;;  %v7345_v37 = vld [vmem:[#allocation139_spill] sm:$0xff] }
 0x355   : > { %1760 = vst.msk [vmem:[#allocation3 + $0x10] sm:$0xff] %vm6964_vm15, %v1727_v38  ;;  %3459 = vpow2.f32 %v1195_v45  ;;  %v7304_v38 = vld [vmem:[#allocation114_spill] sm:$0xff] }
 0x356   : > { %v1685_v47 = vpop.xlane.xlu0 %1684  ;;  %v7305_v15 = vsub.f32 %v7303_v50, %v7304_v38  ;;  %v1201_v11 = vmul.f32 1.442695, %v7323_v44  ;;  %v7346_v44 = vld [vmem:[#allocation142_spill] sm:$0xff] }
 0x357   : > { %v1743_v42 = vadd.f32 %v1685_v47, %v1615_v27 }
 0x358   : > { %v3454_v4 = vpop.eup %3453  ;;  %v1165_v52 = vmul.f32 1.442695, %v7305_v15 }
 0x359   : > { %1776 = vst.msk [vmem:[#allocation3 + $0x90] sm:$0xff] %vm6964_vm15, %v1743_v42  ;;  %v1603_v3 = vmul.f32 %v3454_v4, %v1571_v63  ;;  %v7307_v42 = vld [vmem:[#allocation116_spill] sm:$0xff]  ;;  %v7324_v63 = vld [vmem:[#allocation125_spill] sm:$0xff] }
 0x35a   : > { %v1640_v2 = vpop.xlane.xlu1 %1639  ;;  %v7308_v33 = vsub.f32 %v7306_v23, %v7307_v42  ;;  %3461 = vpow2.f32 %v1165_v52  ;;  %v1575_v23 = vld [vmem:[#allocation3 + $0x50] sm:$0xff] }
 0x35b   : > { %v1728_v20 = vadd.f32 %v1640_v2, %v1600_v16  ;;  %v3456_v47 = vpop.eup %3455  ;;  %v7310_v16 = vld [vmem:[#allocation118_spill] sm:$0xff] }
 0x35c   : > { %v1167_v6 = vmul.f32 1.442695, %v7308_v33  ;;  %v7311_v9 = vsub.f32 %v7309_v48, %v7310_v16  ;;  %v7327_v33 = vld [vmem:[#allocation128_spill] sm:$0xff]  ;;  %v1576_v16 = vld [vmem:[#allocation3 + $0x58] sm:$0xff] }
 0x35d   : > { %1761 = vst.msk [vmem:[#allocation3 + $0x18] sm:$0xff] %vm6964_vm15, %v1728_v20  ;;  %v1619_v20 = vmul.f32 %v3456_v47, %v1587_v21 }
 0x35e   : > { %v1688_v13 = vpop.xlane.xlu1 %1687  ;;  %v1197_v2 = vmul.f32 1.442695, %v7311_v9  ;;  %v3458_v49 = vpop.eup %3457  ;;  %3463 = vpow2.f32 %v1167_v6  ;;  %v7328_v6 = vld [vmem:[#allocation130_spill] sm:$0xff] }
 0x35f   : > { %v1744_v30 = vadd.f32 %v1688_v13, %v1616_v62  ;;  %v1604_v13 = vmul.f32 %v3458_v49, %v1572_v46  ;;  %v3460_v31 = vpop.eup %3459  ;;  %v7330_v49 = vld [vmem:[#allocation129_spill] sm:$0xff] }
 0x360   : > { %3465 = vpow2.f32 %v1197_v2 }
 0x361   : > { %1777 = vst.msk [vmem:[#allocation3 + $0x98] sm:$0xff] %vm6964_vm15, %v1744_v30  ;;  %3467 = vpow2.f32 %v1199_v0  ;;  %v1620_v30 = vmul.f32 %v3460_v31, %v1588_v40 }
 0x362   : > { %v1643_v61 = vpop.xlane.xlu0 %1642 }
 0x363   : > { %v1729_v54 = vadd.f32 %v1643_v61, %v1601_v28  ;;  %v1573_v61 = vld [vmem:[#allocation3 + $0x40] sm:$0xff] }
 0x364   : > { %v3462_v28 = vpop.eup %3461 }
 0x365   : > { %1762 = vst.msk [vmem:[#allocation3 + $0x20] sm:$0xff] %vm6964_vm15, %v1729_v54  ;;  %v7315_v54 = vld [vmem:[#allocation120_spill] sm:$0xff] }
 0x366   : > { %v1691_v22 = vpop.xlane.xlu0 %1690  ;;  %v7317_v53 = vsub.f32 %v7315_v54, %v7316_v32 }
 0x367   : > { %v1745_v36 = vadd.f32 %v1691_v22, %v1617_v55  ;;  %v1605_v55 = vmul.f32 %v3462_v28, %v1573_v61  ;;  %v1574_v22 = vld [vmem:[#allocation3 + $0x48] sm:$0xff]  ;;  %v7337_v61 = vld [vmem:[#allocation135_spill] sm:$0xff] }
 0x368   : > { %v1169_v18 = vmul.f32 1.442695, %v7317_v53  ;;  %v3464_v7 = vpop.eup %3463 }
 0x369   : > { %1778 = vst.msk [vmem:[#allocation3 + $0xa0] sm:$0xff] %vm6964_vm15, %v1745_v36  ;;  %v1606_v24 = vmul.f32 %v3464_v7, %v1574_v22  ;;  %v7339_v22 = vld [vmem:[#allocation136_spill] sm:$0xff] }
 0x36a   : > { %v1646_v25 = vpop.xlane.xlu1 %1645  ;;  %v3466_v36 = vpop.eup %3465  ;;  %3469 = vpow2.f32 %v1169_v18 }
 0x36b   : > { %v1730_v60 = vadd.f32 %v1646_v25, %v1602_v5  ;;  %v1589_v5 = vld [vmem:[#allocation3 + $0xc0] sm:$0xff]  ;;  %v3468_v25 = vpop.eup %3467  ;;  %3471 = vpow2.f32 %v1171_v57  ;;  %v7342_v57 = vld [vmem:[#allocation137_spill] sm:$0xff] }
 0x36c   : > { %3473 = vpow2.f32 %v1201_v11  ;;  %v7347_v11 = vsub.f32 %v7345_v37, %v7346_v44 }
 0x36d   : > { %1763 = vst.msk [vmem:[#allocation3 + $0x28] sm:$0xff] %vm6964_vm15, %v1730_v60  ;;  %v1590_v60 = vld [vmem:[#allocation3 + $0xc8] sm:$0xff] }
 0x36e   : > { %v1694_v59 = vpop.xlane.xlu1 %1693 }
 0x36f   : > { %v1746_v41 = vadd.f32 %v1694_v59, %v1618_v10  ;;  %v1621_v10 = vmul.f32 %v3466_v36, %v1589_v5  ;;  %v7325_v59 = vld [vmem:[#allocation127_spill] sm:$0xff] }
 0x370   : > { %v7326_v50 = vsub.f32 %v7324_v63, %v7325_v59  ;;  %v1593_v63 = vld [vmem:[#allocation3 + $0xe0] sm:$0xff]  ;;  %v7348_v59 = vld [vmem:[#allocation141_spill] sm:$0xff] }
 0x371   : > { %1779 = vst.msk [vmem:[#allocation3 + $0xa8] sm:$0xff] %vm6964_vm15, %v1746_v41  ;;  %v1622_v41 = vmul.f32 %v3468_v25, %v1590_v60 }
 0x372   : > { %v1649_v27 = vpop.xlane.xlu0 %1648  ;;  %v1203_v38 = vmul.f32 1.442695, %v7326_v50  ;;  %v7349_v50 = vld [vmem:[#allocation143_spill] sm:$0xff] }
 0x373   : > { %v1731_v29 = vadd.f32 %v1649_v27, %v1603_v3 }
 0x374   : > { %3475 = vpow2.f32 %v1203_v38  ;;  %v3470_v47 = vpop.eup %3469  ;;  %v7350_v38 = vsub.f32 %v7348_v59, %v7349_v50 }
 0x375   : > { %1764 = vst.msk [vmem:[#allocation3 + $0x30] sm:$0xff] %vm6964_vm15, %v1731_v29  ;;  %v3472_v42 = vpop.eup %3471  ;;  %v7329_v29 = vsub.f32 %v7327_v33, %v7328_v6  ;;  %v1607_v48 = vmul.f32 %v3470_v47, %v1575_v23  ;;  %v1594_v47 = vld [vmem:[#allocation3 + $0xe8] sm:$0xff] }
 0x376   : > { %v3474_v2 = vpop.eup %3473  ;;  %v1608_v0 = vmul.f32 %v3472_v42, %v1576_v16 }
 0x377   : > { %v1697_v62 = vpop.xlane.xlu0 %1696  ;;  %v1173_v21 = vmul.f32 1.442695, %v7329_v29  ;;  %v1623_v28 = vmul.f32 %v3474_v2, %v1591_v43 }
 0x378   : > { %v1747_v39 = vadd.f32 %v1697_v62, %v1619_v20  ;;  %v7331_v20 = vld [vmem:[#allocation132_spill] sm:$0xff] }
 0x379   : > { %v7332_v46 = vsub.f32 %v7330_v49, %v7331_v20  ;;  %3477 = vpow2.f32 %v1173_v21  ;;  %v1579_v49 = vld [vmem:[#allocation3 + $0x70] sm:$0xff] }
 0x37a   : > { %1780 = vst.msk [vmem:[#allocation3 + $0xb0] sm:$0xff] %vm6964_vm15, %v1747_v39  ;;  %v1652_v35 = vpop.xlane.xlu1 %1651  ;;  %v7333_v39 = vld [vmem:[#allocation131_spill] sm:$0xff] }
 0x37b   : > { %v1732_v17 = vadd.f32 %v1652_v35, %v1604_v13  ;;  %v1175_v14 = vmul.f32 1.442695, %v7332_v46  ;;  %v7334_v13 = vld [vmem:[#allocation134_spill] sm:$0xff] }
 0x37c   : > { %v7335_v31 = vsub.f32 %v7333_v39, %v7334_v13  ;;  %v1595_v13 = vld [vmem:[#allocation3 + $0xf0] sm:$0xff] }
 0x37d   : > { %1765 = vst.msk [vmem:[#allocation3 + $0x38] sm:$0xff] %vm6964_vm15, %v1732_v17  ;;  %v1592_v17 = vld [vmem:[#allocation3 + $0xd8] sm:$0xff]  ;;  %3479 = vpow2.f32 %v1175_v14 }
 0x37e   : > { %v1700_v8 = vpop.xlane.xlu1 %1699  ;;  %v3476_v62 = vpop.eup %3475  ;;  %v1205_v35 = vmul.f32 1.442695, %v7335_v31 }
 0x37f   : > { %v1748_v1 = vadd.f32 %v1700_v8, %v1620_v30  ;;  %v7336_v8 = vld [vmem:[#allocation133_spill] sm:$0xff]  ;;  %v1624_v18 = vmul.f32 %v3476_v62, %v1592_v17 }
 0x380   : > { %3481 = vpow2.f32 %v1205_v35 }
 0x381   : > { %1781 = vst.msk [vmem:[#allocation3 + $0xb8] sm:$0xff] %vm6964_vm15, %v1748_v1  ;;  %v7338_v1 = vsub.f32 %v7336_v8, %v7337_v61  ;;  %v1853_v8 = vld [vmem:[#allocation4 + $0xf8] sm:$0xff] }
 0x382   : > { %v1655_v51 = vpop.xlane.xlu0 %1654 }
 0x383   : > { %v1733_v19 = vadd.f32 %v1655_v51, %v1605_v55  ;;  %v1207_v54 = vmul.f32 1.442695, %v7338_v1  ;;  %v7340_v51 = vld [vmem:[#allocation138_spill] sm:$0xff]  ;;  %v3478_v56 = vpop.eup %3477 }
 0x384   : > { %v7341_v36 = vsub.f32 %v7339_v22, %v7340_v51  ;;  %v1609_v60 = vmul.f32 %v3478_v56, %v1577_v34 }
 0x385   : > { %1766 = vst.msk [vmem:[#allocation3 + $0x40] sm:$0xff] %vm6964_vm15, %v1733_v19  ;;  %v1658_v45 = vpop.xlane.xlu1 %1657  ;;  %3483 = vpow2.f32 %v1207_v54  ;;  %v7343_v19 = vld [vmem:[#allocation140_spill] sm:$0xff]  ;;  %v1852_v54 = vld [vmem:[#allocation4 + $0xf0] sm:$0xff] }
 0x386   : > { %v1734_v4 = vadd.f32 %v1658_v45, %v1606_v24  ;;  %v1179_v26 = vmul.f32 1.442695, %v7341_v36  ;;  %v7344_v5 = vsub.f32 %v7342_v57, %v7343_v19  ;;  %v1211_v45 = vmul.f32 1.442695, %v7347_v11 }
 0x387   : > { %v1703_v15 = vpop.xlane.xlu0 %1702  ;;  %v3480_v25 = vpop.eup %3479 }
 0x388   : > { %1767 = vst.msk [vmem:[#allocation3 + $0x48] sm:$0xff] %vm6964_vm15, %v1734_v4  ;;  %v1749_v52 = vadd.f32 %v1703_v15, %v1621_v10  ;;  %v1177_v24 = vmul.f32 1.442695, %v7344_v5  ;;  %3485 = vpow2.f32 %v1179_v26  ;;  %v1209_v15 = vmul.f32 1.442695, %v7350_v38 }
 0x389   : > { %v1706_v3 = vpop.xlane.xlu1 %1705 }
 0x38a   : > { %1782 = vst.msk [vmem:[#allocation3 + $0xc0] sm:$0xff] %vm6964_vm15, %v1749_v52  ;;  %v1750_v27 = vadd.f32 %v1706_v3, %v1622_v41  ;;  %v3482_v4 = vpop.eup %3481  ;;  %3487 = vpow2.f32 %v1177_v24  ;;  %v1610_v41 = vmul.f32 %v3480_v25, %v1578_v12 }
 0x38b   : > { %3489 = vpow2.f32 %v1211_v45  ;;  %v1625_v42 = vmul.f32 %v3482_v4, %v1593_v63 }
 0x38c   : > { %1783 = vst.msk [vmem:[#allocation3 + $0xc8] sm:$0xff] %vm6964_vm15, %v1750_v27  ;;  %3491 = vpow2.f32 %v1209_v15 }
 0x38f   : > { %v3484_v3 = vpop.eup %3483 }
 0x390   : > { %v1626_v29 = vmul.f32 %v3484_v3, %v1594_v47 }
 0x392   : > { %v1661_v9 = vpop.xlane.xlu0 %1660  ;;  %v3486_v16 = vpop.eup %3485 }
 0x393   : > { %v1735_v58 = vadd.f32 %v1661_v9, %v1607_v48  ;;  %v1580_v9 = vld [vmem:[#allocation3 + $0x78] sm:$0xff] }
 0x394   : > { %v3488_v2 = vpop.eup %3487  ;;  %v1612_v20 = vmul.f32 %v3486_v16, %v1580_v9 }
 0x395   : > { %1768 = vst.msk [vmem:[#allocation3 + $0x50] sm:$0xff] %vm6964_vm15, %v1735_v58  ;;  %v1664_v40 = vpop.xlane.xlu1 %1663  ;;  %v3490_v46 = vpop.eup %3489  ;;  %v1596_v58 = vld [vmem:[#allocation3 + $0xf8] sm:$0xff] }
 0x396   : > { %v1736_v30 = vadd.f32 %v1664_v40, %v1608_v0  ;;  %v1611_v0 = vmul.f32 %v3488_v2, %v1579_v49  ;;  %v3492_v62 = vpop.eup %3491  ;;  %v1628_v35 = vmul.f32 %v3490_v46, %v1596_v58 }
 0x397   : > { %v1709_v32 = vpop.xlane.xlu0 %1708 }
 0x398   : > { %1769 = vst.msk [vmem:[#allocation3 + $0x58] sm:$0xff] %vm6964_vm15, %v1736_v30  ;;  %v1751_v53 = vadd.f32 %v1709_v32, %v1623_v28  ;;  %v1627_v30 = vmul.f32 %v3492_v62, %v1595_v13 }
 0x399   : > { %v1712_v7 = vpop.xlane.xlu1 %1711 }
 0x39a   : > { %1784 = vst.msk [vmem:[#allocation3 + $0xd0] sm:$0xff] %vm6964_vm15, %v1751_v53  ;;  %v1752_v55 = vadd.f32 %v1712_v7, %v1624_v18 }
 0x39c   : > { %1785 = vst.msk [vmem:[#allocation3 + $0xd8] sm:$0xff] %vm6964_vm15, %v1752_v55 }
 0x3a3   : > { %v1667_v10 = vpop.xlane.xlu0 %1666 }
 0x3a4   : > { %v1737_v52 = vadd.f32 %v1667_v10, %v1609_v60 }
 0x3a5   : > { %v1670_v27 = vpop.xlane.xlu1 %1669 }
 0x3a6   : > { %1770 = vst.msk [vmem:[#allocation3 + $0x60] sm:$0xff] %vm6964_vm15, %v1737_v52  ;;  %v1738_v23 = vadd.f32 %v1670_v27, %v1610_v41 }
 0x3a7   : > { %v1715_v33 = vpop.xlane.xlu0 %1714 }
 0x3a8   : > { %1771 = vst.msk [vmem:[#allocation3 + $0x68] sm:$0xff] %vm6964_vm15, %v1738_v23  ;;  %v1753_v6 = vadd.f32 %v1715_v33, %v1625_v42 }
 0x3a9   : > { %v1718_v21 = vpop.xlane.xlu1 %1717 }
 0x3aa   : > { %1786 = vst.msk [vmem:[#allocation3 + $0xe0] sm:$0xff] %vm6964_vm15, %v1753_v6  ;;  %v1754_v48 = vadd.f32 %v1718_v21, %v1626_v29 }
 0x3ac   : > { %1787 = vst.msk [vmem:[#allocation3 + $0xe8] sm:$0xff] %vm6964_vm15, %v1754_v48 }
 0x3b0   : > { %v1676_v14 = vpop.xlane.xlu1 %1675 }
 0x3b1   : > { %v1740_v43 = vadd.f32 %v1676_v14, %v1612_v20 }
 0x3b2   : > { %v1673_v39 = vpop.xlane.xlu0 %1672 }
 0x3b3   : > { %1773 = vst.msk [vmem:[#allocation3 + $0x78] sm:$0xff] %vm6964_vm15, %v1740_v43  ;;  %v1739_v31 = vadd.f32 %v1673_v39, %v1611_v0 }
 0x3b4   : > { %v1724_v40 = vpop.xlane.xlu1 %1723 }
 0x3b5   : > { %1772 = vst.msk [vmem:[#allocation3 + $0x70] sm:$0xff] %vm6964_vm15, %v1739_v31  ;;  %v1756_v17 = vadd.f32 %v1724_v40, %v1628_v35 }
 0x3b6   : > { %v1721_v28 = vpop.xlane.xlu0 %1720 }
 0x3b7   : > { %1789 = vst.msk [vmem:[#allocation3 + $0xf8] sm:$0xff] %vm6964_vm15, %v1756_v17  ;;  %v1755_v61 = vadd.f32 %v1721_v28, %v1627_v30  ;;  %2241 = sbr.rel (%p3137_p2) target bundleno = 1374 (0x55e), region = 48 }
 0x3b8   : > { %v2173_v1 = vpop.xlane.xlu1 %2172 }
 0x3b9   : > { %1788 = vst.msk [vmem:[#allocation3 + $0xf0] sm:$0xff] %vm6964_vm15, %v1755_v61  ;;  %v2205_v32 = vadd.f32 %v2173_v1, %v1853_v8 }
 0x3ba   : > { %v2170_v53 = vpop.xlane.xlu0 %2169 }
 0x3bb   : > { %2237 = vst.msk [vmem:[#allocation4 + $0xf8] sm:$0xff] %vm6964_vm15, %v2205_v32  ;;  %v2204_v18 = vadd.f32 %v2170_v53, %v1852_v54 }
 0x3bd   : > { %2236 = vst.msk [vmem:[#allocation4 + $0xf0] sm:$0xff] %vm6964_vm15, %v2204_v18 }
 0x3be   : > { %v7351_v7 = vld [vmem:[#allocation52_spill] sm:$0xff]  ;;  %s3138_s30 = sshll.u32 %s3727_s25, 8  ;;  %v7352_v12 = vld [vmem:[#allocation21_spill] sm:$0xff]  ;;  %v7354_v50 = vld [vmem:[#allocation22_spill] sm:$0xff] }
 0x3bf   : > { %v2277_v55 = vadd.s32 8, %v7351_v7  ;;  %v2278_v22 = vadd.s32 16, %v7351_v7  ;;  %v2279_v51 = vadd.s32 24, %v7351_v7  ;;  %v2280_v36 = vadd.s32 32, %v7351_v7  ;;  %v7353_v60 = vld [vmem:[#allocation20_spill] sm:$0xff]  ;;  %v7355_v3 = vld [vmem:[#allocation23_spill] sm:$0xff] }
 0x3c0   : > { %v2281_v26 = vadd.s32 40, %v7351_v7  ;;  %v2282_v56 = vadd.s32 48, %v7351_v7  ;;  %v2283_v34 = vadd.s32 56, %v7351_v7  ;;  %v2284_v57 = vadd.s32 64, %v7351_v7  ;;  %v7356_v33 = vld [vmem:[#allocation24_spill] sm:$0xff]  ;;  %v7357_v16 = vld [vmem:[#allocation25_spill] sm:$0xff] }
 0x3c1   : > { %v2285_v19 = vadd.s32 72, %v7351_v7  ;;  %v2286_v5 = vadd.s32 80, %v7351_v7  ;;  %v2287_v24 = vadd.s32 88, %v7351_v7  ;;  %v2288_v25 = vadd.s32 96, %v7351_v7  ;;  %v7358_v46 = vld [vmem:[#allocation26_spill] sm:$0xff]  ;;  %v7359_v62 = vld [vmem:[#allocation27_spill] sm:$0xff] }
 0x3c2   : > { %vm2242_vm6 = vcmp.ne.s32.totalorder %v7352_v12, 0  ;;  %v2289_v37 = vadd.s32 104, %v7351_v7  ;;  %v2290_v44 = vadd.s32 112, %v7351_v7  ;;  %v2291_v11 = vadd.s32 120, %v7351_v7  ;;  %v7360_v40 = vld [vmem:[#allocation28_spill] sm:$0xff]  ;;  %v7361_v8 = vld [vmem:[#allocation29_spill] sm:$0xff] }
 0x3c3   : > { %v2292_v45 = vadd.s32 128, %v7351_v7  ;;  %vm2243_vm7 = vcmp.ne.s32.totalorder %v7353_v60, 0  ;;  %v2293_v4 = vadd.s32 136, %v7351_v7  ;;  %v2294_v10 = vadd.s32 144, %v7351_v7  ;;  %v7363_v32 = vld [vmem:[#allocation30_spill] sm:$0xff]  ;;  %v7378_v12 = vld [vmem:[#allocation33_spill] sm:$0xff] }
 0x3c4   : > { %v2295_v63 = vadd.s32 152, %v7351_v7  ;;  %v5576_v59 = vstv %s3138_s30  ;;  %vm2244_vm8 = vcmp.ne.s32.totalorder %v7354_v50, 0  ;;  %v2296_v38 = vadd.s32 160, %v7351_v7 }
 0x3c5   : > { %v2297_v15 = vadd.s32 168, %v7351_v7  ;;  %v2298_v52 = vadd.s32 176, %v7351_v7  ;;  %v2299_v41 = vadd.s32 184, %v7351_v7  ;;  %vm2245_vm9 = vcmp.ne.s32.totalorder %v7355_v3, 0  ;;  %v5741_v3 = vld [vmem:[#allocation4 + $0x8] sm:$0xff] }
 0x3c6   : > { %v2300_v27 = vadd.s32 192, %v7351_v7  ;;  %v2301_v47 = vadd.s32 200, %v7351_v7  ;;  %v2302_v23 = vadd.s32 208, %v7351_v7  ;;  %v2303_v42 = vadd.s32 216, %v7351_v7  ;;  %7398 = vst [vmem:[#allocation162_spill] sm:$0xff] %v5741_v3 }
 0x3c7   : > { %vm2246_vm10 = vcmp.ne.s32.totalorder %v7356_v33, 0  ;;  %v2304_v6 = vadd.s32 224, %v7351_v7  ;;  %v2305_v29 = vadd.s32 232, %v7351_v7  ;;  %v2306_v21 = vadd.s32 240, %v7351_v7  ;;  %v5760_v33 = vld [vmem:[#allocation2 + $0x20] sm:$0xff] }
 0x3c8   : > { %v2309_v48 = vadd.s32 %v5576_v59, %v7351_v7  ;;  %vm2247_vm11 = vcmp.ne.s32.totalorder %v7357_v16, 0  ;;  %v2307_v9 = vadd.s32 248, %v7351_v7  ;;  %v2310_v2 = vadd.s32 %v5576_v59, %v2277_v55  ;;  %7405 = vst [vmem:[#allocation166_spill] sm:$0xff] %v5760_v33  ;;  %v5790_v7 = vld [vmem:[#allocation4 + $0x30] sm:$0xff] }
 0x3c9   : > { %v2311_v49 = vadd.s32 %v5576_v59, %v2278_v22  ;;  %v2312_v20 = vadd.s32 %v5576_v59, %v2279_v51  ;;  %v2313_v14 = vadd.s32 %v5576_v59, %v2280_v36  ;;  %v5602_v58 = vadd.s32 %v5576_v59, %v2281_v26  ;;  %v7367_v22 = vld [vmem:[#allocation31_spill] sm:$0xff]  ;;  %7420 = vst [vmem:[#allocation176_spill] sm:$0xff] %v5790_v7 }
 0x3ca   : > { %v5605_v43 = vadd.s32 %v5576_v59, %v2282_v56  ;;  %v5608_v0 = vadd.s32 %v5576_v59, %v2283_v34  ;;  %v5612_v39 = vadd.s32 %v5576_v59, %v2284_v57  ;;  %v5615_v13 = vadd.s32 %v5576_v59, %v2285_v19  ;;  %v7373_v34 = vld [vmem:[#allocation32_spill] sm:$0xff]  ;;  %v7374_v57 = vld [vmem:[#allocation34_spill] sm:$0xff] }
 0x3cb   : > { %v5618_v31 = vadd.s32 %v5576_v59, %v2286_v5  ;;  %v5621_v35 = vadd.s32 %v5576_v59, %v2287_v24  ;;  %v5625_v17 = vadd.s32 %v5576_v59, %v2288_v25  ;;  %v5628_v30 = vadd.s32 %v5576_v59, %v2289_v37  ;;  %v7379_v37 = vld [vmem:[#allocation35_spill] sm:$0xff] }
 0x3cc   : > { %v5631_v28 = vadd.s32 %v5576_v59, %v2290_v44  ;;  %vm2341_vm0 = vcmp.lt.s32.totalorder %v2309_v48, 400  ;;  %v5635_v61 = vadd.s32 %v5576_v59, %v2291_v11  ;;  %v5638_v1 = vadd.s32 %v5576_v59, %v2292_v45  ;;  %v2437_v48 = vld [vmem:[#allocation3] sm:$0xff] }
 0x3cd   : > { %v5641_v54 = vadd.s32 %v5576_v59, %v2293_v4  ;;  %vm2342_vm4 = vcmp.lt.s32.totalorder %v2310_v2, 400  ;;  %v5645_v53 = vadd.s32 %v5576_v59, %v2294_v10  ;;  %v5648_v18 = vadd.s32 %v5576_v59, %v2295_v63  ;;  %vm5666_vm1 = vmand %vm2242_vm6, %vm2341_vm0  ;;  %v7385_v4 = vld [vmem:[#allocation36_spill] sm:$0xff]  ;;  %v5780_v2 = vld [vmem:[#allocation2 + $0x28] sm:$0xff] }
 0x3ce   : > { %v5651_v55 = vadd.s32 %v5576_v59, %v2296_v38  ;;  %vm2343_vm5 = vcmp.lt.s32.totalorder %v2311_v49, 400  ;;  %v5655_v51 = vadd.s32 %v5576_v59, %v2297_v15  ;;  %v5658_v36 = vadd.s32 %v5576_v59, %v2298_v52  ;;  %vm5684_vm6 = vmand %vm2243_vm7, %vm2342_vm4  ;;  %v5723_v38 = vld [vmem:[#allocation2] sm:$0xff]  ;;  %v5737_v52 = vld [vmem:[#allocation2 + $0x8] sm:$0xff]  ;;  %7415 = vst [vmem:[#allocation171_spill] sm:$0xff] %v5780_v2 }
 0x3cf   : > { %7362 = vst [vmem:[#allocation144_spill] sm:$0xff] %v5641_v54  ;;  %7364 = vst [vmem:[#allocation145_spill] sm:$0xff] %v5645_v53  ;;  %v5661_v26 = vadd.s32 %v5576_v59, %v2299_v41  ;;  %vm2344_vm15 = vcmp.lt.s32.totalorder %v2312_v20, 400  ;;  %v7370_v56 = vmov 0  ;;  %v5673_v19 = vadd.s32 %v5576_v59, %v2300_v27  ;;  %v5739_v41 = vld [vmem:[#allocation4] sm:$0xff]  ;;  %v5782_v49 = vld [vmem:[#allocation2 + $0x30] sm:$0xff] }
 0x3d0   : > { %7365 = vst [vmem:[#allocation146_spill] sm:$0xff] %v5648_v18  ;;  %7366 = vst [vmem:[#allocation147_spill] sm:$0xff] %v5651_v55  ;;  %v7371_v56 = vsel %vm5666_vm1, 4294967295, %v7370_v56  ;;  %v5676_v5 = vadd.s32 %v5576_v59, %v2301_v47  ;;  %v5679_v24 = vadd.s32 %v5576_v59, %v2302_v23  ;;  %vm2345_vm14 = vcmp.lt.s32.totalorder %v2313_v14, 400  ;;  %v5756_v23 = vld [vmem:[#allocation2 + $0x10] sm:$0xff]  ;;  %v5784_v20 = vld [vmem:[#allocation2 + $0x38] sm:$0xff] }
 0x3d1   : > { %7368 = vst [vmem:[#allocation148_spill] sm:$0xff] %v5655_v51  ;;  %7369 = vst [vmem:[#allocation149_spill] sm:$0xff] %v5658_v36  ;;  %v7375_v25 = vmov 0  ;;  %v5691_v44 = vadd.s32 %v5576_v59, %v2303_v42  ;;  %v5694_v11 = vadd.s32 %v5576_v59, %v2304_v6  ;;  %v5697_v45 = vadd.s32 %v5576_v59, %v2305_v29  ;;  %v5758_v42 = vld [vmem:[#allocation2 + $0x18] sm:$0xff]  ;;  %v5762_v6 = vld [vmem:[#allocation4 + $0x10] sm:$0xff] }
 0x3d2   : > { %7372 = vst [vmem:[#allocation150_spill] sm:$0xff] %v7371_v56  ;;  %v7376_v25 = vsel %vm5684_vm6, 4294967295, %v7375_v25  ;;  %vm2346_vm3 = vcmp.lt.s32.totalorder %v5602_v58, 400  ;;  %vm5703_vm7 = vmand %vm2244_vm8, %vm2343_vm5  ;;  %v7382_v60 = vmov 0  ;;  %v5709_v10 = vadd.s32 %v5576_v59, %v2306_v21  ;;  %v5764_v29 = vld [vmem:[#allocation4 + $0x18] sm:$0xff]  ;;  %v5766_v21 = vld [vmem:[#allocation4 + $0x20] sm:$0xff] }
 0x3d3   : > { %7377 = vst [vmem:[#allocation151_spill] sm:$0xff] %v7376_v25  ;;  %7380 = vst [vmem:[#allocation152_spill] sm:$0xff] %v5694_v11  ;;  %v7383_v60 = vsel %vm5703_vm7, 4294967295, %v7382_v60  ;;  %v5712_v63 = vadd.s32 %v5576_v59, %v2307_v9  ;;  %v7388_v50 = vmov 0  ;;  %vm2349_vm5 = vcmp.lt.s32.totalorder %v5612_v39, 400  ;;  %v5786_v14 = vld [vmem:[#allocation2 + $0x40] sm:$0xff] }
 0x3d4   : > { %7381 = vst [vmem:[#allocation153_spill] sm:$0xff] %v5697_v45  ;;  %7384 = vst [vmem:[#allocation154_spill] sm:$0xff] %v7383_v60  ;;  %vm2350_vm4 = vcmp.lt.s32.totalorder %v5615_v13, 400  ;;  %v7393_v59 = vmov 0  ;;  %v7400_v47 = vmov 0  ;;  %vm7410_vm12 = vcmp.lt.s32.totalorder %v5605_v43, 400 }
 0x3d5   : > { %7386 = vst [vmem:[#allocation155_spill] sm:$0xff] %v5709_v10  ;;  %7387 = vst [vmem:[#allocation156_spill] sm:$0xff] %v5712_v63  ;;  %vm7411_vm8 = vcmp.ne.s32.totalorder %v7358_v46, 0  ;;  %v7412_v16 = vmov 0  ;;  %v5788_v58 = vld [vmem:[#allocation4 + $0x28] sm:$0xff]  ;;  %v5792_v63 = vld [vmem:[#allocation4 + $0x38] sm:$0xff]  ;;  %3493 = vlog2.f32 %v2437_v48 }
 0x3d6   : > { %vm5719_vm13 = vmand %vm2245_vm9, %vm2344_vm15  ;;  %7391 = vst [vmem:[#allocation158_spill] sm:$0xff] %v5723_v38  ;;  %v5794_v43 = vld [vmem:[#allocation4 + $0x40] sm:$0xff]  ;;  %v7426_v9 = vmov 0  ;;  %v5809_v10 = vld [vmem:[#allocation2 + $0x48] sm:$0xff]  ;;  %v7444_v55 = vmov 0  ;;  %v7455_v48 = vmov 0 }
 0x3d7   : > { %v7389_v50 = vsel %vm5719_vm13, 4294967295, %v7388_v50  ;;  %vm5733_vm0 = vmand %vm2246_vm10, %vm2345_vm14  ;;  %7396 = vst [vmem:[#allocation160_spill] sm:$0xff] %v5737_v52  ;;  %v5811_v27 = vld [vmem:[#allocation2 + $0x50] sm:$0xff]  ;;  %v5813_v53 = vld [vmem:[#allocation4 + $0x48] sm:$0xff] }
 0x3d8   : > { %7390 = vst [vmem:[#allocation157_spill] sm:$0xff] %v7389_v50  ;;  %v7394_v59 = vsel %vm5733_vm0, 4294967295, %v7393_v59  ;;  %7397 = vst [vmem:[#allocation161_spill] sm:$0xff] %v5739_v41  ;;  %v5815_v45 = vld [vmem:[#allocation4 + $0x50] sm:$0xff]  ;;  %v2438_v46 = vld [vmem:[#allocation3 + $0x8] sm:$0xff]  ;;  %v7495_v50 = vmov 0 }
 0x3d9   : > { %7395 = vst [vmem:[#allocation159_spill] sm:$0xff] %v7394_v59  ;;  %vm5752_vm10 = vmand %vm2247_vm11, %vm2346_vm3  ;;  %vm7424_vm3 = vcmp.lt.s32.totalorder %v5608_v0, 400  ;;  %vm7425_vm11 = vcmp.ne.s32.totalorder %v7359_v62, 0  ;;  %v7435_v0 = vmov 0  ;;  %v5829_v62 = vld [vmem:[#allocation2 + $0x58] sm:$0xff]  ;;  %v5831_v18 = vld [vmem:[#allocation2 + $0x60] sm:$0xff]  ;;  %3495 = vlog2.f32 %v2438_v46 }
 0x3da   : > { %v7401_v47 = vsel %vm5752_vm10, 4294967295, %v7400_v47  ;;  %7403 = vst [vmem:[#allocation164_spill] sm:$0xff] %v5756_v23  ;;  %7404 = vst [vmem:[#allocation165_spill] sm:$0xff] %v5758_v42  ;;  %v2439_v39 = vld [vmem:[#allocation3 + $0x10] sm:$0xff]  ;;  %v5853_v51 = vld [vmem:[#allocation2 + $0x68] sm:$0xff] }
 0x3db   : > { %7402 = vst [vmem:[#allocation163_spill] sm:$0xff] %v7401_v47  ;;  %7406 = vst [vmem:[#allocation167_spill] sm:$0xff] %v5762_v6  ;;  %v5857_v15 = vld [vmem:[#allocation4 + $0x68] sm:$0xff]  ;;  %v5859_v54 = vld [vmem:[#allocation4 + $0x70] sm:$0xff]  ;;  %3497 = vlog2.f32 %v2439_v39 }
 0x3dc   : > { %7407 = vst [vmem:[#allocation168_spill] sm:$0xff] %v5764_v29  ;;  %7408 = vst [vmem:[#allocation169_spill] sm:$0xff] %v5766_v21  ;;  %v2440_v13 = vld [vmem:[#allocation3 + $0x18] sm:$0xff]  ;;  %v5886_v36 = vld [vmem:[#allocation2 + $0x88] sm:$0xff] }
 0x3dd   : > { %vm5776_vm2 = vmand %vm7411_vm8, %vm7410_vm12  ;;  %7416 = vst [vmem:[#allocation172_spill] sm:$0xff] %v5782_v49  ;;  %vm7443_vm12 = vcmp.ne.s32.totalorder %v7361_v8, 0  ;;  %vm7454_vm8 = vcmp.ne.s32.totalorder %v7363_v32, 0  ;;  %v2441_v56 = vld [vmem:[#allocation3 + $0x20] sm:$0xff]  ;;  %v7465_v8 = vmov 0  ;;  %v5912_v25 = vld [vmem:[#allocation2 + $0x90] sm:$0xff]  ;;  %3499 = vlog2.f32 %v2440_v13 }
 0x3de   : > { %v7413_v16 = vsel %vm5776_vm2, 4294967295, %v7412_v16  ;;  %7417 = vst [vmem:[#allocation173_spill] sm:$0xff] %v5784_v20  ;;  %7418 = vst [vmem:[#allocation174_spill] sm:$0xff] %v5786_v14  ;;  %v7472_v46 = vld [vmem:[#allocation45_spill] sm:$0xff]  ;;  %v5944_v39 = vld [vmem:[#allocation2 + $0x98] sm:$0xff]  ;;  %3501 = vlog2.f32 %v2441_v56 }
 0x3df   : > { %7414 = vst [vmem:[#allocation170_spill] sm:$0xff] %v7413_v16  ;;  %7419 = vst [vmem:[#allocation175_spill] sm:$0xff] %v5788_v58  ;;  %v5835_v16 = vld [vmem:[#allocation4 + $0x60] sm:$0xff]  ;;  %v5946_v60 = vld [vmem:[#allocation4 + $0x88] sm:$0xff] }
 0x3e0   : > { %7421 = vst [vmem:[#allocation177_spill] sm:$0xff] %v5792_v63  ;;  %7422 = vst [vmem:[#allocation178_spill] sm:$0xff] %v5794_v43  ;;  %v5976_v13 = vld [vmem:[#allocation2 + $0xa0] sm:$0xff]  ;;  %v6001_v59 = vld [vmem:[#allocation4 + $0x98] sm:$0xff] }
 0x3e1   : > { %vm5805_vm9 = vmand %vm7425_vm11, %vm7424_vm3  ;;  %7429 = vst [vmem:[#allocation180_spill] sm:$0xff] %v5809_v10  ;;  %vm7434_vm11 = vcmp.ne.s32.totalorder %v7360_v40, 0  ;;  %v5884_v40 = vld [vmem:[#allocation2 + $0x78] sm:$0xff]  ;;  %v6022_v47 = vld [vmem:[#allocation2 + $0xb0] sm:$0xff] }
 0x3e2   : > { %v7427_v9 = vsel %vm5805_vm9, 4294967295, %v7426_v9  ;;  %7430 = vst [vmem:[#allocation181_spill] sm:$0xff] %v5811_v27  ;;  %7431 = vst [vmem:[#allocation182_spill] sm:$0xff] %v5813_v53  ;;  %v7525_v11 = vld [vmem:[#allocation145_spill] sm:$0xff] }
 0x3e3   : > { %7428 = vst [vmem:[#allocation179_spill] sm:$0xff] %v7427_v9  ;;  %7432 = vst [vmem:[#allocation183_spill] sm:$0xff] %v5815_v45  ;;  %v5833_v9 = vld [vmem:[#allocation4 + $0x58] sm:$0xff] }
 0x3e4   : > { %vm5825_vm3 = vmand %vm7434_vm11, %vm2349_vm5  ;;  %7438 = vst [vmem:[#allocation185_spill] sm:$0xff] %v5829_v62  ;;  %vm7451_vm5 = vcmp.ge.f32.partialorder %v5739_v41, %v5723_v38  ;;  %v5888_v41 = vld [vmem:[#allocation4 + $0x78] sm:$0xff]  ;;  %vm7461_vm11 = vcmp.ge.f32.partialorder %v5741_v3, %v5737_v52  ;;  %v5910_v3 = vld [vmem:[#allocation2 + $0x80] sm:$0xff]  ;;  %v7475_v38 = vmov 0 }
 0x3e5   : > { %v7436_v0 = vsel %vm5825_vm3, 4294967295, %v7435_v0  ;;  %7439 = vst [vmem:[#allocation186_spill] sm:$0xff] %v5831_v18  ;;  %7440 = vst [vmem:[#allocation187_spill] sm:$0xff] %v5833_v9  ;;  %v5914_v52 = vld [vmem:[#allocation4 + $0x80] sm:$0xff] }
 0x3e6   : > { %7437 = vst [vmem:[#allocation184_spill] sm:$0xff] %v7436_v0  ;;  %7441 = vst [vmem:[#allocation188_spill] sm:$0xff] %v5835_v16  ;;  %v5855_v0 = vld [vmem:[#allocation2 + $0x70] sm:$0xff] }
 0x3e7   : > { %vm5849_vm3 = vmand %vm7443_vm12, %vm2350_vm4  ;;  %7447 = vst [vmem:[#allocation190_spill] sm:$0xff] %v5853_v51  ;;  %vm7464_vm4 = vcmp.ne.s32.totalorder %v7367_v22, 0  ;;  %v2442_v22 = vld [vmem:[#allocation3 + $0x28] sm:$0xff]  ;;  %vm7488_vm12 = vcmp.lt.s32.totalorder %v5628_v30, 400 }
 0x3e8   : > { %v7445_v55 = vsel %vm5849_vm3, 4294967295, %v7444_v55  ;;  %7448 = vst [vmem:[#allocation191_spill] sm:$0xff] %v5855_v0  ;;  %7449 = vst [vmem:[#allocation192_spill] sm:$0xff] %v5857_v15  ;;  %vm7453_vm3 = vcmp.lt.s32.totalorder %v5618_v31, 400  ;;  %v6995_v31 = vmov 0   ;;  %3503 = vlog2.f32 %v2442_v22 }
 0x3e9   : > { %7446 = vst [vmem:[#allocation189_spill] sm:$0xff] %v7445_v55  ;;  %7450 = vst [vmem:[#allocation193_spill] sm:$0xff] %v5859_v54 }
 0x3ea   : > { %vm2693_vm14 = vmand %vm5666_vm1, %vm7451_vm5  ;;  %7458 = vst [vmem:[#allocation195_spill] sm:$0xff] %v5884_v40  ;;  %vm7463_vm5 = vcmp.lt.s32.totalorder %v5621_v35, 400 }
 0x3eb   : > { %vm5880_vm9 = vmand %vm7454_vm8, %vm7453_vm3  ;;  %7459 = vst [vmem:[#allocation196_spill] sm:$0xff] %v5886_v36  ;;  %v2725_v32 = vsel %vm2693_vm14, 1, %v6995_v31  ;;  %vm7471_vm3 = vcmp.ge.f32.partialorder %v5762_v6, %v5756_v23  ;;  %vm7474_vm14 = vcmp.ne.s32.totalorder %v7373_v34, 0  ;;  %v2443_v34 = vld [vmem:[#allocation3 + $0x30] sm:$0xff]  ;;  %v7490_v6 = vmov 0 }
 0x3ec   : > { %v7456_v48 = vsel %vm5880_vm9, 4294967295, %v7455_v48  ;;  %7460 = vst [vmem:[#allocation197_spill] sm:$0xff] %v5888_v41  ;;  %vm2694_vm8 = vmand %vm5684_vm6, %vm7461_vm11  ;;  %vm7473_vm6 = vcmp.lt.s32.totalorder %v5625_v17, 400  ;;  %vm7478_vm11 = vcmp.lt.s32.totalorder %v5631_v28, 400  ;;  %v7486_v17 = vmov 0   ;;  %v7527_v36 = vld [vmem:[#allocation38_spill] sm:$0xff] }
 0x3ed   : > { %7457 = vst [vmem:[#allocation194_spill] sm:$0xff] %v7456_v48  ;;  %vm5906_vm15 = vmand %vm7464_vm4, %vm7463_vm5  ;;  %v2726_v35 = vsel %vm2694_vm8, 1, %v6995_v31  ;;  %v7480_v31 = vmov 0  ;;  %vm7489_vm8 = vcmp.ne.s32.totalorder %v7378_v12, 0  ;;  %v7501_v12 = vld [vmem:[#allocation47_spill] sm:$0xff]  ;;  %v7515_v23 = vmov 0 }
 0x3ee   : > { %v7466_v8 = vsel %vm5906_vm15, 4294967295, %v7465_v8  ;;  %7468 = vst [vmem:[#allocation199_spill] sm:$0xff] %v5910_v3  ;;  %7469 = vst [vmem:[#allocation200_spill] sm:$0xff] %v5912_v25  ;;  %3505 = vlog2.f32 %v2443_v34  ;;  %v7541_v25 = vld [vmem:[#allocation39_spill] sm:$0xff]  ;;  %v6137_v48 = vld [vmem:[#allocation4 + $0xc8] sm:$0xff] }
 0x3ef   : > { %7467 = vst [vmem:[#allocation198_spill] sm:$0xff] %v7466_v8  ;;  %7470 = vst [vmem:[#allocation201_spill] sm:$0xff] %v5914_v52  ;;  %v7589_v8 = vld [vmem:[#allocation44_spill] sm:$0xff] }
 0x3f0   : > { %vm2695_vm4 = vmand %vm5703_vm7, %vm7471_vm3  ;;  %vm7479_vm3 = vcmp.ne.s32.totalorder %v7374_v57, 0  ;;  %7483 = vst [vmem:[#allocation204_spill] sm:$0xff] %v5944_v39  ;;  %v7487_v57 = vld [vmem:[#allocation46_spill] sm:$0xff]  ;;  %v7554_v39 = vld [vmem:[#allocation40_spill] sm:$0xff] }
 0x3f1   : > { %vm5932_vm1 = vmand %vm7474_vm14, %vm7473_vm6  ;;  %7484 = vst [vmem:[#allocation205_spill] sm:$0xff] %v5946_v60  ;;  %vm7485_vm14 = vcmp.ge.f32.partialorder %v5764_v29, %v5758_v42  ;;  %v2727_v28 = vsel %vm2695_vm4, 1, %v7486_v17  ;;  %vm7493_vm6 = vcmp.lt.s32.totalorder %v5635_v61, 400  ;;  %v5978_v29 = vld [vmem:[#allocation4 + $0x90] sm:$0xff]  ;;  %v7513_v42 = vld [vmem:[#allocation37_spill] sm:$0xff] }
 0x3f2   : > { %v7476_v38 = vsel %vm5932_vm1, 4294967295, %v7475_v38  ;;  %vm5940_vm7 = vmand %vm7479_vm3, %vm7478_vm11  ;;  %7498 = vst [vmem:[#allocation208_spill] sm:$0xff] %v5978_v29  ;;  %vm7500_vm11 = vcmask 7168   ;;  %vm7502_vm3 = vcmp.lt.s32.totalorder %v5638_v1, 400  ;;  %v7539_v60 = vld [vmem:[#allocation146_spill] sm:$0xff] }
 0x3f3   : > { %7477 = vst [vmem:[#allocation202_spill] sm:$0xff] %v7476_v38  ;;  %v7481_v31 = vsel %vm5940_vm7, 4294967295, %v7480_v31  ;;  %vm2696_vm5 = vmand %vm5719_vm13, %vm7485_vm14  ;;  %vm7494_vm14 = vcmp.ne.s32.totalorder %v7379_v37, 0  ;;  %v2829_v61 = vsel %vm7500_vm11, %v2725_v32, 0  ;;  %v7504_v37 = vmov 0  ;;  %v7552_v32 = vld [vmem:[#allocation147_spill] sm:$0xff] }
 0x3f4   : > { %7482 = vst [vmem:[#allocation203_spill] sm:$0xff] %v7481_v31  ;;  %vm5964_vm7 = vmand %vm7489_vm8, %vm7488_vm12  ;;  %vm7499_vm12 = vcmp.ge.f32.partialorder %v5766_v21, %v5760_v33  ;;  %v2728_v30 = vsel %vm2696_vm5, 1, %v7486_v17  ;;  %v5999_v21 = vld [vmem:[#allocation2 + $0xa8] sm:$0xff]  ;;  %vm7508_vm11 = vcmp.ge.f32.partialorder %v5788_v58, %v5780_v2  ;;  %v7511_v33 = vld [vmem:[#allocation144_spill] sm:$0xff]  ;;  %vm7514_vm5 = vcmp.ne.s32.totalorder %v7513_v42, 0 }
 0x3f5   : > { %v7491_v6 = vsel %vm5964_vm7, 4294967295, %v7490_v6  ;;  %vm5972_vm13 = vmand %vm7494_vm14, %vm7493_vm6  ;;  %7507 = vst [vmem:[#allocation210_spill] sm:$0xff] %v6001_v59  ;;  %vm7509_vm6 = vcmask 7168   ;;  %vm7512_vm14 = vcmp.lt.s32.totalorder %v7511_v33, 400  ;;  %v6024_v58 = vld [vmem:[#allocation4 + $0xa0] sm:$0xff]  ;;  %v6181_v38 = vld [vmem:[#allocation2 + $0xe8] sm:$0xff] }
 0x3f6   : > { %7492 = vst [vmem:[#allocation206_spill] sm:$0xff] %v7491_v6  ;;  %v7496_v50 = vsel %vm5972_vm13, 4294967295, %v7495_v50  ;;  %vm2697_vm8 = vmand %vm5733_vm0, %vm7499_vm12  ;;  %vm7503_vm13 = vcmp.ne.s32.totalorder %v7385_v4, 0  ;;  %v2830_v56 = vsel %vm7509_vm6, %v2726_v35, 0  ;;  %v2444_v4 = vld [vmem:[#allocation3 + $0x38] sm:$0xff]  ;;  %vm7519_vm6 = vcmp.ge.f32.partialorder %v5790_v7, %v5782_v49  ;;  %v2445_v2 = vld [vmem:[#allocation3 + $0x40] sm:$0xff] }
 0x3f7   : > { %7497 = vst [vmem:[#allocation207_spill] sm:$0xff] %v7496_v50  ;;  %vm5995_vm4 = vmand %vm7503_vm13, %vm7502_vm3  ;;  %v2729_v1 = vsel %vm2697_vm8, 1, %v7486_v17  ;;  %vm7521_vm13 = vcmask 7168   ;;  %vm7526_vm8 = vcmp.lt.s32.totalorder %v7525_v11, 400  ;;  %v7529_v7 = vmov 0  ;;  %v6046_v35 = vld [vmem:[#allocation2 + $0xb8] sm:$0xff] }
 0x3f8   : > { %v7505_v37 = vsel %vm5995_vm4, 4294967295, %v7504_v37  ;;  %vm2698_vm12 = vmand %vm5752_vm10, %vm7508_vm11  ;;  %7518 = vst [vmem:[#allocation211_spill] sm:$0xff] %v6024_v58  ;;  %v2831_v42 = vsel %vm7521_vm13, %v2727_v28, 0  ;;  %vm7528_vm10 = vcmp.ne.s32.totalorder %v7527_v36, 0  ;;  %v6048_v49 = vld [vmem:[#allocation4 + $0xa8] sm:$0xff]  ;;  %v7533_v28 = vld [vmem:[#allocation179_spill] sm:$0xff]  ;;  %3507 = vlog2.f32 %v2444_v4 }
 0x3f9   : > { %7506 = vst [vmem:[#allocation209_spill] sm:$0xff] %v7505_v37  ;;  %vm6018_vm0 = vmand %vm7514_vm5, %vm7512_vm14  ;;  %v2730_v33 = vsel %vm2698_vm12, 1, %v7486_v17  ;;  %vm7535_vm5 = vcmask 7168   ;;  %vm7540_vm12 = vcmp.lt.s32.totalorder %v7539_v60, 400  ;;  %vm7555_vm3 = vcmp.ne.s32.totalorder %v7554_v39, 0  ;;  %v6206_v6 = vld [vmem:[#allocation4 + $0xe0] sm:$0xff] }
 0x3fa   : > { %v7516_v23 = vsel %vm6018_vm0, 4294967295, %v7515_v23  ;;  %vm2699_vm11 = vmand %vm5776_vm2, %vm7519_vm6  ;;  %vm7534_vm6 = vnez %v7533_v28  ;;  %v2832_v36 = vsel %vm7535_vm5, %v2728_v30, 0  ;;  %vm7542_vm2 = vcmp.ne.s32.totalorder %v7541_v25, 0  ;;  %v6070_v28 = vld [vmem:[#allocation2 + $0xc0] sm:$0xff]  ;;  %v7626_v37 = vld [vmem:[#allocation205_spill] sm:$0xff] }
 0x3fb   : > { %7517 = vst [vmem:[#allocation144_spill] sm:$0xff] %v7516_v23  ;;  %vm7522_vm14 = vmmov %vm7521_vm13  ;;  %vm7532_vm13 = vcmp.ge.f32.partialorder %v5792_v63, %v5784_v20  ;;  %v2731_v11 = vsel %vm2699_vm11, 1, %v7486_v17  ;;  %v7543_v63 = vmov 0  ;;  %v6072_v20 = vld [vmem:[#allocation4 + $0xb0] sm:$0xff]  ;;  %v7547_v30 = vld [vmem:[#allocation184_spill] sm:$0xff]  ;;  %vm7553_vm11 = vcmp.lt.s32.totalorder %v7552_v32, 400 }
 0x3fc   : > { %v2833_v22 = vsel %vm7522_vm14, %v2729_v1, 0  ;;  %vm6042_vm0 = vmand %vm7528_vm10, %vm7526_vm8  ;;  %v7551_v23 = vld [vmem:[#allocation156_spill] sm:$0xff]  ;;  %3509 = vlog2.f32 %v2445_v2 }
 0x3fd   : > { %v7530_v7 = vsel %vm6042_vm0, 4294967295, %v7529_v7  ;;  %vm2700_vm14 = vmand %vm7534_vm6, %vm7532_vm13  ;;  %v2834_v34 = vadd.s32 %v2833_v22, %v2829_v61  ;;  %vm7548_vm13 = vnez %v7547_v30  ;;  %v3494_v22 = vpop.eup %3493  ;;  %v6093_v30 = vld [vmem:[#allocation2 + $0xc8] sm:$0xff] }
 0x3fe   : > { %7531 = vst [vmem:[#allocation145_spill] sm:$0xff] %v7530_v7  ;;  %vm7536_vm10 = vmmov %vm7535_vm5  ;;  %v2446_v7 = vld [vmem:[#allocation3 + $0x48] sm:$0xff]  ;;  %vm7546_vm5 = vcmp.ge.f32.partialorder %v5794_v43, %v5786_v14  ;;  %v2732_v60 = vsel %vm2700_vm14, 1, %v7486_v17  ;;  %v7556_v43 = vmov 0  ;;  %v7566_v14 = vmov 0 }
 0x3ff   : > { %v2835_v1 = vsel %vm7536_vm10, %v2730_v33, 0  ;;  %vm6066_vm0 = vmand %vm7542_vm2, %vm7540_vm12  ;;  %vm7549_vm2 = vcmask 7168   ;;  %v2447_v33 = vld [vmem:[#allocation3 + $0x50] sm:$0xff]  ;;  %3511 = vlog2.f32 %v2446_v7 }
 0x400   : > { %v7544_v63 = vsel %vm6066_vm0, 4294967295, %v7543_v63  ;;  %vm2701_vm10 = vmand %vm7548_vm13, %vm7546_vm5  ;;  %v2836_v25 = vadd.s32 %v2835_v1, %v2830_v56  ;;  %v2837_v61 = vsel %vm7549_vm2, %v2731_v11, 0  ;;  %v6095_v56 = vld [vmem:[#allocation4 + $0xb8] sm:$0xff]  ;;  %vm7559_vm5 = vcmp.ge.f32.partialorder %v5813_v53, %v5809_v10  ;;  %v7562_v11 = vld [vmem:[#allocation148_spill] sm:$0xff] }
 0x401   : > { %7545 = vst [vmem:[#allocation146_spill] sm:$0xff] %v7544_v63  ;;  %v7550_v63 = vld [vmem:[#allocation51_spill] sm:$0xff]  ;;  %vm6089_vm6 = vmand %vm7555_vm3, %vm7553_vm11  ;;  %vm7560_vm2 = vnez %v7445_v55  ;;  %v2733_v4 = vsel %vm2701_vm10, 1, %v7486_v17  ;;  %v2838_v39 = vadd.s32 %v2837_v61, %v2831_v42  ;;  %vm7561_vm3 = vcmask 7168   ;;  %v7564_v1 = vld [vmem:[#allocation41_spill] sm:$0xff] }
 0x402   : > { %v7557_v43 = vsel %vm6089_vm6, 4294967295, %v7556_v43  ;;  %vm2702_vm12 = vmand %vm7560_vm2, %vm7559_vm5  ;;  %v2839_v32 = vsel %vm7561_vm3, %v2732_v60, 0  ;;  %vm7563_vm11 = vcmp.lt.s32.totalorder %v7562_v11, 400  ;;  %vm7565_vm8 = vcmp.ne.s32.totalorder %v7564_v1, 0  ;;  %v6116_v53 = vld [vmem:[#allocation4 + $0xc0] sm:$0xff]  ;;  %v2448_v61 = vld [vmem:[#allocation3 + $0x58] sm:$0xff]  ;;  %v3496_v11 = vpop.eup %3495 }
 0x403   : > { %7558 = vst [vmem:[#allocation156_spill] sm:$0xff] %v7557_v43  ;;  %vm6110_vm13 = vmand %vm7565_vm8, %vm7563_vm11  ;;  %v6114_v43 = vld [vmem:[#allocation2 + $0xd0] sm:$0xff]  ;;  %vm7569_vm10 = vcmp.ge.f32.partialorder %v5815_v45, %v5811_v27  ;;  %v2734_v2 = vsel %vm2702_vm12, 1, %v7486_v17  ;;  %v2840_v42 = vadd.s32 %v2839_v32, %v2832_v36  ;;  %vm7570_vm8 = vcmask 7168   ;;  %v7571_v1 = vld [vmem:[#allocation149_spill] sm:$0xff] }
 0x404   : > { %v7567_v14 = vsel %vm6110_vm13, 4294967295, %v7566_v14  ;;  %vm2703_vm3 = vmand %vm5880_vm9, %vm7569_vm10  ;;  %v2841_v60 = vsel %vm7570_vm8, %v2733_v4, 0  ;;  %vm7572_vm11 = vcmp.lt.s32.totalorder %v7571_v1, 400  ;;  %v7573_v55 = vld [vmem:[#allocation42_spill] sm:$0xff]  ;;  %v7575_v10 = vmov 0  ;;  %v6135_v45 = vld [vmem:[#allocation2 + $0xd8] sm:$0xff]  ;;  %v3498_v4 = vpop.eup %3497 }
 0x405   : > { %7568 = vst [vmem:[#allocation147_spill] sm:$0xff] %v7567_v14  ;;  %vm7574_vm14 = vcmp.ne.s32.totalorder %v7573_v55, 0  ;;  %vm7578_vm10 = vcmp.ge.f32.partialorder %v5833_v9, %v5829_v62  ;;  %v2735_v7 = vsel %vm2703_vm3, 1, %v7486_v17  ;;  %v2842_v55 = vadd.s32 %v2841_v60, %v2834_v34  ;;  %v7581_v32 = vld [vmem:[#allocation43_spill] sm:$0xff]  ;;  %v6156_v27 = vld [vmem:[#allocation2 + $0xe0] sm:$0xff]  ;;  %v6158_v9 = vld [vmem:[#allocation4 + $0xd0] sm:$0xff] }
 0x406   : > { %vm6131_vm2 = vmand %vm7574_vm14, %vm7572_vm11  ;;  %vm7579_vm14 = vcmask 7168   ;;  %3513 = vlog2.f32 %v2447_v33  ;;  %vm7580_vm11 = vcmp.lt.s32.totalorder %v5661_v26, 400  ;;  %vm7582_vm5 = vcmp.ne.s32.totalorder %v7581_v32, 0  ;;  %v6171_v32 = vpop.eup %3499 }
 0x407   : > { %v7576_v10 = vsel %vm6131_vm2, 4294967295, %v7575_v10  ;;  %vm2704_vm8 = vmand %vm5906_vm15, %vm7578_vm10  ;;  %v2843_v36 = vsel %vm7579_vm14, %v2734_v2, 0  ;;  %v7583_v1 = vmov 0  ;;  %vm7586_vm10 = vcmp.ge.f32.partialorder %v5835_v16, %v5831_v18  ;;  %v2449_v2 = vld [vmem:[#allocation3 + $0x60] sm:$0xff]  ;;  %v6183_v16 = vld [vmem:[#allocation4 + $0xd8] sm:$0xff] }
 0x408   : > { %7577 = vst [vmem:[#allocation148_spill] sm:$0xff] %v7576_v10  ;;  %vm6152_vm9 = vmand %vm7582_vm5, %vm7580_vm11  ;;  %v2736_v26 = vsel %vm2704_vm8, 1, %v7486_v17  ;;  %v2844_v34 = vadd.s32 %v2843_v36, %v2836_v25  ;;  %vm7587_vm5 = vcmask 7168   ;;  %v6169_v60 = vmul.f32 0.6931472, %v3494_v22  ;;  %v6194_v22 = vpop.eup %3501  ;;  %v6204_v36 = vld [vmem:[#allocation2 + $0xf0] sm:$0xff] }
 0x409   : > { %v7584_v1 = vsel %vm6152_vm9, 4294967295, %v7583_v1  ;;  %vm2705_vm14 = vmand %vm5932_vm1, %vm7586_vm10  ;;  %v2845_v33 = vsel %vm7587_vm5, %v2735_v7, 0  ;;  %vm7588_vm11 = vcmp.lt.s32.totalorder %v5673_v19, 400  ;;  %vm7590_vm3 = vcmp.ne.s32.totalorder %v7589_v8, 0 }
 0x40a   : > { %7585 = vst [vmem:[#allocation149_spill] sm:$0xff] %v7584_v1  ;;  %vm6177_vm12 = vmand %vm7590_vm3, %vm7588_vm11  ;;  %v7591_v62 = vmov 0  ;;  %vm7594_vm10 = vcmp.ge.f32.partialorder %v5857_v15, %v5853_v51  ;;  %v2737_v19 = vsel %vm2705_vm14, 1, %v7486_v17  ;;  %v2846_v8 = vadd.s32 %v2845_v33, %v2838_v39  ;;  %v6219_v33 = vpop.eup %3503  ;;  %v7635_v51 = vld [vmem:[#allocation49_spill] sm:$0xff] }
 0x40b   : > { %v7592_v62 = vsel %vm6177_vm12, 4294967295, %v7591_v62  ;;  %vm2706_vm5 = vmand %vm5964_vm7, %vm7594_vm10  ;;  %vm7595_vm3 = vcmask 7168   ;;  %3515 = vlog2.f32 %v2448_v61  ;;  %vm7596_vm11 = vcmp.lt.s32.totalorder %v5676_v5, 400  ;;  %v2450_v61 = vld [vmem:[#allocation3 + $0x68] sm:$0xff] }
 0x40c   : > { %7593 = vst [vmem:[#allocation212_spill] sm:$0xff] %v7592_v62  ;;  %v2847_v25 = vsel %vm7595_vm3, %v2736_v26, 0  ;;  %vm7597_vm1 = vcmp.ne.s32.totalorder %v7472_v46, 0  ;;  %v7598_v7 = vmov 0  ;;  %vm7601_vm10 = vcmp.ge.f32.partialorder %v5859_v54, %v5855_v0  ;;  %v6231_v54 = vld [vmem:[#allocation4 + $0xe8] sm:$0xff] }
 0x40d   : > { %vm6200_vm15 = vmand %vm7597_vm1, %vm7596_vm11  ;;  %vm7602_vm3 = vnez %v7481_v31  ;;  %v2738_v5 = vsel %vm2706_vm5, 1, %v7486_v17  ;;  %v2848_v46 = vadd.s32 %v2847_v25, %v2840_v42  ;;  %vm7603_vm1 = vcmask 7168   ;;  %v6229_v31 = vld [vmem:[#allocation2 + $0xf8] sm:$0xff]  ;;  %v7633_v0 = vld [vmem:[#allocation153_spill] sm:$0xff] }
 0x40e   : > { %v7599_v7 = vsel %vm6200_vm15, 4294967295, %v7598_v7  ;;  %vm2707_vm8 = vmand %vm7602_vm3, %vm7601_vm10  ;;  %v2849_v39 = vsel %vm7603_vm1, %v2737_v19, 0  ;;  %v6217_v26 = vmul.f32 0.6931472, %v3496_v11  ;;  %vm7604_vm11 = vcmp.lt.s32.totalorder %v5679_v24, 400  ;;  %v2455_v11 = vld [vmem:[#allocation3 + $0x90] sm:$0xff]  ;;  %v6242_v19 = vpop.eup %3505 }
 0x40f   : > { %7600 = vst [vmem:[#allocation213_spill] sm:$0xff] %v7599_v7  ;;  %vm7605_vm14 = vcmp.ne.s32.totalorder %v7487_v57, 0  ;;  %v7606_v15 = vmov 0  ;;  %vm7609_vm10 = vcmp.ge.f32.partialorder %v5888_v41, %v5884_v40  ;;  %vm7610_vm1 = vnez %v7496_v50  ;;  %v6252_v41 = vld [vmem:[#allocation4 + $0xf0] sm:$0xff]  ;;  %v7621_v50 = vld [vmem:[#allocation48_spill] sm:$0xff] }
 0x410   : > { %vm6225_vm7 = vmand %vm7605_vm14, %vm7604_vm11  ;;  %v2739_v24 = vsel %vm2707_vm8, 1, %v7486_v17  ;;  %v2850_v57 = vadd.s32 %v2849_v39, %v2842_v55  ;;  %vm7611_vm14 = vcmask 7168   ;;  %3517 = vlog2.f32 %v2449_v2  ;;  %v2456_v2 = vld [vmem:[#allocation3 + $0x98] sm:$0xff]  ;;  %v7619_v39 = vld [vmem:[#allocation152_spill] sm:$0xff] }
 0x411   : > { %v7607_v15 = vsel %vm6225_vm7, 4294967295, %v7606_v15  ;;  %vm2708_vm3 = vmand %vm7610_vm1, %vm7609_vm10  ;;  %v2851_v42 = vsel %vm7611_vm14, %v2738_v5, 0  ;;  %vm7612_vm11 = vcmp.lt.s32.totalorder %v5691_v44, 400  ;;  %vm7613_vm7 = vcmp.ne.s32.totalorder %v7501_v12, 0 }
 0x412   : > { %7608 = vst [vmem:[#allocation214_spill] sm:$0xff] %v7607_v15  ;;  %vm6248_vm5 = vmand %vm7613_vm7, %vm7612_vm11  ;;  %v7614_v25 = vmov 0  ;;  %vm7617_vm10 = vcmp.ge.f32.partialorder %v5914_v52, %v5910_v3  ;;  %v2740_v55 = vsel %vm2708_vm3, 1, %v7486_v17  ;;  %v2852_v44 = vadd.s32 %v2851_v42, %v2844_v34  ;;  %v6273_v52 = vld [vmem:[#allocation4 + $0xf8] sm:$0xff]  ;;  %v7627_v34 = vld [vmem:[#allocation196_spill] sm:$0xff]  ;;  %v6284_v3 = vpop.eup %3507 }
 0x413   : > { %v7615_v25 = vsel %vm6248_vm5, 4294967295, %v7614_v25  ;;  %vm2709_vm14 = vmand %vm5995_vm4, %vm7617_vm10  ;;  %vm7618_vm1 = vcmask 7168   ;;  %v6263_v5 = vmul.f32 0.6931472, %v3498_v4  ;;  %vm7620_vm7 = vcmp.lt.s32.totalorder %v7619_v39, 400  ;;  %v2457_v39 = vld [vmem:[#allocation3 + $0xa0] sm:$0xff] }
 0x414   : > { %7616 = vst [vmem:[#allocation215_spill] sm:$0xff] %v7615_v25  ;;  %v2853_v12 = vsel %vm7618_vm1, %v2739_v24, 0  ;;  %vm7622_vm11 = vcmp.ne.s32.totalorder %v7621_v50, 0  ;;  %v7623_v40 = vmov 0  ;;  %vm7628_vm3 = vcmp.ge.f32.partialorder %v7626_v37, %v7627_v34  ;;  %v7629_v24 = vld [vmem:[#allocation144_spill] sm:$0xff]  ;;  %7632 = vst [vmem:[#allocation216_spill] sm:$0xff] %v6284_v3 }
 0x415   : > { %vm6269_vm5 = vmand %vm7622_vm11, %vm7620_vm7  ;;  %vm7630_vm1 = vnez %v7629_v24  ;;  %v2741_v4 = vsel %vm2709_vm14, 1, %v7486_v17  ;;  %v2854_v42 = vadd.s32 %v2853_v12, %v2846_v8  ;;  %vm7631_vm4 = vcmask 7168   ;;  %v7640_v24 = vld [vmem:[#allocation200_spill] sm:$0xff]  ;;  %v7642_v8 = vld [vmem:[#allocation145_spill] sm:$0xff] }
 0x416   : > { %v7624_v40 = vsel %vm6269_vm5, 4294967295, %v7623_v40  ;;  %vm2710_vm8 = vmand %vm7630_vm1, %vm7628_vm3  ;;  %v2855_v50 = vsel %vm7631_vm4, %v2740_v55, 0  ;;  %3519 = vlog2.f32 %v2450_v61  ;;  %vm7634_vm7 = vcmp.lt.s32.totalorder %v7633_v0, 400  ;;  %v2458_v12 = vld [vmem:[#allocation3 + $0xa8] sm:$0xff]  ;;  %v7645_v37 = vld [vmem:[#allocation155_spill] sm:$0xff] }
 0x417   : > { %7625 = vst [vmem:[#allocation152_spill] sm:$0xff] %v7624_v40  ;;  %vm7636_vm11 = vcmp.ne.s32.totalorder %v7635_v51, 0  ;;  %v7637_v18 = vmov 0  ;;  %vm7641_vm14 = vcmp.ge.f32.partialorder %v5978_v29, %v7640_v24  ;;  %vm7643_vm4 = vnez %v7642_v8  ;;  %v6303_v51 = vpop.eup %3509  ;;  %v7647_v34 = vld [vmem:[#allocation50_spill] sm:$0xff]  ;;  %v7652_v8 = vld [vmem:[#allocation204_spill] sm:$0xff] }
 0x418   : > { %vm6290_vm10 = vmand %vm7636_vm11, %vm7634_vm7  ;;  %v2742_v61 = vsel %vm2710_vm8, 1, %v7486_v17  ;;  %v2856_v55 = vadd.s32 %v2855_v50, %v2848_v46  ;;  %vm7644_vm5 = vcmask 7168   ;;  %3521 = vlog2.f32 %v2455_v11  ;;  %v2459_v50 = vld [vmem:[#allocation3 + $0xb0] sm:$0xff] }
 0x419   : > { %v7638_v18 = vsel %vm6290_vm10, 4294967295, %v7637_v18  ;;  %vm2711_vm1 = vmand %vm7643_vm4, %vm7641_vm14  ;;  %v2857_v0 = vsel %vm7644_vm5, %v2741_v4, 0  ;;  %vm7646_vm7 = vcmp.lt.s32.totalorder %v7645_v37, 400  ;;  %vm7648_vm11 = vcmp.ne.s32.totalorder %v7647_v34, 0  ;;  %v6322_v34 = vpop.eup %3511 }
 0x41a   : > { %7639 = vst [vmem:[#allocation153_spill] sm:$0xff] %v7638_v18  ;;  %vm6309_vm3 = vmand %vm7648_vm11, %vm7646_vm7  ;;  %v7649_v3 = vmov 0  ;;  %vm7653_vm8 = vcmp.ge.f32.partialorder %v6001_v59, %v7652_v8  ;;  %v2743_v11 = vsel %vm2711_vm1, 1, %v7486_v17  ;;  %v2858_v4 = vadd.s32 %v2857_v0, %v2850_v57  ;;  %v2460_v0 = vld [vmem:[#allocation3 + $0xb8] sm:$0xff]  ;;  %v2461_v59 = vld [vmem:[#allocation3 + $0xc0] sm:$0xff] }
 0x41b   : > { %v7650_v3 = vsel %vm6309_vm3, 4294967295, %v7649_v3  ;;  %vm2712_vm5 = vmand %vm6066_vm0, %vm7653_vm8  ;;  %vm7655_vm4 = vcmask 7168   ;;  %3523 = vlog2.f32 %v2456_v2  ;;  %vm7656_vm7 = vcmp.lt.s32.totalorder %v7551_v23, 400  ;;  %v7691_v18 = vld [vmem:[#allocation158_spill] sm:$0xff] }
 0x41c   : > { %7651 = vst [vmem:[#allocation200_spill] sm:$0xff] %v7650_v3  ;;  %v2859_v37 = vsel %vm7655_vm4, %v2742_v61, 0  ;;  %vm7657_vm11 = vcmp.ne.s32.totalorder %v7550_v63, 0  ;;  %v7658_v29 = vmov 0  ;;  %vm7661_vm1 = vcmp.ge.f32.partialorder %v6024_v58, %v5976_v13  ;;  %v6341_v63 = vpop.eup %3513 }
 0x41d   : > { %vm6328_vm14 = vmand %vm7657_vm11, %vm7656_vm7  ;;  %v2744_v2 = vsel %vm2712_vm5, 1, %v7486_v17  ;;  %v2860_v61 = vadd.s32 %v2859_v37, %v2852_v44  ;;  %vm7663_vm0 = vcmask 7168   ;;  %3525 = vlog2.f32 %v2457_v39  ;;  %v2462_v37 = vld [vmem:[#allocation3 + $0xc8] sm:$0xff]  ;;  %v6357_v14 = vpop.eup %3515 }
 0x41e   : > { %v7659_v29 = vsel %vm6328_vm14, 4294967295, %v7658_v29  ;;  %vm2713_vm4 = vmand %vm6089_vm6, %vm7661_vm1  ;;  %v2861_v23 = vsel %vm7663_vm0, %v2743_v11, 0  ;;  %vm7664_vm7 = vcmp.ge.f32.partialorder %v6048_v49, %v5999_v21  ;;  %3527 = vlog2.f32 %v2458_v12  ;;  %7668 = vst [vmem:[#allocation204_spill] sm:$0xff] %v6357_v14  ;;  %v6373_v14 = vpop.eup %3517 }
 0x41f   : > { %7660 = vst [vmem:[#allocation155_spill] sm:$0xff] %v7659_v29  ;;  %vm2714_vm11 = vmand %vm6110_vm13, %vm7664_vm7  ;;  %v2745_v46 = vsel %vm2713_vm4, 1, %v7486_v17  ;;  %v2862_v58 = vadd.s32 %v2861_v23, %v2854_v42  ;;  %3529 = vlog2.f32 %v2459_v50  ;;  %v2463_v23 = vld [vmem:[#allocation3 + $0xd0] sm:$0xff]  ;;  %v2510_v62 = vmul.f32 0.6931472, %v6194_v22  ;;  %v7699_v22 = vld [vmem:[#allocation165_spill] sm:$0xff] }
 0x420   : > { %vm7665_vm8 = vmmov %vm7663_vm0  ;;  %vm7666_vm0 = vcmp.ge.f32.partialorder %v6072_v20, %v6022_v47  ;;  %v2746_v44 = vsel %vm2714_vm11, 1, %v7486_v17  ;;  %3531 = vlog2.f32 %v2460_v0  ;;  %vm7671_vm11 = vcmp.ge.f32.partialorder %v6116_v53, %v6070_v28  ;;  %7672 = vst [vmem:[#allocation217_spill] sm:$0xff] %v6373_v14  ;;  %v6389_v14 = vpop.eup %3519 }
 0x421   : > { %v2863_v57 = vsel %vm7665_vm8, %v2744_v2, 0  ;;  %vm2715_vm5 = vmand %vm6131_vm2, %vm7666_vm0  ;;  %3533 = vlog2.f32 %v2461_v59  ;;  %7678 = vst [vmem:[#allocation218_spill] sm:$0xff] %v6389_v14  ;;  %v2468_v14 = vld [vmem:[#allocation3 + $0xf8] sm:$0xff]  ;;  %v6460_v1 = vmul.f32 0.6931472, %v6322_v34 }
 0x422   : > { %v2864_v39 = vadd.s32 %v2863_v57, %v2856_v55  ;;  %vm7667_vm1 = vmmov %vm7665_vm8  ;;  %vm7669_vm8 = vcmp.ge.f32.partialorder %v6095_v56, %v6046_v35  ;;  %v2747_v42 = vsel %vm2715_vm5, 1, %v7486_v17  ;;  %v2464_v57 = vld [vmem:[#allocation3 + $0xd8] sm:$0xff]  ;;  %vm7673_vm5 = vcmp.ge.f32.partialorder %v6137_v48, %v6093_v30 }
 0x423   : > { %v2865_v11 = vsel %vm7667_vm1, %v2745_v46, 0  ;;  %vm2716_vm4 = vmand %vm6152_vm9, %vm7669_vm8  ;;  %v2869_v50 = vsel %vm7667_vm1, %v2747_v42, 0  ;;  %3535 = vlog2.f32 %v2462_v37  ;;  %7703 = vst [vmem:[#allocation165_spill] sm:$0xff] %v6460_v1 }
 0x424   : > { %v2866_v12 = vadd.s32 %v2865_v11, %v2858_v4  ;;  %vm7670_vm7 = vmmov %vm7667_vm1  ;;  %v2748_v55 = vsel %vm2716_vm4, 1, %v7486_v17  ;;  %v2870_v0 = vadd.s32 %v2869_v50, %v2862_v58  ;;  %v2465_v11 = vld [vmem:[#allocation3 + $0xe0] sm:$0xff]  ;;  %vm7675_vm4 = vcmp.ge.f32.partialorder %v6158_v9, %v6114_v43  ;;  %v2467_v50 = vld [vmem:[#allocation3 + $0xf0] sm:$0xff] }
 0x425   : > { %v2867_v2 = vsel %vm7670_vm7, %v2746_v44, 0  ;;  %vm2717_vm0 = vmand %vm6177_vm12, %vm7671_vm11  ;;  %vm7676_vm11 = vnez %v7607_v15  ;;  %3537 = vlog2.f32 %v2463_v23 }
 0x426   : > { %v2868_v46 = vadd.s32 %v2867_v2, %v2860_v61  ;;  %vm2718_vm8 = vmand %vm6200_vm15, %vm7673_vm5  ;;  %v2749_v4 = vsel %vm2717_vm0, 1, %v7486_v17  ;;  %v2466_v2 = vld [vmem:[#allocation3 + $0xe8] sm:$0xff]  ;;  %vm7679_vm0 = vcmp.ge.f32.partialorder %v6183_v16, %v6135_v45  ;;  %vm7680_vm5 = vnez %v7615_v25 }
 0x427   : > { %vm7674_vm7 = vmmov %vm7667_vm1  ;;  %v2750_v59 = vsel %vm2718_vm8, 1, %v7486_v17  ;;  %3539 = vlog2.f32 %v2464_v57  ;;  %vm7683_vm8 = vnez %v7624_v40  ;;  %v6432_v25 = vadd.f32 %v6169_v60, %v7691_v18  ;;  %v7696_v60 = vld [vmem:[#allocation164_spill] sm:$0xff] }
 0x428   : > { %v2871_v44 = vsel %vm7674_vm7, %v2748_v55, 0  ;;  %vm2719_vm1 = vmand %vm7676_vm11, %vm7675_vm4  ;;  %3541 = vlog2.f32 %v2465_v11 }
 0x429   : > { %v2872_v61 = vadd.s32 %v2871_v44, %v2864_v39  ;;  %vm7677_vm12 = vmmov %vm7674_vm7  ;;  %v2751_v58 = vsel %vm2719_vm1, 1, %v7486_v17  ;;  %v6398_v39 = vpop.eup %3521  ;;  %3543 = vlog2.f32 %v2466_v2  ;;  %7692 = vst [vmem:[#allocation158_spill] sm:$0xff] %v6432_v25 }
 0x42a   : > { %v2873_v42 = vsel %vm7677_vm12, %v2749_v4, 0  ;;  %vm2720_vm7 = vmand %vm7680_vm5, %vm7679_vm0  ;;  %3545 = vlog2.f32 %v2467_v50 }
 0x42b   : > { %v2874_v37 = vadd.s32 %v2873_v42, %v2866_v12  ;;  %vm7681_vm15 = vmmov %vm7677_vm12  ;;  %vm7682_vm12 = vcmp.ge.f32.partialorder %v6206_v6, %v6156_v27  ;;  %v2752_v23 = vsel %vm2720_vm7, 1, %v7486_v17  ;;  %v3524_v12 = vpop.eup %3523  ;;  %vm7687_vm7 = vcmp.ge.f32.partialorder %v6252_v41, %v6204_v36 }
 0x42c   : > { %v2875_v55 = vsel %vm7681_vm15, %v2750_v59, 0  ;;  %vm2721_vm4 = vmand %vm7683_vm8, %vm7682_vm12  ;;  %v3526_v40 = vpop.eup %3525  ;;  %3547 = vlog2.f32 %v2468_v14 }
 0x42d   : > { %v2876_v4 = vadd.s32 %v2875_v55, %v2868_v46  ;;  %vm7684_vm11 = vmmov %vm7681_vm15  ;;  %vm7685_vm15 = vcmp.ge.f32.partialorder %v6231_v54, %v6181_v38  ;;  %v2753_v57 = vsel %vm2721_vm4, 1, %v7486_v17  ;;  %v3528_v55 = vpop.eup %3527  ;;  %vm7689_vm4 = vcmp.ge.f32.partialorder %v6273_v52, %v6229_v31 }
 0x42e   : > { %v2877_v44 = vsel %vm7684_vm11, %v2751_v58, 0  ;;  %vm2722_vm1 = vmand %vm6290_vm10, %vm7685_vm15  ;;  %v3530_v3 = vpop.eup %3529 }
 0x42f   : > { %v2878_v59 = vadd.s32 %v2877_v44, %v2870_v0  ;;  %vm7686_vm0 = vmmov %vm7684_vm11  ;;  %v2754_v46 = vsel %vm2722_vm1, 1, %v7486_v17  ;;  %v2451_v44 = vld [vmem:[#allocation3 + $0x70] sm:$0xff]  ;;  %v3532_v29 = vpop.eup %3531 }
 0x430   : > { %v2879_v42 = vsel %vm7686_vm0, %v2752_v23, 0  ;;  %vm2723_vm11 = vmand %vm6309_vm3, %vm7687_vm7  ;;  %v2883_v23 = vsel %vm7686_vm0, %v2754_v46, 0  ;;  %v2508_v46 = vmul.f32 0.6931472, %v6171_v32  ;;  %3549 = vlog2.f32 %v2451_v44 }
 0x431   : > { %v2880_v11 = vadd.s32 %v2879_v42, %v2872_v61  ;;  %vm7688_vm12 = vmmov %vm7686_vm0  ;;  %v2755_v0 = vsel %vm2723_vm11, 1, %v7486_v17  ;;  %v2884_v42 = vadd.s32 %v2883_v23, %v2876_v4  ;;  %v2512_v32 = vmul.f32 0.6931472, %v6219_v33 }
 0x432   : > { %v2881_v58 = vsel %vm7688_vm12, %v2753_v57, 0  ;;  %vm2724_vm15 = vmand %vm6328_vm14, %vm7689_vm4  ;;  %v2452_v57 = vld [vmem:[#allocation3 + $0x78] sm:$0xff]  ;;  %v2518_v33 = vmul.f32 0.6931472, %v6303_v51  ;;  %v2542_v51 = vmul.f32 0.6931472, %v3526_v40 }
 0x433   : > { %v2882_v2 = vadd.s32 %v2881_v58, %v2874_v37  ;;  %v2756_v61 = vsel %vm2724_vm15, 1, %v7486_v17  ;;  %vm7690_vm1 = vmmov %vm7686_vm0  ;;  %v2453_v37 = vld [vmem:[#allocation3 + $0x80] sm:$0xff]  ;;  %v3534_v17 = vpop.eup %3533  ;;  %3551 = vlog2.f32 %v2452_v57  ;;  %v2548_v44 = vmul.f32 0.6931472, %v3532_v29 }
 0x434   : > { %v2885_v50 = vsel %vm7690_vm1, %v2755_v0, 0  ;;  %vm7693_vm7 = vmmov %vm7686_vm0  ;;  %v7694_v58 = vld [vmem:[#allocation160_spill] sm:$0xff]  ;;  %v2454_v0 = vld [vmem:[#allocation3 + $0x88] sm:$0xff]  ;;  %v3536_v18 = vpop.eup %3535  ;;  %3553 = vlog2.f32 %v2453_v37 }
 0x435   : > { %v2886_v15 = vadd.s32 %v2885_v50, %v2878_v59  ;;  %v2887_v7 = vsel %vm7693_vm7, %v2756_v61, 0  ;;  %v6438_v14 = vadd.f32 %v6217_v26, %v7694_v58  ;;  %v2889_v23 = vadd.s32 %v2884_v42, %v2882_v2  ;;  %v3538_v61 = vpop.eup %3537  ;;  %v7702_v37 = vld [vmem:[#allocation166_spill] sm:$0xff]  ;;  %v7707_v26 = vld [vmem:[#allocation172_spill] sm:$0xff] }
 0x436   : > { %v2888_v4 = vadd.s32 %v2887_v7, %v2880_v11  ;;  %v6443_v59 = vadd.f32 %v6263_v5, %v7696_v60  ;;  %v3540_v7 = vpop.eup %3539  ;;  %v2514_v11 = vmul.f32 0.6931472, %v6242_v19  ;;  %3555 = vlog2.f32 %v2454_v0  ;;  %v7701_v60 = vld [vmem:[#allocation216_spill] sm:$0xff] }
 0x437   : > { %7695 = vst [vmem:[#allocation160_spill] sm:$0xff] %v6438_v14  ;;  %v6450_v2 = vadd.f32 %v2508_v46, %v7699_v22  ;;  %v3542_v5 = vpop.eup %3541  ;;  %v6463_v19 = vmul.f32 0.6931472, %v6341_v63  ;;  %v2538_v46 = vmul.f32 0.6931472, %v6398_v39  ;;  %v7706_v14 = vld [vmem:[#allocation171_spill] sm:$0xff] }
 0x438   : > { %7697 = vst [vmem:[#allocation164_spill] sm:$0xff] %v6443_v59  ;;  %v2890_v50 = vadd.s32 %v2888_v4, %v2886_v15  ;;  %v2516_v15 = vmul.f32 0.6931472, %v7701_v60  ;;  %v6457_v4 = vadd.f32 %v2510_v62, %v7702_v37  ;;  %v3544_v58 = vpop.eup %3543  ;;  %v2540_v42 = vmul.f32 0.6931472, %v3524_v12  ;;  %v7708_v59 = vld [vmem:[#allocation173_spill] sm:$0xff] }
 0x439   : > { %7704 = vst [vmem:[#allocation216_spill] sm:$0xff] %v6463_v19  ;;  %v2544_v62 = vmul.f32 0.6931472, %v3528_v55  ;;  %v2546_v37 = vmul.f32 0.6931472, %v3530_v3  ;;  %v6469_v34 = vadd.f32 %v2512_v32, %v7706_v14  ;;  %v6472_v39 = vadd.f32 %v2514_v11, %v7707_v26 }
 0x43a   : > { %v2891_v57 = vadd.s32 %v2890_v50, %v2889_v23  ;;  %v3546_v23 = vpop.eup %3545  ;;  %v2550_v63 = vmul.f32 0.6931472, %v3534_v17  ;;  %v2552_v19 = vmul.f32 0.6931472, %v3536_v18  ;;  %v2554_v25 = vmul.f32 0.6931472, %v3538_v61 }
 0x43b   : > { %v3548_v10 = vpop.eup %3547  ;;  %v2556_v22 = vmul.f32 0.6931472, %v3540_v7  ;;  %v2558_v0 = vmul.f32 0.6931472, %v3542_v5  ;;  %v2560_v29 = vmul.f32 0.6931472, %v3544_v58  ;;  %v2583_v32 = vadd.f32 %v2538_v46, %v7640_v24 }
 0x43c   : > { %v2893_v50 = vshrl.u32 %v2891_v57, 16  ;;  %v2892_v60 = vand.u32 65535, %v2891_v57  ;;  %v6475_v57 = vadd.f32 %v2516_v15, %v7708_v59  ;;  %v6477_v40 = vpop.eup %3549  ;;  %v2562_v12 = vmul.f32 0.6931472, %v3546_v23  ;;  %v7709_v17 = vld [vmem:[#allocation174_spill] sm:$0xff] }
 0x43d   : > { %v2564_v55 = vmul.f32 0.6931472, %v3548_v10  ;;  %v6479_v14 = vpop.eup %3551  ;;  %v6482_v18 = vadd.f32 %v2518_v33, %v7709_v17  ;;  %v2584_v61 = vadd.f32 %v2540_v42, %v7652_v8  ;;  %v2585_v26 = vadd.f32 %v2542_v51, %v5976_v13  ;;  %v7714_v33 = vld [vmem:[#allocation210_spill] sm:$0xff] }
 0x43e   : > { %v2895_v1 = vcvt.s32.f32 %v2893_v50  ;;  %v2894_v3 = vcvt.s32.f32 %v2892_v60  ;;  %v6487_v59 = vpop.eup %3553  ;;  %v2586_v7 = vadd.f32 %v2544_v62, %v5999_v21  ;;  %v2588_v58 = vadd.f32 %v2548_v44, %v6046_v35  ;;  %v7710_v35 = vld [vmem:[#allocation168_spill] sm:$0xff]  ;;  %v7711_v44 = vld [vmem:[#allocation169_spill] sm:$0xff]  ;;  %v7716_v51 = vld [vmem:[#allocation158_spill] sm:$0xff] }
 0x43f   : > { %v2589_v10 = vadd.f32 %v2550_v63, %v6070_v28  ;;  %v2590_v5 = vadd.f32 %v2552_v19, %v6093_v30  ;;  %v2591_v24 = vadd.f32 %v2554_v25, %v6114_v43  ;;  %v2592_v8 = vadd.f32 %v2556_v22, %v6135_v45  ;;  %v7712_v30 = vld [vmem:[#allocation175_spill] sm:$0xff]  ;;  %v7713_v25 = vld [vmem:[#allocation208_spill] sm:$0xff]  ;;  %v7735_v17 = vld [vmem:[#allocation146_spill] sm:$0xff] }
 0x440   : > { %2898 = vadd.xlane.f32.xlu0 %v2895_v1  ;;  %v2587_v1 = vadd.f32 %v2546_v37, %v6022_v47  ;;  %v6493_v11 = vpop.eup %3555  ;;  %v2593_v13 = vadd.f32 %v2558_v0, %v6156_v27  ;;  %v2594_v42 = vadd.f32 %v2560_v29, %v6181_v38  ;;  %v2595_v21 = vadd.f32 %v2562_v12, %v6204_v36  ;;  %v7715_v19 = vld [vmem:[#allocation211_spill] sm:$0xff]  ;;  %v7721_v37 = vld [vmem:[#allocation160_spill] sm:$0xff]  ;;  %v7731_v29 = vld [vmem:[#allocation157_spill] sm:$0xff] }
 0x441   : > { %v2596_v47 = vadd.f32 %v2564_v55, %v6229_v31  ;;  %v2600_v28 = vsub.f32 %v6450_v2, %v7710_v35  ;;  %v2601_v15 = vsub.f32 %v6457_v4, %v7711_v44  ;;  %v2602_v43 = vsub.f32 %v6469_v34, %v7712_v30  ;;  %v7726_v63 = vld [vmem:[#allocation164_spill] sm:$0xff]  ;;  %v7733_v12 = vld [vmem:[#allocation145_spill] sm:$0xff]  ;;  %v7779_v30 = vld [vmem:[#allocation186_spill] sm:$0xff] }
 0x442   : > { %v2615_v45 = vsub.f32 %v2583_v32, %v7713_v25  ;;  %v2616_v27 = vsub.f32 %v2584_v61, %v7714_v33  ;;  %v2617_v46 = vsub.f32 %v2585_v26, %v7715_v19  ;;  %v2618_v38 = vsub.f32 %v2586_v7, %v6048_v49 }
 0x443   : > { %v2619_v36 = vsub.f32 %v2587_v1, %v6072_v20  ;;  %v2620_v31 = vsub.f32 %v2588_v58, %v6095_v56  ;;  %v2621_v2 = vsub.f32 %v2589_v10, %v6116_v53  ;;  %v2622_v0 = vsub.f32 %v2590_v5, %v6137_v48  ;;  %v7717_v20 = vld [vmem:[#allocation161_spill] sm:$0xff]  ;;  %v7719_v56 = vld [vmem:[#allocation150_spill] sm:$0xff] }
 0x444   : > { %2896 = vadd.xlane.f32.xlu0 %v2894_v3  ;;  %v2623_v4 = vsub.f32 %v2591_v24, %v6158_v9  ;;  %v2624_v22 = vsub.f32 %v2592_v8, %v6183_v16  ;;  %v2625_v23 = vsub.f32 %v2593_v13, %v6206_v6  ;;  %v2626_v50 = vsub.f32 %v2594_v42, %v6231_v54  ;;  %v7722_v48 = vld [vmem:[#allocation162_spill] sm:$0xff]  ;;  %v7724_v9 = vld [vmem:[#allocation151_spill] sm:$0xff]  ;;  %v7741_v8 = vld [vmem:[#allocation212_spill] sm:$0xff] }
 0x445   : > { %v2627_v60 = vsub.f32 %v2595_v21, %v6252_v41  ;;  %v2628_v49 = vsub.f32 %v2596_v47, %v6273_v52  ;;  %v7718_v62 = vsub.f32 %v7716_v51, %v7717_v20  ;;  %vm7720_vm11 = vnez %v7719_v56  ;;  %v7727_v6 = vld [vmem:[#allocation167_spill] sm:$0xff]  ;;  %v7729_v54 = vld [vmem:[#allocation154_spill] sm:$0xff]  ;;  %v7743_v42 = vld [vmem:[#allocation213_spill] sm:$0xff] }
 0x446   : > { %v7723_v34 = vsub.f32 %v7721_v37, %v7722_v48  ;;  %vm7725_vm12 = vnez %v7724_v9  ;;  %v7728_v3 = vsub.f32 %v7726_v63, %v7727_v6  ;;  %vm7730_vm4 = vnez %v7729_v54  ;;  %v7745_v47 = vld [vmem:[#allocation214_spill] sm:$0xff]  ;;  %v7758_v51 = vld [vmem:[#allocation204_spill] sm:$0xff]  ;;  %v7762_v37 = vld [vmem:[#allocation177_spill] sm:$0xff] }
 0x447   : > { %v2629_v53 = vsel %vm7720_vm11, %v7718_v62, 0.0  ;;  %vm7732_vm15 = vnez %v7731_v29  ;;  %vm7734_vm0 = vnez %v7733_v12  ;;  %vm7736_vm1 = vnez %v7735_v17  ;;  %v7760_v62 = vld [vmem:[#allocation180_spill] sm:$0xff]  ;;  %v7763_v48 = vld [vmem:[#allocation163_spill] sm:$0xff]  ;;  %v7765_v9 = vld [vmem:[#allocation217_spill] sm:$0xff] }
 0x448   : > { %v2630_v16 = vsel %vm7725_vm12, %v7723_v34, 0.0  ;;  %v2631_v41 = vsel %vm7730_vm4, %v7728_v3, 0.0  ;;  %v2632_v52 = vsel %vm7732_vm15, %v2600_v28, 0.0  ;;  %v6541_v55 = vsel %vm7734_vm0, %v2615_v45, 0.0  ;;  %v7767_v63 = vld [vmem:[#allocation181_spill] sm:$0xff]  ;;  %v7768_v6 = vld [vmem:[#allocation216_spill] sm:$0xff] }
 0x449   : > { %v6545_v32 = vsel %vm7736_vm1, %v2616_v27, 0.0  ;;  %v6549_v26 = vsel %vm6089_vm6, %v2617_v46, 0.0  ;;  %v6553_v1 = vsel %vm6110_vm13, %v2618_v38, 0.0  ;;  %v6557_v10 = vsel %vm6131_vm2, %v2619_v36, 0.0  ;;  %v7769_v54 = vld [vmem:[#allocation178_spill] sm:$0xff]  ;;  %v7780_v27 = vld [vmem:[#allocation183_spill] sm:$0xff] }
 0x44a   : > { %v6561_v24 = vsel %vm6152_vm9, %v2620_v31, 0.0  ;;  %vm7742_vm7 = vnez %v7741_v8  ;;  %vm7744_vm11 = vnez %v7743_v42  ;;  %vm7746_vm6 = vnez %v7745_v47  ;;  %v7770_v29 = vld [vmem:[#allocation170_spill] sm:$0xff]  ;;  %v7776_v8 = vld [vmem:[#allocation179_spill] sm:$0xff] }
 0x44b   : > { %v6565_v13 = vsel %vm7742_vm7, %v2621_v2, 0.0  ;;  %v6569_v21 = vsel %vm7744_vm11, %v2622_v0, 0.0  ;;  %v6573_v35 = vsel %vm7746_vm6, %v2623_v4, 0.0  ;;  %v6577_v44 = vsel %vm7680_vm5, %v2624_v22, 0.0  ;;  %v7754_v2 = vld [vmem:[#allocation176_spill] sm:$0xff]  ;;  %v7755_v4 = vld [vmem:[#allocation159_spill] sm:$0xff] }
 0x44c   : > { %v6581_v25 = vsel %vm7683_vm8, %v2625_v23, 0.0  ;;  %v6585_v33 = vsel %vm6290_vm10, %v2626_v50, 0.0  ;;  %v6589_v19 = vsel %vm6309_vm3, %v2627_v60, 0.0  ;;  %v6593_v38 = vsel %vm6328_vm14, %v2628_v49, 0.0  ;;  %v7761_v49 = vld [vmem:[#allocation165_spill] sm:$0xff]  ;;  %v7772_v17 = vld [vmem:[#allocation218_spill] sm:$0xff] }
 0x44d   : > { %vm7752_vm9 = vcmask 7168   ;;  %v2603_v0 = vsub.f32 %v6472_v39, %v7754_v2  ;;  %vm7756_vm2 = vnez %v7755_v4  ;;  %v2524_v60 = vmul.f32 0.6931472, %v7758_v51  ;;  %v7775_v58 = vld [vmem:[#allocation182_spill] sm:$0xff] }
 0x44e   : > { %v2757_v36 = vsel %vm7752_vm9, %v2629_v53, 0.0  ;;  %vm7753_vm13 = vmmov %vm7752_vm9  ;;  %v2633_v22 = vsel %vm7756_vm2, %v2601_v15, 0.0  ;;  %v2574_v56 = vadd.f32 %v7761_v49, %v7760_v62  ;;  %v2604_v53 = vsub.f32 %v6475_v57, %v7762_v37 }
 0x44f   : > { %v2758_v31 = vsel %vm7753_vm13, %v2630_v16, 0.0  ;;  %vm7757_vm10 = vmmov %vm7752_vm9  ;;  %vm7764_vm14 = vnez %v7763_v48  ;;  %v2526_v16 = vmul.f32 0.6931472, %v7765_v9  ;;  %v2575_v3 = vadd.f32 %v7768_v6, %v7767_v63  ;;  %v7795_v6 = vld [vmem:[#allocation192_spill] sm:$0xff] }
 0x450   : > { %v2759_v23 = vadd.f32 %v2758_v31, %v2757_v36  ;;  %v2760_v50 = vsel %vm7757_vm10, %v2631_v41, 0.0  ;;  %vm7759_vm3 = vmmov %vm7752_vm9  ;;  %v2634_v34 = vsel %vm7764_vm14, %v2602_v43, 0.0  ;;  %v2605_v41 = vsub.f32 %v6482_v18, %v7769_v54  ;;  %v7774_v43 = vld [vmem:[#allocation185_spill] sm:$0xff]  ;;  %v7781_v36 = vld [vmem:[#allocation184_spill] sm:$0xff] }
 0x451   : > { %v2762_v20 = vsel %vm7759_vm3, %v2632_v52, 0.0  ;;  %vm7766_vm5 = vmmov %vm7759_vm3  ;;  %vm7771_vm8 = vnez %v7770_v29  ;;  %v2528_v57 = vmul.f32 0.6931472, %v7772_v17  ;;  %v2576_v7 = vadd.f32 %v2524_v60, %v7774_v43  ;;  %v7786_v60 = vld [vmem:[#allocation189_spill] sm:$0xff]  ;;  %v7796_v54 = vld [vmem:[#allocation198_spill] sm:$0xff] }
 0x452   : > { %v2761_v39 = vadd.f32 %v2760_v50, %v2759_v23  ;;  %v2764_v15 = vsel %vm7766_vm5, %v2633_v22, 0.0  ;;  %v2635_v52 = vsel %vm7771_vm8, %v2603_v0, 0.0  ;;  %vm7773_vm12 = vmmov %vm7759_vm3  ;;  %v2606_v5 = vsub.f32 %v2574_v56, %v7775_v58  ;;  %v7784_v22 = vld [vmem:[#allocation190_spill] sm:$0xff]  ;;  %v7785_v50 = vld [vmem:[#allocation187_spill] sm:$0xff] }
 0x453   : > { %v2766_v61 = vsel %vm7773_vm12, %v2634_v34, 0.0  ;;  %vm7777_vm4 = vnez %v7776_v8  ;;  %v2530_v28 = vmul.f32 0.6931472, %v6477_v40  ;;  %vm7778_vm15 = vmmov %vm7759_vm3  ;;  %v2577_v45 = vadd.f32 %v2526_v16, %v7779_v30  ;;  %v7789_v56 = vld [vmem:[#allocation191_spill] sm:$0xff]  ;;  %v7791_v34 = vld [vmem:[#allocation194_spill] sm:$0xff] }
 0x454   : > { %v2763_v12 = vadd.f32 %v2762_v20, %v2761_v39  ;;  %v2636_v42 = vsel %vm7777_vm4, %v2604_v53, 0.0  ;;  %v2768_v18 = vsel %vm7778_vm15, %v2635_v52, 0.0  ;;  %v2607_v46 = vsub.f32 %v2575_v3, %v7780_v27  ;;  %vm7783_vm1 = vmmov %vm7759_vm3  ;;  %v7790_v53 = vld [vmem:[#allocation188_spill] sm:$0xff]  ;;  %v7799_v52 = vld [vmem:[#allocation199_spill] sm:$0xff] }
 0x455   : > { %vm7782_vm0 = vnez %v7781_v36  ;;  %v2532_v0 = vmul.f32 0.6931472, %v6479_v14  ;;  %v2770_v4 = vsel %vm7783_vm1, %v2636_v42, 0.0  ;;  %v2578_v23 = vadd.f32 %v2528_v57, %v7784_v22  ;;  %vm7788_vm11 = vmmov %vm7783_vm1  ;;  %v7800_v17 = vld [vmem:[#allocation193_spill] sm:$0xff]  ;;  %v7804_v58 = vld [vmem:[#allocation196_spill] sm:$0xff] }
 0x456   : > { %v2765_v47 = vadd.f32 %v2764_v15, %v2763_v12  ;;  %v2637_v31 = vsel %vm7782_vm0, %v2605_v41, 0.0  ;;  %v2608_v51 = vsub.f32 %v2576_v7, %v7785_v50  ;;  %vm7787_vm7 = vnez %v7786_v60  ;;  %vm7793_vm9 = vmmov %vm7783_vm1  ;;  %v7794_v15 = vld [vmem:[#allocation195_spill] sm:$0xff]  ;;  %v7805_v8 = vld [vmem:[#allocation197_spill] sm:$0xff] }
 0x457   : > { %v2638_v40 = vsel %vm7787_vm7, %v2606_v5, 0.0  ;;  %v2534_v62 = vmul.f32 0.6931472, %v6487_v59  ;;  %v2772_v49 = vsel %vm7788_vm11, %v2637_v31, 0.0  ;;  %v2579_v37 = vadd.f32 %v2530_v28, %v7789_v56  ;;  %vm7798_vm2 = vmmov %vm7783_vm1  ;;  %v7814_v22 = vld [vmem:[#allocation207_spill] sm:$0xff]  ;;  %v7817_v60 = vld [vmem:[#allocation209_spill] sm:$0xff] }
 0x458   : > { %v2767_v2 = vadd.f32 %v2766_v61, %v2765_v47  ;;  %v2609_v48 = vsub.f32 %v2577_v45, %v7790_v53  ;;  %vm7792_vm6 = vnez %v7791_v34  ;;  %v2536_v9 = vmul.f32 0.6931472, %v6493_v11  ;;  %v7801_v61 = vld [vmem:[#allocation202_spill] sm:$0xff]  ;;  %vm7803_vm3 = vmmov %vm7783_vm1  ;;  %v7809_v45 = vld [vmem:[#allocation201_spill] sm:$0xff] }
 0x459   : > { %v2639_v14 = vsel %vm7792_vm6, %v2607_v46, 0.0  ;;  %v2774_v16 = vsel %vm7793_vm9, %v2638_v40, 0.0  ;;  %v2580_v63 = vadd.f32 %v2532_v0, %v7794_v15  ;;  %v2610_v3 = vsub.f32 %v2578_v23, %v7795_v6  ;;  %v7806_v47 = vld [vmem:[#allocation206_spill] sm:$0xff]  ;;  %vm7808_vm5 = vmmov %vm7783_vm1  ;;  %v7810_v46 = vld [vmem:[#allocation203_spill] sm:$0xff] }
 0x45a   : > { %v2769_v20 = vadd.f32 %v2768_v18, %v2767_v2  ;;  %vm7797_vm13 = vnez %v7796_v54  ;;  %v2776_v29 = vsel %vm7798_vm2, %v2639_v14, 0.0  ;;  %v2581_v12 = vadd.f32 %v2534_v62, %v7799_v52  ;;  %vm7812_vm12 = vmmov %vm7783_vm1  ;;  %v7813_v0 = vld [vmem:[#allocation205_spill] sm:$0xff] }
 0x45b   : > { %v2640_v59 = vsel %vm7797_vm13, %v2608_v51, 0.0  ;;  %v2611_v57 = vsub.f32 %v2579_v37, %v7800_v17  ;;  %vm7802_vm10 = vnez %v7801_v61  ;;  %v2582_v5 = vadd.f32 %v2536_v9, %v7804_v58  ;;  %vm7816_vm15 = vmmov %vm7783_vm1 }
 0x45c   : > { %v2771_v39 = vadd.f32 %v2770_v4, %v2769_v20  ;;  %v2641_v43 = vsel %vm7802_vm10, %v2609_v48, 0.0  ;;  %v2778_v7 = vsel %vm7803_vm3, %v2640_v59, 0.0  ;;  %v2612_v42 = vsub.f32 %v2580_v63, %v7805_v8  ;;  %vm7821_vm11 = vmmov %vm7783_vm1 }
 0x45d   : > { %vm7807_vm14 = vnez %v7806_v47  ;;  %v2780_v30 = vsel %vm7808_vm5, %v2641_v43, 0.0  ;;  %v2613_v27 = vsub.f32 %v2581_v12, %v7809_v45  ;;  %vm7811_vm8 = vnez %v7810_v46  ;;  %vm7822_vm6 = vmmov %vm7783_vm1 }
 0x45e   : > { %v2773_v41 = vadd.f32 %v2772_v49, %v2771_v39  ;;  %v2642_v28 = vsel %vm7807_vm14, %v2610_v3, 0.0  ;;  %v2643_v36 = vsel %vm7811_vm8, %v2611_v57, 0.0  ;;  %v2614_v4 = vsub.f32 %v2582_v5, %v7813_v0  ;;  %v7819_v49 = vld [vmem:[#allocation144_spill] sm:$0xff]  ;;  %vm7823_vm9 = vmmov %vm7783_vm1 }
 0x45f   : > { %v2782_v2 = vsel %vm7812_vm12, %v2642_v28, 0.0  ;;  %vm7815_vm4 = vnez %v7814_v22  ;;  %v2784_v51 = vsel %vm7816_vm15, %v2643_v36, 0.0  ;;  %vm7818_vm0 = vnez %v7817_v60  ;;  %vm7824_vm13 = vmmov %vm7783_vm1  ;;  %v7838_v22 = vld [vmem:[#allocation53_spill] sm:$0xff] }
 0x460   : > { %v2775_v11 = vadd.f32 %v2774_v16, %v2773_v41  ;;  %v2644_v23 = vsel %vm7815_vm4, %v2612_v42, 0.0  ;;  %v2645_v40 = vsel %vm7818_vm0, %v2613_v27, 0.0  ;;  %vm7820_vm7 = vnez %v7819_v49  ;;  %vm7825_vm2 = vmmov %vm7783_vm1 }
 0x461   : > { %v2786_v62 = vsel %vm7783_vm1, %v2644_v23, 0.0  ;;  %v2646_v56 = vsel %vm7820_vm7, %v2614_v4, 0.0  ;;  %v2788_v53 = vsel %vm7821_vm11, %v2645_v40, 0.0  ;;  %v2792_v39 = vsel %vm7823_vm9, %v6541_v55, 0.0  ;;  %vm7826_vm10 = vmmov %vm7783_vm1  ;;  %v7837_v4 = vld [vmem:[#allocation52_spill] sm:$0xff] }
 0x462   : > { %v2777_v18 = vadd.f32 %v2776_v29, %v2775_v11  ;;  %v2790_v34 = vsel %vm7822_vm6, %v2646_v56, 0.0  ;;  %v2794_v16 = vsel %vm7824_vm13, %v6545_v32, 0.0  ;;  %v2796_v63 = vsel %vm7825_vm2, %v6549_v26, 0.0  ;;  %vm7827_vm3 = vmmov %vm7783_vm1 }
 0x463   : > { %v2798_v3 = vsel %vm7826_vm10, %v6553_v1, 0.0  ;;  %v2800_v59 = vsel %vm7827_vm3, %v6557_v10, 0.0  ;;  %vm7828_vm14 = vmmov %vm7783_vm1  ;;  %vm2911_vm11 = vcmp.eq.s32.totalorder %v7837_v4, 0  ;;  %vm2912_vm6 = vcmp.eq.s32.totalorder %v7838_v22, 0 }
 0x464   : > { %v2779_v31 = vadd.f32 %v2778_v7, %v2777_v18  ;;  %v2802_v55 = vsel %vm7828_vm14, %v6561_v24, 0.0  ;;  %vm7829_vm5 = vmmov %vm7783_vm1 }
 0x465   : > { %v2804_v32 = vsel %vm7829_vm5, %v6565_v13, 0.0  ;;  %vm7830_vm8 = vmmov %vm7783_vm1 }
 0x466   : > { %v2781_v50 = vadd.f32 %v2780_v30, %v2779_v31  ;;  %v2806_v26 = vsel %vm7830_vm8, %v6569_v21, 0.0  ;;  %vm7831_vm12 = vmmov %vm7783_vm1 }
 0x467   : > { %v2808_v1 = vsel %vm7831_vm12, %v6573_v35, 0.0  ;;  %vm7832_vm4 = vmmov %vm7783_vm1 }
 0x468   : > { %v2783_v20 = vadd.f32 %v2782_v2, %v2781_v50  ;;  %v2810_v10 = vsel %vm7832_vm4, %v6577_v44, 0.0  ;;  %vm7833_vm15 = vmmov %vm7783_vm1 }
 0x469   : > { %v2812_v24 = vsel %vm7833_vm15, %v6581_v25, 0.0  ;;  %vm7834_vm0 = vmmov %vm7783_vm1 }
 0x46a   : > { %v2785_v37 = vadd.f32 %v2784_v51, %v2783_v20  ;;  %v2814_v13 = vsel %vm7834_vm0, %v6585_v33, 0.0  ;;  %vm7835_vm1 = vmmov %vm7834_vm0 }
 0x46b   : > { %v2816_v21 = vsel %vm7835_vm1, %v6589_v19, 0.0  ;;  %vm7836_vm7 = vmmov %vm7834_vm0 }
 0x46c   : > { %v2787_v48 = vadd.f32 %v2786_v62, %v2785_v37  ;;  %v2818_v35 = vsel %vm7836_vm7, %v6593_v38, 0.0  ;;  %vm2913_vm9 = vmand %vm2911_vm11, %vm2912_vm6 }
 0x46e   : > { %v2789_v14 = vadd.f32 %v2788_v53, %v2787_v48 }
 0x470   : > { %v2791_v9 = vadd.f32 %v2790_v34, %v2789_v14 }
 0x472   : > { %v2793_v15 = vadd.f32 %v2792_v39, %v2791_v9 }
 0x474   : > { %v2795_v6 = vadd.f32 %v2794_v16, %v2793_v15 }
 0x476   : > { %v2797_v54 = vadd.f32 %v2796_v63, %v2795_v6 }
 0x478   : > { %v2799_v41 = vadd.f32 %v2798_v3, %v2797_v54 }
 0x47a   : > { %v2801_v29 = vadd.f32 %v2800_v59, %v2799_v41 }
 0x47c   : > { %v2803_v52 = vadd.f32 %v2802_v55, %v2801_v29 }
 0x47e   : > { %v2805_v12 = vadd.f32 %v2804_v32, %v2803_v52 }
 0x480   : > { %v2807_v17 = vadd.f32 %v2806_v26, %v2805_v12 }
 0x482   : > { %v2809_v57 = vadd.f32 %v2808_v1, %v2807_v17 }
 0x484   : > { %v2811_v61 = vadd.f32 %v2810_v10, %v2809_v57 }
 0x486   : > { %v2813_v43 = vadd.f32 %v2812_v24, %v2811_v61 }
 0x488   : > { %v2815_v11 = vadd.f32 %v2814_v13, %v2813_v43 }
 0x48a   : > { %v2817_v7 = vadd.f32 %v2816_v21, %v2815_v11 }
 0x48c   : > { %v2819_v58 = vadd.f32 %v2818_v35, %v2817_v7 }
 0x48e   : > { %2820 = vadd.xlane.f32.xlu1 %v2819_v58 }
 0x4cd   : > { %v2899_v44 = vpop.xlane.xlu0 %2898 }
 0x4ce   : > { %v2901_v5 = vcvt.f32.s32 %v2899_v44 }
 0x4d0   : > { %v2902_v25 = vshll.u32 %v2901_v5, 16 }
 0x4d1   : > { %v2897_v8 = vpop.xlane.xlu0 %2896 }
 0x4d2   : > { %v2900_v42 = vcvt.f32.s32 %v2897_v8 }
 0x4d4   : > { %v2903_v47 = vadd.s32 %v2902_v25, %v2900_v42 }
 0x4d6   : > { %v2904_v28 = vrot.slane %v2903_v47, 4 }
 0x4d8   : > { %v2905_v18 = vadd.s32 %v2904_v28, %v2903_v47 }
 0x4da   : > { %v2906_v30 = vrot.slane %v2905_v18, 2 }
 0x4dc   : > { %v2907_v19 = vadd.s32 %v2906_v30, %v2905_v18 }
 0x4de   : > { %v2908_v38 = vrot.slane %v2907_v19, 1 }
 0x4e0   : > { %v2909_v0 = vadd.s32 %v2908_v38, %v2907_v19 }
 0x51b   : > { %v2821_v33 = vpop.xlane.xlu1 %2820 }
 0x51c   : > { %v2822_v45 = vrot.slane %v2821_v33, 4 }
 0x51e   : > { %v2823_v27 = vadd.f32 %v2822_v45, %v2821_v33 }
 0x520   : > { %v2824_v46 = vrot.slane %v2823_v27, 2 }
 0x522   : > { %v2825_v36 = vadd.f32 %v2824_v46, %v2823_v27 }
 0x524   : > { %v2826_v31 = vrot.slane %v2825_v36, 1 }
 0x526   : > { %v2827_v2 = vadd.f32 %v2826_v31, %v2825_v36 }
 0x528   : > { %3164 = vpush %v2827_v2 }
 0x529   : > { %3166 = vpush %v2909_v0 }
 0x559   : > { %s3165_s24 = spop %3164 }
 0x55a   : > { %s3167_s21 = spop %3166  ;;  %v2914_v23 = vstv %s3165_s24 }
 0x55b   : > { %v2915_v50 = vsel %vm2913_vm9, %v2914_v23, 0.0  ;;  %v2917_v51 = vstv %s3167_s21 }
 0x55c   : > { %2916 = vst [vmem:[%s3960_s1] sm:$0xff] %v2915_v50  ;;  %v2918_v60 = vsel %vm2913_vm9, %v2917_v51, 0 }
 0x55d   : > { %2919 = vst [vmem:[%s3962_s11] sm:$0xff] %v2918_v60 }
 0x55e PF: > { %s3141_s29 = sshll.u32 %s3727_s25, 7  ;;  %s2939_s8 = sshll.u32 %s3960_s1, 4  ;;  %s2940_s8 = int_to_ptr.vmem [resolvable:$true] %s2939_s8 }
 0x55f   : > { %s6712_s23 = scalar_lea.hbm %s6800_s4, %s3141_s29  ;;  %s2921_s6 = scalar_lea.sflag [#allocation7], %s3939_s27 }
 0x560   : > { %s3585_s10 = scalar_lea.vmem %s2940_s8, 128  ;;  %s3748_s7 = smov [#allocation8]  }
 0x561   : > { %p3586_p4 = scmp.ne.s32.totalorder %s2940_s8, %s3585_s10  ;;  %s3589_s26 = sshll.u32 %s3748_s7, 4  ;;  %s3590_s26 = int_to_ptr.vmem [resolvable:$false] %s3589_s26 }
 0x562   : > { %s3591_s9 = scalar_lea.vmem %s3590_s26, 256  ;;  %p3592_p9 = scmp.lt.s32.totalorder %s2940_s8, %s3590_s26 }
 0x563   : > { %p3587_p5 = pnand %p3586_p4, %p3868_p12  ;;  %p3593_p10 = scmp.lt.s32.totalorder %s3591_s9, %s3585_s10 }
 0x565   : > { %p3588_p6 = pneg %p3587_p5  ;;  %p3594_p11 = por %p3593_p10, %p3592_p9 }
 0x567   : > { %p3595_p7 = pnand %p3594_p11, %p3588_p6 }
 0x569   : > { %3598 = shalt.err (!%p3595_p7)
}
 0x56a   : > { %s3599_s1 = scalar_lea.hbm %s6712_s23, 128  ;;  %s3603_s24 = scalar_lea.hbm %s6800_s4, 256 }
 0x56b   : > { %p3600_p13 = scmp.ne.s32.totalorder %s6712_s23, %s3599_s1  ;;  %p3604_p0 = scmp.lt.u32.totalorder %s6712_s23, %s6800_s4 }
 0x56c   : > { %p3605_p8 = scmp.lt.u32.totalorder %s3603_s24, %s3599_s1  ;;  %p3607_p4 = scmp.lt.u32.totalorder %s3599_s1, %s6712_s23 }
 0x56d   : > { %p3601_p1 = pnand %p3600_p13, %p3868_p12 }
 0x56e   : > { %p3606_p2 = por %p3605_p8, %p3604_p0 }
 0x56f   : > { %p3602_p3 = pneg %p3601_p1 }
 0x570   : > { %p3608_p5 = por %p3607_p4, %p3606_p2 }
 0x572   : > { %p3609_p6 = pnand %p3608_p5, %p3602_p3 }
 0x574   : > { %3612 = shalt.err (!%p3609_p6)
}
 0x575   : > { %3169 = dma.vmem_to_hbm [thread:$0]  (%p3868_p12), %s2940_s8, 128, %s6712_s23, %s2921_s6  }
 0x576   : > { %s6738_s7 = scalar_lea.hbm %s6801_s5, %s3141_s29  ;;  %s2952_s26 = sshll.u32 %s3962_s11, 4  ;;  %s2953_s26 = int_to_ptr.vmem [resolvable:$true] %s2952_s26 }
 0x577   : > { %s2926_s9 = scalar_lea.sflag [#allocation10], %s3939_s27  ;;  %s3613_s1 = scalar_lea.vmem %s2953_s26, 128 }
 0x578   : > { %p3614_p9 = scmp.ne.s32.totalorder %s2953_s26, %s3613_s1  ;;  %s3749_s14 = smov [#allocation9]  }
 0x579   : > { %s3617_s30 = sshll.u32 %s3749_s14, 4  ;;  %s3618_s30 = int_to_ptr.vmem [resolvable:$false] %s3617_s30 }
 0x57a   : > { %p3615_p10 = pnand %p3614_p9, %p3868_p12  ;;  %s3619_s24 = scalar_lea.vmem %s3618_s30, 256 }
 0x57b   : > { %p3620_p7 = scmp.lt.s32.totalorder %s2953_s26, %s3618_s30  ;;  %p3621_p13 = scmp.lt.s32.totalorder %s3619_s24, %s3613_s1 }
 0x57c   : > { %p3616_p11 = pneg %p3615_p10 }
 0x57d   : > { %p3622_p1 = por %p3621_p13, %p3620_p7 }
 0x57f   : > { %p3623_p3 = pnand %p3622_p1, %p3616_p11 }
 0x581   : > { %3626 = shalt.err (!%p3623_p3)
}
 0x582   : > { %s3627_s25 = scalar_lea.hbm %s6738_s7, 128  ;;  %s3631_s29 = scalar_lea.hbm %s6801_s5, 256 }
 0x583   : > { %p3628_p0 = scmp.ne.s32.totalorder %s6738_s7, %s3627_s25  ;;  %p3632_p4 = scmp.lt.u32.totalorder %s6738_s7, %s6801_s5 }
 0x584   : > { %p3633_p5 = scmp.lt.u32.totalorder %s3631_s29, %s3627_s25  ;;  %p3635_p9 = scmp.lt.u32.totalorder %s3627_s25, %s6738_s7 }
 0x585   : > { %p3629_p8 = pnand %p3628_p0, %p3868_p12 }
 0x586   : > { %p3634_p6 = por %p3633_p5, %p3632_p4 }
 0x587   : > { %p3630_p2 = pneg %p3629_p8 }
 0x588   : > { %p3636_p10 = por %p3635_p9, %p3634_p6 }
 0x58a   : > { %p3637_p11 = pnand %p3636_p10, %p3630_p2 }
 0x58c   : > { %3640 = shalt.err (!%p3637_p11)
}
 0x58d   : > { %3170 = dma.vmem_to_hbm [thread:$0]  (%p3868_p12), %s2953_s26, 128, %s6738_s7, %s2926_s9  }
 0x58e PF: > { %p3180_p7 = scmp.ge.s32.totalorder %s3739_s28, 2  ;;  %s2964_s6 = sand.u32 1, %s3699_s18  }
 0x58f   : > { %p7839_p13 = scmp.ne.s32.totalorder %s7103_s17, 0  ;;  %s2965_s21 = scalar_lea.sflag [#allocation7], %s2964_s6 }
 0x591   : > { %p3174_p1 = pnand %p3180_p7, %p7839_p13 }
 0x593   : > { %3690 = dma.done.wait (!%p3174_p1), %s2965_s21, 128  }
 0x594   : > { %3692 = vsyncadd (!%p3174_p1), %s2965_s21, 4294967168  ;;  %s2974_s13 = scalar_lea.sflag [#allocation10], %s2964_s6 }
 0x595   : > { %3694 = dma.done.wait (!%p3174_p1), %s2974_s13, 128  }
 0x596   : > { %3696 = vsyncadd (!%p3174_p1), %s2974_s13, 4294967168  ;;  %s25_s28 = sadd.s32 1, %s3739_s28   ;;  %s7840_s16 = sld [smem:[#allocation14_spill]] }
 0x597   : > { %p22_p3 = scmp.ge.s32.totalorder %s25_s28, 6   ;;  %s7841_s23 = sld [smem:[#allocation19_spill]] }
 0x598   : > { %s7842_s24 = sld [smem:[#allocation15_spill]]  ;;  %s7843_s25 = sld [smem:[#allocation16_spill]] }
 0x599   : > { %s7844_s26 = sld [smem:[#allocation17_spill]]  ;;  %s7845_s27 = sld [smem:[#allocation18_spill]] }
 0x59a   : > { %s7846_s18 = smov %s3703_s19  ;;  %s7847_s19 = smov %s3707_s20 }
 0x59b   : > { %s7848_s20 = smov %s3866_s15  ;;  %s7849_s21 = smov %s3715_s22 }
 0x59c   : > { %s7850_s22 = smov %s7840_s16  ;;  %24 = sbr.rel (!%p22_p3) target bundleno = 13 (0xd), region = 115 }
 0x5a3   :  { %2979 = vsyncpa [#allocation6], 1 }
 0x5a4   :  { %2981 = vsyncpa [#allocation6 + $0x1], 1 }
 0x5a5   :  { %2982 = vsyncpa [#allocation7], 1 }
 0x5a6   :  { %2984 = vsyncpa [#allocation7 + $0x1], 1 }
 0x5a7   :  { %2985 = vsyncpa [#allocation10], 1 }
 0x5a8   :  { %2987 = vsyncpa [#allocation10 + $0x1], 1 }

</bundles_post_ra>
